<compile_context>
chip_gen: v6e
topology: v6e:2x2x1
jax: 0.10.0
libtpu: 0.0.40
codegen_flags: <defaults>
</compile_context>

<pallas_src>
import math

import jax
import jax.numpy as jnp
from jax import lax
from jax.experimental import pallas as pl
from jax.experimental.pallas import tpu as pltpu

_CHUNK = 8  # scan steps per chunk (sublane height)


def _silu(v):
  return v / (1.0 + jnp.exp(-v))


def _softplus(v):
  # numerically stable softplus with only max / abs / exp / log
  return jnp.maximum(v, 0.0) + jnp.log(1.0 + jnp.exp(-jnp.abs(v)))


def _gelu_kernel(v):
  # exact GELU via Abramowitz-Stegun 7.1.26 erf polynomial (|err| < 1.5e-7);
  # the divide goes to the EUP via pl.reciprocal.
  s = v * 0.7071067811865476
  a = jnp.abs(s)
  t = pl.reciprocal(1.0 + 0.3275911 * a, approx=True)
  poly = ((((1.061405429 * t - 1.453152027) * t + 1.421413741) * t
           - 0.284496736) * t + 0.254829592) * t
  erf_a = 1.0 - poly * jnp.exp(-a * a)
  erf_s = jnp.where(s >= 0.0, erf_a, -erf_a)
  return 0.5 * v * (1.0 + erf_s)


def _make_mamba_kernel(*, flat_scan, chunk):
  """Builds the kernel; flat_scan selects the lane-flattened scan path."""

  def kernel(x_ref, gamma_ref, beta_ref, win_ref, wconv_ref, bconv_ref,
             wx_ref, wdt_ref, bdt_ref, dpar_ref, wout_ref, *rest):
    if flat_scan:
      (aflat_ref, erep_ref, rrep_ref, gsum_ref, out_ref,
       h_carry, uext_s, y_s, uact_s, z_s, dA_s, bdu_s, cexp_s) = rest
    else:
      (at_ref, out_ref,
       h_carry, uext_s, y_s, uact_s, z_s, delta_s, b_s, c_s) = rest

    lt = pl.program_id(1)
    LT = x_ref.shape[1]
    d_inner = dpar_ref.shape[1]
    d_conv = wconv_ref.shape[0]
    dtr = wdt_ref.shape[0]
    d_state = rrep_ref.shape[0] if flat_scan else at_ref.shape[0]
    cpad = uext_s.shape[0] - LT          # conv tail-carry rows (>= d_conv - 1)

    # ---- reset carried state at the start of every sequence (batch elem) ----
    @pl.when(lt == 0)
    def _():
      h_carry[...] = jnp.zeros_like(h_carry)
      uext_s[pl.ds(0, cpad), :] = jnp.zeros((cpad, d_inner), jnp.float32)

    # ---- LayerNorm over channels (eps = 1e-5, like nn.LayerNorm) ----
    x = x_ref[0]                                          # (LT, C)
    mu = jnp.mean(x, axis=-1, keepdims=True)
    xc = x - mu
    var = jnp.mean(xc * xc, axis=-1, keepdims=True)
    xn = xc * lax.rsqrt(var + 1e-5) * gamma_ref[...] + beta_ref[...]

    # ---- fused in_proj (x-branch | z-branch): one MXU pass ----
    uz = jnp.dot(xn, win_ref[...], preferred_element_type=jnp.float32)
    u = uz[:, :d_inner]                                   # (LT, di)
    z_s[...] = uz[:, d_inner:]                            # stage gate input

    # ---- causal depthwise conv1d + SiLU with cross-tile tail carry ----
    # uext_s rows [0, cpad) hold the previous tile's last cpad u rows
    # (zeros for the first tile); rows [cpad, cpad+LT) hold this tile's u.
    uext_s[pl.ds(cpad, LT), :] = u
    wconv = wconv_ref[...]                                # (d_conv, di)
    conv = None
    for k in range(d_conv):                               # tap k: u[t+k-(dc-1)]
      off = cpad - (d_conv - 1) + k
      tap = uext_s[pl.ds(off, LT), :] * wconv[k:k + 1, :]
      conv = tap if conv is None else conv + tap
    conv = conv + bconv_ref[...]
    # save this tile's tail for the next tile (after the tap reads above)
    uext_s[pl.ds(0, cpad), :] = uext_s[pl.ds(LT, cpad), :]
    u_act = _silu(conv)                                   # (LT, di)
    uact_s[...] = u_act                                   # stage for epilogue

    # ---- fused x_proj -> (dt | B | C), then dt_proj + softplus ----
    dbc = jnp.dot(u_act, wx_ref[...], preferred_element_type=jnp.float32)
    dt = dbc[:, :dtr]
    Bm = dbc[:, dtr:dtr + d_state]
    Cm = dbc[:, dtr + d_state:dtr + 2 * d_state]
    if dtr == 1:
      dpre = dt * wdt_ref[...]                            # rank-1 dt_proj
    else:
      dpre = jnp.dot(dt, wdt_ref[...], preferred_element_type=jnp.float32)
    delta = _softplus(dpre + bdt_ref[...])                # (LT, di)

    n_chunks = LT // chunk

    if flat_scan:
      # ---- whole-tile precompute of the scan operands, lane-flattened:
      #      lane j = s*d_inner + d.  All exps / expansions happen once,
      #      off the serial chain. ----
      e_rep = erep_ref[...]                               # (di, F)
      r_rep = rrep_ref[...]                               # (ds, F)
      delta_rep = jnp.dot(delta, e_rep, preferred_element_type=jnp.float32)
      dA_s[...] = jnp.exp(delta_rep * aflat_ref[...])
      du_rep = jnp.dot(delta * u_act, e_rep,
                       preferred_element_type=jnp.float32)
      bdu_s[...] = jnp.dot(Bm, r_rep,
                           preferred_element_type=jnp.float32) * du_rep
      cexp_s[...] = jnp.dot(Cm, r_rep, preferred_element_type=jnp.float32)
      gsum = gsum_ref[...]                                # (F, di)

      def scan_chunk(base, h):                            # h: (1, F)
        dA = dA_s[pl.ds(base, chunk), :]                  # (8, F)
        bdu = bdu_s[pl.ds(base, chunk), :]                # (8, F)
        hs = []
        for k in range(chunk):                            # serial recurrence
          h = dA[k:k + 1, :] * h + bdu[k:k + 1, :]
          hs.append(h)
        yfull = jnp.concatenate(hs, axis=0) * cexp_s[pl.ds(base, chunk), :]
        # lane-segmented reduce over d_state via one tiny MXU matmul
        y_s[pl.ds(base, chunk), :] = jnp.dot(
            yfull, gsum, preferred_element_type=jnp.float32)
        return h
    else:
      # fallback path: (d_state, d_inner) state, batched per-chunk precompute
      delta_s[...] = delta
      b_s[...] = Bm
      c_s[...] = Cm
      a_t = at_ref[...]                                   # (ds, di)

      def scan_chunk(base, h):                            # h: (ds, di)
        d_ch = delta_s[pl.ds(base, chunk), :]
        u_ch = uact_s[pl.ds(base, chunk), :]
        b_ch = b_s[pl.ds(base, chunk), :]
        c_ch = c_s[pl.ds(base, chunk), :]
        dA_all = jnp.exp(d_ch[:, None, :] * a_t[None, :, :])      # (8, ds, di)
        bdu_all = b_ch[:, :, None] * (d_ch * u_ch)[:, None, :]    # (8, ds, di)
        hs = []
        for k in range(chunk):
          h = dA_all[k] * h + bdu_all[k]
          hs.append(h)
        hst = jnp.stack(hs, axis=0)                       # (8, ds, di)
        y_s[pl.ds(base, chunk), :] = jnp.sum(hst * c_ch[:, :, None], axis=1)
        return h

    # ---- chunk loop, manually unrolled 2x so chunk c+1's loads/precompute
    #      overlap chunk c's serial chain ----
    def pair_body(i, h):
      b0 = pl.multiple_of(i * (2 * chunk), chunk)
      h = scan_chunk(b0, h)
      h = scan_chunk(pl.multiple_of(b0 + chunk, chunk), h)
      return h

    h = lax.fori_loop(0, n_chunks // 2, pair_body, h_carry[...])
    if n_chunks % 2:
      h = scan_chunk((n_chunks - 1) * chunk, h)
    h_carry[...] = h                                      # carry to next tile

    # ---- epilogue: D skip, SiLU(z) gate, out_proj, residual, exact GELU.
    #      Output is written transposed (C, LT) for lane-dense stores. ----
    z = z_s[...]
    gate = z * pl.reciprocal(1.0 + jnp.exp(-z), approx=True)
    y = (y_s[...] + uact_s[...] * dpar_ref[...]) * gate
    out = jnp.dot(y, wout_ref[...], preferred_element_type=jnp.float32) \
        + x_ref[0]
    out_ref[0] = _gelu_kernel(jnp.transpose(out))

  return kernel


def _derive_vmem_limit(LT, C, F, d_inner, d_state, dtr, cpad, weights,
                       flat_scan):
  """vmem_limit_bytes derived from actual block/scratch sizes + margin."""
  blocks = 2 * 2 * LT * C                                 # in + out, 2-buffered
  wts = 2 * sum(int(w.size) for w in weights)
  scr = (cpad + LT) * d_inner + 3 * LT * d_inner + F
  scr += 3 * LT * F if flat_scan else LT * (d_inner + 2 * d_state)
  tmp = LT * (3 * C + 4 * d_inner + 2 * d_state + dtr)    # live full-tile vals
  tmp += 3 * LT * F if flat_scan else 3 * _CHUNK * d_state * d_inner
  need = 4 * (blocks + wts + scr + tmp)                   # f32 bytes
  try:
    cap = int(pltpu.get_tpu_info().vmem_capacity_bytes)
  except Exception:
    cap = 64 * 1024 * 1024
  return int(min(max(2 * need, 16 * 1024 * 1024), cap - 4 * 1024 * 1024))


def mamba_layer_forward(x, p, *, l_tile=512):
  """x: (B, C, *spatial) NCHW-style input; returns the same shape."""
  B, C = x.shape[:2]
  img_dims = x.shape[2:]
  L = math.prod(img_dims)

  d_inner = p["w_in_x"].shape[1]
  d_state = p["w_x_B"].shape[1]
  d_conv = p["w_conv"].shape[0]
  dtr = p["w_x_dt"].shape[1]
  F = d_state * d_inner
  flat_scan = F <= 128                    # lane-flattened scan fits one vreg row

  # sequence padding / tiling: the tile length is a multiple of 128 (so the
  # transposed output blocks are lane-dense) unless one tile covers everything.
  Lc = ((L + _CHUNK - 1) // _CHUNK) * _CHUNK
  LT = Lc if Lc <= l_tile else max(128, (l_tile // 128) * 128)
  Lp = ((Lc + LT - 1) // LT) * LT
  NT = Lp // LT

  x_flat = jnp.transpose(x.reshape(B, C, L), (0, 2, 1)).astype(jnp.float32)
  if Lp != L:
    x_flat = jnp.pad(x_flat, ((0, 0), (0, Lp - L), (0, 0)))

  # fused projection weights (one MXU pass each)
  # TODO(synk): 128-align the w_in / w_x column boundaries when d_inner >= 128
  # so the uz / dbc lane slices stay tile-aligned.
  w_in = jnp.concatenate([p["w_in_x"], p["w_in_z"]], axis=1)            # (C,2di)
  w_x = jnp.concatenate([p["w_x_dt"], p["w_x_B"], p["w_x_C"]], axis=1)  # (di,..)
  a_t = -jnp.exp(p["a_log_t"])                                          # (ds,di)

  weights = [p["gamma"], p["beta"], w_in, p["w_conv"], p["b_conv"], w_x,
             p["w_dt"], p["b_dt"], p["d_par"], p["w_out"]]
  if flat_scan:
    lane = jnp.arange(F)
    e_rep = (lane[None, :] % d_inner
             == jnp.arange(d_inner)[:, None]).astype(jnp.float32)       # (di,F)
    r_rep = (lane[None, :] // d_inner
             == jnp.arange(d_state)[:, None]).astype(jnp.float32)       # (ds,F)
    weights += [a_t.reshape(1, F), e_rep, r_rep, e_rep.T]
  else:
    weights += [a_t]

  in_specs = [pl.BlockSpec((1, LT, C), lambda b, l: (b, l, 0))]
  for w in weights:
    in_specs.append(pl.BlockSpec(w.shape, lambda b, l, n=w.ndim: (0,) * n))
  out_specs = pl.BlockSpec((1, C, LT), lambda b, l: (b, 0, l))

  cpad = max(_CHUNK, ((d_conv - 1 + 7) // 8) * 8)
  scratch = [
      pltpu.VMEM((1, F) if flat_scan else (d_state, d_inner), jnp.float32),
      pltpu.VMEM((cpad + LT, d_inner), jnp.float32),   # conv staging + carry
      pltpu.VMEM((LT, d_inner), jnp.float32),          # y (scan output)
      pltpu.VMEM((LT, d_inner), jnp.float32),          # u_act (staged)
      pltpu.VMEM((LT, d_inner), jnp.float32),          # z (staged)
  ]
  if flat_scan:
    scratch += [pltpu.VMEM((LT, F), jnp.float32) for _ in range(3)]  # dA,Bdu,C
  else:
    scratch += [pltpu.VMEM((LT, d_inner), jnp.float32),              # delta
                pltpu.VMEM((LT, d_state), jnp.float32),              # B
                pltpu.VMEM((LT, d_state), jnp.float32)]              # C

  kernel = _make_mamba_kernel(flat_scan=flat_scan, chunk=_CHUNK)

  # TODO(synk): when B == 1 add a second parallel axis over independent
  # d_inner blocks so both v7x TensorCores are used.
  out_flat = pl.pallas_call(
      kernel,
      out_shape=jax.ShapeDtypeStruct((B, C, Lp), jnp.float32),
      grid_spec=pltpu.PrefetchScalarGridSpec(
          num_scalar_prefetch=0,
          grid=(B, NT),
          in_specs=in_specs,
          out_specs=out_specs,
          scratch_shapes=scratch),
      compiler_params=pltpu.CompilerParams(
          dimension_semantics=("parallel", "arbitrary"),
          vmem_limit_bytes=_derive_vmem_limit(
              LT, C, F, d_inner, d_state, dtr, cpad, weights, flat_scan)),
  )(x_flat, *weights)

  return out_flat[:, :, :L].reshape(B, C, *img_dims)


def init_params(dim, d_state=16, d_conv=4, expand=2):
  d_inner = expand * dim
  dt_rank = math.ceil(dim / 16)
  ks = jax.random.split(jax.random.PRNGKey(1), 7)
  s = 0.2
  in_proj_w = s * jax.random.normal(ks[0], (2 * d_inner, dim), jnp.float32)
  conv_w = s * jax.random.normal(ks[1], (d_inner, d_conv), jnp.float32)
  conv_b = s * jax.random.normal(ks[2], (d_inner,), jnp.float32)
  x_proj_w = s * jax.random.normal(ks[3], (dt_rank + 2 * d_state, d_inner),
                                   jnp.float32)
  dt_proj_w = s * jax.random.normal(ks[4], (d_inner, dt_rank), jnp.float32)
  dt_proj_b = s * jax.random.normal(ks[5], (d_inner,), jnp.float32)
  a_log = jnp.log(jnp.broadcast_to(
      jnp.arange(1, d_state + 1, dtype=jnp.float32), (d_inner, d_state)))
  d_param = jnp.ones((d_inner,), jnp.float32)
  out_proj_w = s * jax.random.normal(ks[6], (dim, d_inner), jnp.float32)
  return {
      "gamma": jnp.ones((1, dim), jnp.float32),
      "beta": jnp.zeros((1, dim), jnp.float32),
      "w_in_x": in_proj_w[:d_inner].T,                   # (C, di)
      "w_in_z": in_proj_w[d_inner:].T,                   # (C, di)
      "w_conv": conv_w.T,                                # (d_conv, di)
      "b_conv": conv_b.reshape(1, d_inner),
      "w_x_dt": x_proj_w[:dt_rank].T,                    # (di, dtr)
      "w_x_B": x_proj_w[dt_rank:dt_rank + d_state].T,    # (di, ds)
      "w_x_C": x_proj_w[dt_rank + d_state:].T,           # (di, ds)
      "w_dt": dt_proj_w.T,                               # (dtr, di)
      "b_dt": dt_proj_b.reshape(1, d_inner),
      "a_log_t": a_log.T,                                # (ds, di)
      "d_par": d_param.reshape(1, d_inner),
      "w_out": out_proj_w.T,                             # (di, C)
  }


def reference_forward(x, p):
  """Pure-JAX reference of the same math (sanity check)."""
  B, C = x.shape[:2]
  img_dims = x.shape[2:]
  L = math.prod(img_dims)
  xf = jnp.transpose(x.reshape(B, C, L), (0, 2, 1)).astype(jnp.float32)
  mu = jnp.mean(xf, -1, keepdims=True)
  xc = xf - mu
  var = jnp.mean(xc * xc, -1, keepdims=True)
  xn = xc * jax.lax.rsqrt(var + 1e-5) * p["gamma"] + p["beta"]
  u = xn @ p["w_in_x"]
  z = xn @ p["w_in_z"]
  d_conv = p["w_conv"].shape[0]
  d_inner = p["w_in_x"].shape[1]
  d_state = p["w_x_B"].shape[1]
  upad = jnp.pad(u, ((0, 0), (d_conv - 1, 0), (0, 0)))
  conv = jnp.zeros_like(u) + p["b_conv"]
  for k in range(d_conv):
    conv = conv + upad[:, k:k + L, :] * p["w_conv"][k]
  u_act = _silu(conv)
  dt = u_act @ p["w_x_dt"]
  Bm = u_act @ p["w_x_B"]
  Cm = u_act @ p["w_x_C"]
  delta = _softplus(dt @ p["w_dt"] + p["b_dt"])
  A_t = -jnp.exp(p["a_log_t"])                           # (ds, di)

  def step(h, inp):
    dlt, du, bt, ct = inp
    dA = jnp.exp(dlt[:, None, :] * A_t)                  # (B, ds, di)
    h = dA * h + bt[:, :, None] * du[:, None, :]
    y = jnp.sum(h * ct[:, :, None], axis=1)              # (B, di)
    return h, y

  xs = (jnp.swapaxes(delta, 0, 1), jnp.swapaxes(delta * u_act, 0, 1),
        jnp.swapaxes(Bm, 0, 1), jnp.swapaxes(Cm, 0, 1))
  h0 = jnp.zeros((B, d_state, d_inner), jnp.float32)
  _, ys = jax.lax.scan(step, h0, xs)
  y = jnp.swapaxes(ys, 0, 1) + u_act * p["d_par"]
  y = y * _silu(z)
  out = y @ p["w_out"] + xf
  out = jax.nn.gelu(out, approximate=False)
  return jnp.transpose(out, (0, 2, 1)).reshape(B, C, *img_dims)


if __name__ == "__main__":
  dim, d_state, d_conv, expand = 4, 16, 4, 2
  B, H, W = 2, 16, 16
  params = init_params(dim, d_state, d_conv, expand)
  x = jax.random.normal(jax.random.PRNGKey(0), (B, dim, H, W), jnp.float32)

  ref = reference_forward(x, params)

  # single sequence tile (L_TILE covers the whole flattened sequence)
  out = jax.block_until_ready(mamba_layer_forward(x, params))
  assert out.shape == x.shape
  err = float(jnp.max(jnp.abs(out - ref)))
  assert err < 1e-2, f"kernel/reference mismatch (single tile): {err}"

  # multi-tile path: exercises the scan-state / conv-tail carry across tiles
  out2 = jax.block_until_ready(mamba_layer_forward(x, params, l_tile=128))
  err2 = float(jnp.max(jnp.abs(out2 - ref)))
  assert err2 < 1e-2, f"kernel/reference mismatch (multi tile): {err2}"

  print("KERNEL_OK")
</pallas_src>

<mosaic_0001>
module attributes {stable_mosaic.version = 11 : i64} {
  func.func @kernel(%arg0: i32, %arg1: i32, %arg2: memref<1x256x4xf32, #tpu.memory_space<vmem>>, %arg3: memref<1x4xf32, #tpu.memory_space<vmem>>, %arg4: memref<1x4xf32, #tpu.memory_space<vmem>>, %arg5: memref<4x16xf32, #tpu.memory_space<vmem>>, %arg6: memref<4x8xf32, #tpu.memory_space<vmem>>, %arg7: memref<1x8xf32, #tpu.memory_space<vmem>>, %arg8: memref<8x33xf32, #tpu.memory_space<vmem>>, %arg9: memref<1x8xf32, #tpu.memory_space<vmem>>, %arg10: memref<1x8xf32, #tpu.memory_space<vmem>>, %arg11: memref<1x8xf32, #tpu.memory_space<vmem>>, %arg12: memref<8x4xf32, #tpu.memory_space<vmem>>, %arg13: memref<1x128xf32, #tpu.memory_space<vmem>>, %arg14: memref<8x128xf32, #tpu.memory_space<vmem>>, %arg15: memref<16x128xf32, #tpu.memory_space<vmem>>, %arg16: memref<128x8xf32, #tpu.memory_space<vmem>>, %arg17: memref<1x4x256xf32, #tpu.memory_space<vmem>>, %arg18: memref<1x128xf32, #tpu.memory_space<vmem>>, %arg19: memref<264x8xf32, #tpu.memory_space<vmem>>, %arg20: memref<256x8xf32, #tpu.memory_space<vmem>>, %arg21: memref<256x8xf32, #tpu.memory_space<vmem>>, %arg22: memref<256x8xf32, #tpu.memory_space<vmem>>, %arg23: memref<256x128xf32, #tpu.memory_space<vmem>>, %arg24: memref<256x128xf32, #tpu.memory_space<vmem>>, %arg25: memref<256x128xf32, #tpu.memory_space<vmem>>) attributes {dimension_semantics = [#tpu.dimension_semantics<parallel>, #tpu.dimension_semantics<arbitrary>], iteration_bounds = array<i64: 2, 1>, scalar_prefetch = 0 : i64, scratch_operands = 8 : i64, tpu.core_type = #tpu.core_type<tc>, window_params = [{transform_indices = @transform_0, window_bounds = array<i64: 1, 256, 4>}, {pipeline_mode = #tpu.pipeline_mode<synchronous>, transform_indices = @transform_1, window_bounds = array<i64: 1, 4>}, {pipeline_mode = #tpu.pipeline_mode<synchronous>, transform_indices = @transform_2, window_bounds = array<i64: 1, 4>}, {pipeline_mode = #tpu.pipeline_mode<synchronous>, transform_indices = @transform_3, window_bounds = array<i64: 4, 16>}, {pipeline_mode = #tpu.pipeline_mode<synchronous>, transform_indices = @transform_4, window_bounds = array<i64: 4, 8>}, {pipeline_mode = #tpu.pipeline_mode<synchronous>, transform_indices = @transform_5, window_bounds = array<i64: 1, 8>}, {pipeline_mode = #tpu.pipeline_mode<synchronous>, transform_indices = @transform_6, window_bounds = array<i64: 8, 33>}, {pipeline_mode = #tpu.pipeline_mode<synchronous>, transform_indices = @transform_7, window_bounds = array<i64: 1, 8>}, {pipeline_mode = #tpu.pipeline_mode<synchronous>, transform_indices = @transform_8, window_bounds = array<i64: 1, 8>}, {pipeline_mode = #tpu.pipeline_mode<synchronous>, transform_indices = @transform_9, window_bounds = array<i64: 1, 8>}, {pipeline_mode = #tpu.pipeline_mode<synchronous>, transform_indices = @transform_10, window_bounds = array<i64: 8, 4>}, {pipeline_mode = #tpu.pipeline_mode<synchronous>, transform_indices = @transform_11, window_bounds = array<i64: 1, 128>}, {pipeline_mode = #tpu.pipeline_mode<synchronous>, transform_indices = @transform_12, window_bounds = array<i64: 8, 128>}, {pipeline_mode = #tpu.pipeline_mode<synchronous>, transform_indices = @transform_13, window_bounds = array<i64: 16, 128>}, {pipeline_mode = #tpu.pipeline_mode<synchronous>, transform_indices = @transform_14, window_bounds = array<i64: 128, 8>}, {transform_indices = @transform_15, window_bounds = array<i64: 1, 4, 256>}]} {
    %c0_i32 = arith.constant 0 : i32
    %0 = arith.cmpi eq, %arg1, %c0_i32 : i32
    %1 = arith.extui %0 : i1 to i32
    %c0_i32_0 = arith.constant 0 : i32
    %2 = arith.cmpi ne, %1, %c0_i32_0 : i32
    scf.if %2 {
      %cst_100 = arith.constant 0.000000e+00 : f32
      %170 = vector.broadcast %cst_100 : f32 to vector<1x128xf32>
      %c0_101 = arith.constant 0 : index
      %c0_102 = arith.constant 0 : index
      %171 = vector.load %arg18[%c0_101, %c0_102] : memref<1x128xf32, #tpu.memory_space<vmem>>, vector<1x128xf32>
      tpu.vector_store %arg18[%c0_101, %c0_102], %170 {strides = array<i32>} : memref<1x128xf32, #tpu.memory_space<vmem>>, vector<1x128xf32>,
      %cst_103 = arith.constant 0.000000e+00 : f32
      %172 = vector.broadcast %cst_103 : f32 to vector<8x8xf32>
      %c0_104 = arith.constant 0 : index
      %c0_105 = arith.constant 0 : index
      %173 = vector.load %arg19[%c0_104, %c0_105] : memref<264x8xf32, #tpu.memory_space<vmem>>, vector<8x8xf32>
      tpu.vector_store %arg19[%c0_104, %c0_105], %172 {strides = array<i32>} : memref<264x8xf32, #tpu.memory_space<vmem>>, vector<8x8xf32>,
    } else {
    }
    %c0 = arith.constant 0 : index
    %c0_1 = arith.constant 0 : index
    %c0_2 = arith.constant 0 : index
    %3 = vector.load %arg2[%c0, %c0_1, %c0_2] : memref<1x256x4xf32, #tpu.memory_space<vmem>>, vector<1x256x4xf32>
    %4 = vector.shape_cast %3 : vector<1x256x4xf32> to vector<256x4xf32>
    %cst = arith.constant dense<0.000000e+00> : vector<256xf32>
    %5 = vector.multi_reduction <add>, %4, %cst [1] : vector<256x4xf32> to vector<256xf32>
    %6 = vector.shape_cast %5 : vector<256xf32> to vector<256x1xf32>
    %cst_3 = arith.constant 4.000000e+00 : f32
    %7 = vector.broadcast %cst_3 : f32 to vector<256x1xf32>
    %8 = arith.divf %6, %7 : vector<256x1xf32>
    %9 = vector.broadcast %8 : vector<256x1xf32> to vector<256x4xf32>
    %10 = arith.subf %4, %9 : vector<256x4xf32>
    %11 = arith.mulf %10, %10 : vector<256x4xf32>
    %cst_4 = arith.constant dense<0.000000e+00> : vector<256xf32>
    %12 = vector.multi_reduction <add>, %11, %cst_4 [1] : vector<256x4xf32> to vector<256xf32>
    %13 = vector.shape_cast %12 : vector<256xf32> to vector<256x1xf32>
    %cst_5 = arith.constant 4.000000e+00 : f32
    %14 = vector.broadcast %cst_5 : f32 to vector<256x1xf32>
    %15 = arith.divf %13, %14 : vector<256x1xf32>
    %cst_6 = arith.constant 9.99999974E-6 : f32
    %16 = vector.broadcast %cst_6 : f32 to vector<256x1xf32>
    %17 = arith.addf %15, %16 : vector<256x1xf32>
    %18 = math.rsqrt %17 : vector<256x1xf32>
    %19 = vector.broadcast %18 : vector<256x1xf32> to vector<256x4xf32>
    %20 = arith.mulf %10, %19 : vector<256x4xf32>
    %c0_7 = arith.constant 0 : index
    %c0_8 = arith.constant 0 : index
    %21 = vector.load %arg3[%c0_7, %c0_8] : memref<1x4xf32, #tpu.memory_space<vmem>>, vector<1x4xf32>
    %22 = vector.broadcast %21 : vector<1x4xf32> to vector<256x4xf32>
    %23 = arith.mulf %20, %22 : vector<256x4xf32>
    %c0_9 = arith.constant 0 : index
    %c0_10 = arith.constant 0 : index
    %24 = vector.load %arg4[%c0_9, %c0_10] : memref<1x4xf32, #tpu.memory_space<vmem>>, vector<1x4xf32>
    %25 = vector.broadcast %24 : vector<1x4xf32> to vector<256x4xf32>
    %26 = arith.addf %23, %25 : vector<256x4xf32>
    %c0_11 = arith.constant 0 : index
    %c0_12 = arith.constant 0 : index
    %27 = vector.load %arg5[%c0_11, %c0_12] : memref<4x16xf32, #tpu.memory_space<vmem>>, vector<4x16xf32>
    %cst_13 = arith.constant dense<0.000000e+00> : vector<256x16xf32>
    %28 = tpu.matmul %26, %27, %cst_13 {dimension_numbers = #tpu.dot_dimension_numbers<[1], [0], [0], [1], [0, 0, 1, 1], [], []>} : vector<256x4xf32>, vector<4x16xf32>, vector<256x16xf32> -> vector<256x16xf32>
    %29 = vector.extract_strided_slice %28 {offsets = [0, 0], sizes = [256, 8], strides = [1, 1]} : vector<256x16xf32> to vector<256x8xf32>
    %30 = vector.extract_strided_slice %28 {offsets = [0, 8], sizes = [256, 8], strides = [1, 1]} : vector<256x16xf32> to vector<256x8xf32>
    %c0_14 = arith.constant 0 : index
    %c0_15 = arith.constant 0 : index
    %31 = vector.load %arg22[%c0_14, %c0_15] : memref<256x8xf32, #tpu.memory_space<vmem>>, vector<256x8xf32>
    tpu.vector_store %arg22[%c0_14, %c0_15], %30 {strides = array<i32>} : memref<256x8xf32, #tpu.memory_space<vmem>>, vector<256x8xf32>,
    %c8 = arith.constant 8 : index
    %c0_16 = arith.constant 0 : index
    %32 = vector.load %arg19[%c8, %c0_16] : memref<264x8xf32, #tpu.memory_space<vmem>>, vector<256x8xf32>
    tpu.vector_store %arg19[%c8, %c0_16], %29 {strides = array<i32>} : memref<264x8xf32, #tpu.memory_space<vmem>>, vector<256x8xf32>,
    %c0_17 = arith.constant 0 : index
    %c0_18 = arith.constant 0 : index
    %33 = vector.load %arg6[%c0_17, %c0_18] : memref<4x8xf32, #tpu.memory_space<vmem>>, vector<4x8xf32>
    %c5 = arith.constant 5 : index
    %c0_19 = arith.constant 0 : index
    %34 = vector.load %arg19[%c5, %c0_19] : memref<264x8xf32, #tpu.memory_space<vmem>>, vector<256x8xf32>
    %35 = vector.extract_strided_slice %33 {offsets = [0, 0], sizes = [1, 8], strides = [1, 1]} : vector<4x8xf32> to vector<1x8xf32>
    %36 = vector.broadcast %35 : vector<1x8xf32> to vector<256x8xf32>
    %37 = arith.mulf %34, %36 : vector<256x8xf32>
    %c6 = arith.constant 6 : index
    %c0_20 = arith.constant 0 : index
    %38 = vector.load %arg19[%c6, %c0_20] : memref<264x8xf32, #tpu.memory_space<vmem>>, vector<256x8xf32>
    %39 = vector.extract_strided_slice %33 {offsets = [1, 0], sizes = [1, 8], strides = [1, 1]} : vector<4x8xf32> to vector<1x8xf32>
    %40 = vector.broadcast %39 : vector<1x8xf32> to vector<256x8xf32>
    %41 = arith.mulf %38, %40 : vector<256x8xf32>
    %42 = arith.addf %37, %41 : vector<256x8xf32>
    %c7 = arith.constant 7 : index
    %c0_21 = arith.constant 0 : index
    %43 = vector.load %arg19[%c7, %c0_21] : memref<264x8xf32, #tpu.memory_space<vmem>>, vector<256x8xf32>
    %44 = vector.extract_strided_slice %33 {offsets = [2, 0], sizes = [1, 8], strides = [1, 1]} : vector<4x8xf32> to vector<1x8xf32>
    %45 = vector.broadcast %44 : vector<1x8xf32> to vector<256x8xf32>
    %46 = arith.mulf %43, %45 : vector<256x8xf32>
    %47 = arith.addf %42, %46 : vector<256x8xf32>
    %c8_22 = arith.constant 8 : index
    %c0_23 = arith.constant 0 : index
    %48 = vector.load %arg19[%c8_22, %c0_23] : memref<264x8xf32, #tpu.memory_space<vmem>>, vector<256x8xf32>
    %49 = vector.extract_strided_slice %33 {offsets = [3, 0], sizes = [1, 8], strides = [1, 1]} : vector<4x8xf32> to vector<1x8xf32>
    %50 = vector.broadcast %49 : vector<1x8xf32> to vector<256x8xf32>
    %51 = arith.mulf %48, %50 : vector<256x8xf32>
    %52 = arith.addf %47, %51 : vector<256x8xf32>
    %c0_24 = arith.constant 0 : index
    %c0_25 = arith.constant 0 : index
    %53 = vector.load %arg7[%c0_24, %c0_25] : memref<1x8xf32, #tpu.memory_space<vmem>>, vector<1x8xf32>
    %54 = vector.broadcast %53 : vector<1x8xf32> to vector<256x8xf32>
    %55 = arith.addf %52, %54 : vector<256x8xf32>
    %c256 = arith.constant 256 : index
    %c0_26 = arith.constant 0 : index
    %56 = vector.load %arg19[%c256, %c0_26] : memref<264x8xf32, #tpu.memory_space<vmem>>, vector<8x8xf32>
    %c0_27 = arith.constant 0 : index
    %c0_28 = arith.constant 0 : index
    %57 = vector.load %arg19[%c0_27, %c0_28] : memref<264x8xf32, #tpu.memory_space<vmem>>, vector<8x8xf32>
    tpu.vector_store %arg19[%c0_27, %c0_28], %56 {strides = array<i32>} : memref<264x8xf32, #tpu.memory_space<vmem>>, vector<8x8xf32>,
    %cst_29 = arith.constant 0.000000e+00 : f32
    %58 = vector.broadcast %cst_29 : f32 to vector<256x8xf32>
    %59 = arith.subf %58, %55 : vector<256x8xf32>
    %60 = math.exp %59 : vector<256x8xf32>
    %cst_30 = arith.constant 1.000000e+00 : f32
    %61 = vector.broadcast %cst_30 : f32 to vector<256x8xf32>
    %62 = arith.addf %61, %60 : vector<256x8xf32>
    %63 = arith.divf %55, %62 : vector<256x8xf32>
    %c0_31 = arith.constant 0 : index
    %c0_32 = arith.constant 0 : index
    %64 = vector.load %arg21[%c0_31, %c0_32] : memref<256x8xf32, #tpu.memory_space<vmem>>, vector<256x8xf32>
    tpu.vector_store %arg21[%c0_31, %c0_32], %63 {strides = array<i32>} : memref<256x8xf32, #tpu.memory_space<vmem>>, vector<256x8xf32>,
    %c0_33 = arith.constant 0 : index
    %c0_34 = arith.constant 0 : index
    %65 = vector.load %arg8[%c0_33, %c0_34] : memref<8x33xf32, #tpu.memory_space<vmem>>, vector<8x33xf32>
    %cst_35 = arith.constant dense<0.000000e+00> : vector<256x33xf32>
    %66 = tpu.matmul %63, %65, %cst_35 {dimension_numbers = #tpu.dot_dimension_numbers<[1], [0], [0], [1], [0, 0, 1, 1], [], []>} : vector<256x8xf32>, vector<8x33xf32>, vector<256x33xf32> -> vector<256x33xf32>
    %67 = vector.extract_strided_slice %66 {offsets = [0, 0], sizes = [256, 1], strides = [1, 1]} : vector<256x33xf32> to vector<256x1xf32>
    %68 = vector.extract_strided_slice %66 {offsets = [0, 1], sizes = [256, 16], strides = [1, 1]} : vector<256x33xf32> to vector<256x16xf32>
    %69 = vector.extract_strided_slice %66 {offsets = [0, 17], sizes = [256, 16], strides = [1, 1]} : vector<256x33xf32> to vector<256x16xf32>
    %c0_36 = arith.constant 0 : index
    %c0_37 = arith.constant 0 : index
    %70 = vector.load %arg9[%c0_36, %c0_37] : memref<1x8xf32, #tpu.memory_space<vmem>>, vector<1x8xf32>
    %71 = vector.broadcast %67 : vector<256x1xf32> to vector<256x8xf32>
    %72 = vector.broadcast %70 : vector<1x8xf32> to vector<256x8xf32>
    %73 = arith.mulf %71, %72 : vector<256x8xf32>
    %c0_38 = arith.constant 0 : index
    %c0_39 = arith.constant 0 : index
    %74 = vector.load %arg10[%c0_38, %c0_39] : memref<1x8xf32, #tpu.memory_space<vmem>>, vector<1x8xf32>
    %75 = vector.broadcast %74 : vector<1x8xf32> to vector<256x8xf32>
    %76 = arith.addf %73, %75 : vector<256x8xf32>
    %cst_40 = arith.constant 0.000000e+00 : f32
    %77 = vector.broadcast %cst_40 : f32 to vector<256x8xf32>
    %78 = arith.maximumf %76, %77 : vector<256x8xf32>
    %79 = math.absf %76 : vector<256x8xf32>
    %cst_41 = arith.constant 0.000000e+00 : f32
    %80 = vector.broadcast %cst_41 : f32 to vector<256x8xf32>
    %81 = arith.subf %80, %79 : vector<256x8xf32>
    %82 = math.exp %81 : vector<256x8xf32>
    %cst_42 = arith.constant 1.000000e+00 : f32
    %83 = vector.broadcast %cst_42 : f32 to vector<256x8xf32>
    %84 = arith.addf %83, %82 : vector<256x8xf32>
    %85 = math.log %84 : vector<256x8xf32>
    %86 = arith.addf %78, %85 : vector<256x8xf32>
    %c0_43 = arith.constant 0 : index
    %c0_44 = arith.constant 0 : index
    %87 = vector.load %arg14[%c0_43, %c0_44] : memref<8x128xf32, #tpu.memory_space<vmem>>, vector<8x128xf32>
    %c0_45 = arith.constant 0 : index
    %c0_46 = arith.constant 0 : index
    %88 = vector.load %arg15[%c0_45, %c0_46] : memref<16x128xf32, #tpu.memory_space<vmem>>, vector<16x128xf32>
    %cst_47 = arith.constant dense<0.000000e+00> : vector<256x128xf32>
    %89 = tpu.matmul %86, %87, %cst_47 {dimension_numbers = #tpu.dot_dimension_numbers<[1], [0], [0], [1], [0, 0, 1, 1], [], []>} : vector<256x8xf32>, vector<8x128xf32>, vector<256x128xf32> -> vector<256x128xf32>
    %c0_48 = arith.constant 0 : index
    %c0_49 = arith.constant 0 : index
    %90 = vector.load %arg13[%c0_48, %c0_49] : memref<1x128xf32, #tpu.memory_space<vmem>>, vector<1x128xf32>
    %91 = vector.broadcast %90 : vector<1x128xf32> to vector<256x128xf32>
    %92 = arith.mulf %89, %91 : vector<256x128xf32>
    %93 = math.exp %92 : vector<256x128xf32>
    %c0_50 = arith.constant 0 : index
    %c0_51 = arith.constant 0 : index
    %94 = vector.load %arg23[%c0_50, %c0_51] : memref<256x128xf32, #tpu.memory_space<vmem>>, vector<256x128xf32>
    tpu.vector_store %arg23[%c0_50, %c0_51], %93 {strides = array<i32>} : memref<256x128xf32, #tpu.memory_space<vmem>>, vector<256x128xf32>,
    %95 = arith.mulf %86, %63 : vector<256x8xf32>
    %cst_52 = arith.constant dense<0.000000e+00> : vector<256x128xf32>
    %96 = tpu.matmul %95, %87, %cst_52 {dimension_numbers = #tpu.dot_dimension_numbers<[1], [0], [0], [1], [0, 0, 1, 1], [], []>} : vector<256x8xf32>, vector<8x128xf32>, vector<256x128xf32> -> vector<256x128xf32>
    %cst_53 = arith.constant dense<0.000000e+00> : vector<256x128xf32>
    %97 = tpu.matmul %68, %88, %cst_53 {dimension_numbers = #tpu.dot_dimension_numbers<[1], [0], [0], [1], [0, 0, 1, 1], [], []>} : vector<256x16xf32>, vector<16x128xf32>, vector<256x128xf32> -> vector<256x128xf32>
    %98 = arith.mulf %97, %96 : vector<256x128xf32>
    %c0_54 = arith.constant 0 : index
    %c0_55 = arith.constant 0 : index
    %99 = vector.load %arg24[%c0_54, %c0_55] : memref<256x128xf32, #tpu.memory_space<vmem>>, vector<256x128xf32>
    tpu.vector_store %arg24[%c0_54, %c0_55], %98 {strides = array<i32>} : memref<256x128xf32, #tpu.memory_space<vmem>>, vector<256x128xf32>,
    %cst_56 = arith.constant dense<0.000000e+00> : vector<256x128xf32>
    %100 = tpu.matmul %69, %88, %cst_56 {dimension_numbers = #tpu.dot_dimension_numbers<[1], [0], [0], [1], [0, 0, 1, 1], [], []>} : vector<256x16xf32>, vector<16x128xf32>, vector<256x128xf32> -> vector<256x128xf32>
    %c0_57 = arith.constant 0 : index
    %c0_58 = arith.constant 0 : index
    %101 = vector.load %arg25[%c0_57, %c0_58] : memref<256x128xf32, #tpu.memory_space<vmem>>, vector<256x128xf32>
    tpu.vector_store %arg25[%c0_57, %c0_58], %100 {strides = array<i32>} : memref<256x128xf32, #tpu.memory_space<vmem>>, vector<256x128xf32>,
    %c0_59 = arith.constant 0 : index
    %c0_60 = arith.constant 0 : index
    %102 = vector.load %arg16[%c0_59, %c0_60] : memref<128x8xf32, #tpu.memory_space<vmem>>, vector<128x8xf32>
    %c0_61 = arith.constant 0 : index
    %c0_62 = arith.constant 0 : index
    %103 = vector.load %arg18[%c0_61, %c0_62] : memref<1x128xf32, #tpu.memory_space<vmem>>, vector<1x128xf32>
    %c0_i32_63 = arith.constant 0 : i32
    %c16_i32 = arith.constant 16 : i32
    %104 = arith.addi %c0_i32_63, %c16_i32 : i32
    %c1_i32 = arith.constant 1 : i32
    %105 = scf.for %arg26 = %c0_i32_63 to %104 step %c1_i32 iter_args(%arg27 = %103) -> (vector<1x128xf32>)  : i32 {
      %c16_i32_100 = arith.constant 16 : i32
      %170 = arith.muli %arg26, %c16_i32_100 : i32
      %171 = tpu.assume_multiple %170, 8 : i32
      %172 = arith.index_cast %171 : i32 to index
      %c0_101 = arith.constant 0 : index
      %173 = vector.load %arg23[%172, %c0_101] : memref<256x128xf32, #tpu.memory_space<vmem>>, vector<8x128xf32>
      %174 = arith.index_cast %171 : i32 to index
      %c0_102 = arith.constant 0 : index
      %175 = vector.load %arg24[%174, %c0_102] : memref<256x128xf32, #tpu.memory_space<vmem>>, vector<8x128xf32>
      %176 = vector.extract_strided_slice %173 {offsets = [0, 0], sizes = [1, 128], strides = [1, 1]} : vector<8x128xf32> to vector<1x128xf32>
      %177 = arith.mulf %176, %arg27 : vector<1x128xf32>
      %178 = vector.extract_strided_slice %175 {offsets = [0, 0], sizes = [1, 128], strides = [1, 1]} : vector<8x128xf32> to vector<1x128xf32>
      %179 = arith.addf %177, %178 : vector<1x128xf32>
      %180 = vector.extract_strided_slice %173 {offsets = [1, 0], sizes = [1, 128], strides = [1, 1]} : vector<8x128xf32> to vector<1x128xf32>
      %181 = arith.mulf %180, %179 : vector<1x128xf32>
      %182 = vector.extract_strided_slice %175 {offsets = [1, 0], sizes = [1, 128], strides = [1, 1]} : vector<8x128xf32> to vector<1x128xf32>
      %183 = arith.addf %181, %182 : vector<1x128xf32>
      %184 = vector.extract_strided_slice %173 {offsets = [2, 0], sizes = [1, 128], strides = [1, 1]} : vector<8x128xf32> to vector<1x128xf32>
      %185 = arith.mulf %184, %183 : vector<1x128xf32>
      %186 = vector.extract_strided_slice %175 {offsets = [2, 0], sizes = [1, 128], strides = [1, 1]} : vector<8x128xf32> to vector<1x128xf32>
      %187 = arith.addf %185, %186 : vector<1x128xf32>
      %188 = vector.extract_strided_slice %173 {offsets = [3, 0], sizes = [1, 128], strides = [1, 1]} : vector<8x128xf32> to vector<1x128xf32>
      %189 = arith.mulf %188, %187 : vector<1x128xf32>
      %190 = vector.extract_strided_slice %175 {offsets = [3, 0], sizes = [1, 128], strides = [1, 1]} : vector<8x128xf32> to vector<1x128xf32>
      %191 = arith.addf %189, %190 : vector<1x128xf32>
      %192 = vector.extract_strided_slice %173 {offsets = [4, 0], sizes = [1, 128], strides = [1, 1]} : vector<8x128xf32> to vector<1x128xf32>
      %193 = arith.mulf %192, %191 : vector<1x128xf32>
      %194 = vector.extract_strided_slice %175 {offsets = [4, 0], sizes = [1, 128], strides = [1, 1]} : vector<8x128xf32> to vector<1x128xf32>
      %195 = arith.addf %193, %194 : vector<1x128xf32>
      %196 = vector.extract_strided_slice %173 {offsets = [5, 0], sizes = [1, 128], strides = [1, 1]} : vector<8x128xf32> to vector<1x128xf32>
      %197 = arith.mulf %196, %195 : vector<1x128xf32>
      %198 = vector.extract_strided_slice %175 {offsets = [5, 0], sizes = [1, 128], strides = [1, 1]} : vector<8x128xf32> to vector<1x128xf32>
      %199 = arith.addf %197, %198 : vector<1x128xf32>
      %200 = vector.extract_strided_slice %173 {offsets = [6, 0], sizes = [1, 128], strides = [1, 1]} : vector<8x128xf32> to vector<1x128xf32>
      %201 = arith.mulf %200, %199 : vector<1x128xf32>
      %202 = vector.extract_strided_slice %175 {offsets = [6, 0], sizes = [1, 128], strides = [1, 1]} : vector<8x128xf32> to vector<1x128xf32>
      %203 = arith.addf %201, %202 : vector<1x128xf32>
      %204 = vector.extract_strided_slice %173 {offsets = [7, 0], sizes = [1, 128], strides = [1, 1]} : vector<8x128xf32> to vector<1x128xf32>
      %205 = arith.mulf %204, %203 : vector<1x128xf32>
      %206 = vector.extract_strided_slice %175 {offsets = [7, 0], sizes = [1, 128], strides = [1, 1]} : vector<8x128xf32> to vector<1x128xf32>
      %207 = arith.addf %205, %206 : vector<1x128xf32>
      %208 = tpu.concatenate %179, %183, %187, %191, %195, %199, %203, %207 in 0 : vector<1x128xf32>, vector<1x128xf32>, vector<1x128xf32>, vector<1x128xf32>, vector<1x128xf32>, vector<1x128xf32>, vector<1x128xf32>, vector<1x128xf32> -> vector<8x128xf32>
      %209 = arith.index_cast %171 : i32 to index
      %c0_103 = arith.constant 0 : index
      %210 = vector.load %arg25[%209, %c0_103] : memref<256x128xf32, #tpu.memory_space<vmem>>, vector<8x128xf32>
      %211 = arith.mulf %208, %210 : vector<8x128xf32>
      %cst_104 = arith.constant dense<0.000000e+00> : vector<8x8xf32>
      %212 = tpu.matmul %211, %102, %cst_104 {dimension_numbers = #tpu.dot_dimension_numbers<[1], [0], [0], [1], [0, 0, 1, 1], [], []>} : vector<8x128xf32>, vector<128x8xf32>, vector<8x8xf32> -> vector<8x8xf32>
      %213 = arith.index_cast %171 : i32 to index
      %c0_105 = arith.constant 0 : index
      %214 = vector.load %arg20[%213, %c0_105] : memref<256x8xf32, #tpu.memory_space<vmem>>, vector<8x8xf32>
      tpu.vector_store %arg20[%213, %c0_105], %212 {strides = array<i32>} : memref<256x8xf32, #tpu.memory_space<vmem>>, vector<8x8xf32>,
      %c8_i32 = arith.constant 8 : i32
      %215 = arith.addi %171, %c8_i32 : i32
      %216 = tpu.assume_multiple %215, 8 : i32
      %217 = arith.index_cast %216 : i32 to index
      %c0_106 = arith.constant 0 : index
      %218 = vector.load %arg23[%217, %c0_106] : memref<256x128xf32, #tpu.memory_space<vmem>>, vector<8x128xf32>
      %219 = arith.index_cast %216 : i32 to index
      %c0_107 = arith.constant 0 : index
      %220 = vector.load %arg24[%219, %c0_107] : memref<256x128xf32, #tpu.memory_space<vmem>>, vector<8x128xf32>
      %221 = vector.extract_strided_slice %218 {offsets = [0, 0], sizes = [1, 128], strides = [1, 1]} : vector<8x128xf32> to vector<1x128xf32>
      %222 = arith.mulf %221, %207 : vector<1x128xf32>
      %223 = vector.extract_strided_slice %220 {offsets = [0, 0], sizes = [1, 128], strides = [1, 1]} : vector<8x128xf32> to vector<1x128xf32>
      %224 = arith.addf %222, %223 : vector<1x128xf32>
      %225 = vector.extract_strided_slice %218 {offsets = [1, 0], sizes = [1, 128], strides = [1, 1]} : vector<8x128xf32> to vector<1x128xf32>
      %226 = arith.mulf %225, %224 : vector<1x128xf32>
      %227 = vector.extract_strided_slice %220 {offsets = [1, 0], sizes = [1, 128], strides = [1, 1]} : vector<8x128xf32> to vector<1x128xf32>
      %228 = arith.addf %226, %227 : vector<1x128xf32>
      %229 = vector.extract_strided_slice %218 {offsets = [2, 0], sizes = [1, 128], strides = [1, 1]} : vector<8x128xf32> to vector<1x128xf32>
      %230 = arith.mulf %229, %228 : vector<1x128xf32>
      %231 = vector.extract_strided_slice %220 {offsets = [2, 0], sizes = [1, 128], strides = [1, 1]} : vector<8x128xf32> to vector<1x128xf32>
      %232 = arith.addf %230, %231 : vector<1x128xf32>
      %233 = vector.extract_strided_slice %218 {offsets = [3, 0], sizes = [1, 128], strides = [1, 1]} : vector<8x128xf32> to vector<1x128xf32>
      %234 = arith.mulf %233, %232 : vector<1x128xf32>
      %235 = vector.extract_strided_slice %220 {offsets = [3, 0], sizes = [1, 128], strides = [1, 1]} : vector<8x128xf32> to vector<1x128xf32>
      %236 = arith.addf %234, %235 : vector<1x128xf32>
      %237 = vector.extract_strided_slice %218 {offsets = [4, 0], sizes = [1, 128], strides = [1, 1]} : vector<8x128xf32> to vector<1x128xf32>
      %238 = arith.mulf %237, %236 : vector<1x128xf32>
      %239 = vector.extract_strided_slice %220 {offsets = [4, 0], sizes = [1, 128], strides = [1, 1]} : vector<8x128xf32> to vector<1x128xf32>
      %240 = arith.addf %238, %239 : vector<1x128xf32>
      %241 = vector.extract_strided_slice %218 {offsets = [5, 0], sizes = [1, 128], strides = [1, 1]} : vector<8x128xf32> to vector<1x128xf32>
      %242 = arith.mulf %241, %240 : vector<1x128xf32>
      %243 = vector.extract_strided_slice %220 {offsets = [5, 0], sizes = [1, 128], strides = [1, 1]} : vector<8x128xf32> to vector<1x128xf32>
      %244 = arith.addf %242, %243 : vector<1x128xf32>
      %245 = vector.extract_strided_slice %218 {offsets = [6, 0], sizes = [1, 128], strides = [1, 1]} : vector<8x128xf32> to vector<1x128xf32>
      %246 = arith.mulf %245, %244 : vector<1x128xf32>
      %247 = vector.extract_strided_slice %220 {offsets = [6, 0], sizes = [1, 128], strides = [1, 1]} : vector<8x128xf32> to vector<1x128xf32>
      %248 = arith.addf %246, %247 : vector<1x128xf32>
      %249 = vector.extract_strided_slice %218 {offsets = [7, 0], sizes = [1, 128], strides = [1, 1]} : vector<8x128xf32> to vector<1x128xf32>
      %250 = arith.mulf %249, %248 : vector<1x128xf32>
      %251 = vector.extract_strided_slice %220 {offsets = [7, 0], sizes = [1, 128], strides = [1, 1]} : vector<8x128xf32> to vector<1x128xf32>
      %252 = arith.addf %250, %251 : vector<1x128xf32>
      %253 = tpu.concatenate %224, %228, %232, %236, %240, %244, %248, %252 in 0 : vector<1x128xf32>, vector<1x128xf32>, vector<1x128xf32>, vector<1x128xf32>, vector<1x128xf32>, vector<1x128xf32>, vector<1x128xf32>, vector<1x128xf32> -> vector<8x128xf32>
      %254 = arith.index_cast %216 : i32 to index
      %c0_108 = arith.constant 0 : index
      %255 = vector.load %arg25[%254, %c0_108] : memref<256x128xf32, #tpu.memory_space<vmem>>, vector<8x128xf32>
      %256 = arith.mulf %253, %255 : vector<8x128xf32>
      %cst_109 = arith.constant dense<0.000000e+00> : vector<8x8xf32>
      %257 = tpu.matmul %256, %102, %cst_109 {dimension_numbers = #tpu.dot_dimension_numbers<[1], [0], [0], [1], [0, 0, 1, 1], [], []>} : vector<8x128xf32>, vector<128x8xf32>, vector<8x8xf32> -> vector<8x8xf32>
      %258 = arith.index_cast %216 : i32 to index
      %c0_110 = arith.constant 0 : index
      %259 = vector.load %arg20[%258, %c0_110] : memref<256x8xf32, #tpu.memory_space<vmem>>, vector<8x8xf32>
      tpu.vector_store %arg20[%258, %c0_110], %257 {strides = array<i32>} : memref<256x8xf32, #tpu.memory_space<vmem>>, vector<8x8xf32>,
      scf.yield %252 : vector<1x128xf32>
    }
    %c16_i32_64 = arith.constant 16 : i32
    %c0_65 = arith.constant 0 : index
    %c0_66 = arith.constant 0 : index
    %106 = vector.load %arg18[%c0_65, %c0_66] : memref<1x128xf32, #tpu.memory_space<vmem>>, vector<1x128xf32>
    tpu.vector_store %arg18[%c0_65, %c0_66], %105 {strides = array<i32>} : memref<1x128xf32, #tpu.memory_space<vmem>>, vector<1x128xf32>,
    %c0_67 = arith.constant 0 : index
    %c0_68 = arith.constant 0 : index
    %107 = vector.load %arg22[%c0_67, %c0_68] : memref<256x8xf32, #tpu.memory_space<vmem>>, vector<256x8xf32>
    %cst_69 = arith.constant 0.000000e+00 : f32
    %108 = vector.broadcast %cst_69 : f32 to vector<256x8xf32>
    %109 = arith.subf %108, %107 : vector<256x8xf32>
    %110 = math.exp %109 : vector<256x8xf32>
    %cst_70 = arith.constant 1.000000e+00 : f32
    %111 = vector.broadcast %cst_70 : f32 to vector<256x8xf32>
    %112 = arith.addf %111, %110 : vector<256x8xf32>
    %113 = tpu.reciprocal %112 {approx = true} : vector<256x8xf32> -> vector<256x8xf32>
    %114 = arith.mulf %107, %113 : vector<256x8xf32>
    %c0_71 = arith.constant 0 : index
    %c0_72 = arith.constant 0 : index
    %115 = vector.load %arg20[%c0_71, %c0_72] : memref<256x8xf32, #tpu.memory_space<vmem>>, vector<256x8xf32>
    %c0_73 = arith.constant 0 : index
    %c0_74 = arith.constant 0 : index
    %116 = vector.load %arg21[%c0_73, %c0_74] : memref<256x8xf32, #tpu.memory_space<vmem>>, vector<256x8xf32>
    %c0_75 = arith.constant 0 : index
    %c0_76 = arith.constant 0 : index
    %117 = vector.load %arg11[%c0_75, %c0_76] : memref<1x8xf32, #tpu.memory_space<vmem>>, vector<1x8xf32>
    %118 = vector.broadcast %117 : vector<1x8xf32> to vector<256x8xf32>
    %119 = arith.mulf %116, %118 : vector<256x8xf32>
    %120 = arith.addf %115, %119 : vector<256x8xf32>
    %121 = arith.mulf %120, %114 : vector<256x8xf32>
    %c0_77 = arith.constant 0 : index
    %c0_78 = arith.constant 0 : index
    %122 = vector.load %arg12[%c0_77, %c0_78] : memref<8x4xf32, #tpu.memory_space<vmem>>, vector<8x4xf32>
    %cst_79 = arith.constant dense<0.000000e+00> : vector<256x4xf32>
    %123 = tpu.matmul %121, %122, %cst_79 {dimension_numbers = #tpu.dot_dimension_numbers<[1], [0], [0], [1], [0, 0, 1, 1], [], []>} : vector<256x8xf32>, vector<8x4xf32>, vector<256x4xf32> -> vector<256x4xf32>
    %c0_80 = arith.constant 0 : index
    %c0_81 = arith.constant 0 : index
    %c0_82 = arith.constant 0 : index
    %124 = vector.load %arg2[%c0_80, %c0_81, %c0_82] : memref<1x256x4xf32, #tpu.memory_space<vmem>>, vector<1x256x4xf32>
    %125 = vector.shape_cast %124 : vector<1x256x4xf32> to vector<256x4xf32>
    %126 = arith.addf %123, %125 : vector<256x4xf32>
    %127 = tpu.transpose %126, [1, 0] : vector<256x4xf32> -> vector<4x256xf32>
    %cst_83 = arith.constant 0.707106769 : f32
    %128 = vector.broadcast %cst_83 : f32 to vector<4x256xf32>
    %129 = arith.mulf %127, %128 : vector<4x256xf32>
    %130 = math.absf %129 : vector<4x256xf32>
    %cst_84 = arith.constant 0.327591091 : f32
    %131 = vector.broadcast %cst_84 : f32 to vector<4x256xf32>
    %132 = arith.mulf %131, %130 : vector<4x256xf32>
    %cst_85 = arith.constant 1.000000e+00 : f32
    %133 = vector.broadcast %cst_85 : f32 to vector<4x256xf32>
    %134 = arith.addf %133, %132 : vector<4x256xf32>
    %135 = tpu.reciprocal %134 {approx = true} : vector<4x256xf32> -> vector<4x256xf32>
    %cst_86 = arith.constant 1.06140542 : f32
    %136 = vector.broadcast %cst_86 : f32 to vector<4x256xf32>
    %137 = arith.mulf %136, %135 : vector<4x256xf32>
    %cst_87 = arith.constant 1.45315206 : f32
    %138 = vector.broadcast %cst_87 : f32 to vector<4x256xf32>
    %139 = arith.subf %137, %138 : vector<4x256xf32>
    %140 = arith.mulf %139, %135 : vector<4x256xf32>
    %cst_88 = arith.constant 1.42141378 : f32
    %141 = vector.broadcast %cst_88 : f32 to vector<4x256xf32>
    %142 = arith.addf %140, %141 : vector<4x256xf32>
    %143 = arith.mulf %142, %135 : vector<4x256xf32>
    %cst_89 = arith.constant 0.284496725 : f32
    %144 = vector.broadcast %cst_89 : f32 to vector<4x256xf32>
    %145 = arith.subf %143, %144 : vector<4x256xf32>
    %146 = arith.mulf %145, %135 : vector<4x256xf32>
    %cst_90 = arith.constant 0.254829586 : f32
    %147 = vector.broadcast %cst_90 : f32 to vector<4x256xf32>
    %148 = arith.addf %146, %147 : vector<4x256xf32>
    %149 = arith.mulf %148, %135 : vector<4x256xf32>
    %cst_91 = arith.constant 0.000000e+00 : f32
    %150 = vector.broadcast %cst_91 : f32 to vector<4x256xf32>
    %151 = arith.subf %150, %130 : vector<4x256xf32>
    %152 = arith.mulf %151, %130 : vector<4x256xf32>
    %153 = math.exp %152 : vector<4x256xf32>
    %154 = arith.mulf %149, %153 : vector<4x256xf32>
    %cst_92 = arith.constant 1.000000e+00 : f32
    %155 = vector.broadcast %cst_92 : f32 to vector<4x256xf32>
    %156 = arith.subf %155, %154 : vector<4x256xf32>
    %cst_93 = arith.constant 0.000000e+00 : f32
    %157 = vector.broadcast %cst_93 : f32 to vector<4x256xf32>
    %158 = arith.cmpf oge, %129, %157 : vector<4x256xf32>
    %cst_94 = arith.constant 0.000000e+00 : f32
    %159 = vector.broadcast %cst_94 : f32 to vector<4x256xf32>
    %160 = arith.subf %159, %156 : vector<4x256xf32>
    %161 = arith.select %158, %156, %160 : vector<4x256xi1>, vector<4x256xf32>
    %cst_95 = arith.constant 5.000000e-01 : f32
    %162 = vector.broadcast %cst_95 : f32 to vector<4x256xf32>
    %163 = arith.mulf %162, %127 : vector<4x256xf32>
    %cst_96 = arith.constant 1.000000e+00 : f32
    %164 = vector.broadcast %cst_96 : f32 to vector<4x256xf32>
    %165 = arith.addf %164, %161 : vector<4x256xf32>
    %166 = arith.mulf %163, %165 : vector<4x256xf32>
    %c0_97 = arith.constant 0 : index
    %c0_98 = arith.constant 0 : index
    %c0_99 = arith.constant 0 : index
    %167 = vector.load %arg17[%c0_97, %c0_98, %c0_99] : memref<1x4x256xf32, #tpu.memory_space<vmem>>, vector<1x4x256xf32>
    %168 = vector.shape_cast %167 : vector<1x4x256xf32> to vector<4x256xf32>
    %169 = vector.shape_cast %166 : vector<4x256xf32> to vector<1x4x256xf32>
    tpu.vector_store %arg17[%c0_97, %c0_98, %c0_99], %169 {strides = array<i32>} : memref<1x4x256xf32, #tpu.memory_space<vmem>>, vector<1x4x256xf32>,
    return
  }
  func.func @transform_0(%arg0: i32, %arg1: i32) -> (i32, i32, i32) {
    %c0_i32 = arith.constant 0 : i32
    %c0_i32_0 = arith.constant 0 : i32
    return %arg0, %arg1, %c0_i32 : i32, i32, i32
  }
  func.func @transform_1(%arg0: i32, %arg1: i32) -> (i32, i32) {
    %c0_i32 = arith.constant 0 : i32
    %c0_i32_0 = arith.constant 0 : i32
    %c0_i32_1 = arith.constant 0 : i32
    return %c0_i32, %c0_i32_0 : i32, i32
  }
  func.func @transform_2(%arg0: i32, %arg1: i32) -> (i32, i32) {
    %c0_i32 = arith.constant 0 : i32
    %c0_i32_0 = arith.constant 0 : i32
    %c0_i32_1 = arith.constant 0 : i32
    return %c0_i32, %c0_i32_0 : i32, i32
  }
  func.func @transform_3(%arg0: i32, %arg1: i32) -> (i32, i32) {
    %c0_i32 = arith.constant 0 : i32
    %c0_i32_0 = arith.constant 0 : i32
    %c0_i32_1 = arith.constant 0 : i32
    return %c0_i32, %c0_i32_0 : i32, i32
  }
  func.func @transform_4(%arg0: i32, %arg1: i32) -> (i32, i32) {
    %c0_i32 = arith.constant 0 : i32
    %c0_i32_0 = arith.constant 0 : i32
    %c0_i32_1 = arith.constant 0 : i32
    return %c0_i32, %c0_i32_0 : i32, i32
  }
  func.func @transform_5(%arg0: i32, %arg1: i32) -> (i32, i32) {
    %c0_i32 = arith.constant 0 : i32
    %c0_i32_0 = arith.constant 0 : i32
    %c0_i32_1 = arith.constant 0 : i32
    return %c0_i32, %c0_i32_0 : i32, i32
  }
  func.func @transform_6(%arg0: i32, %arg1: i32) -> (i32, i32) {
    %c0_i32 = arith.constant 0 : i32
    %c0_i32_0 = arith.constant 0 : i32
    %c0_i32_1 = arith.constant 0 : i32
    return %c0_i32, %c0_i32_0 : i32, i32
  }
  func.func @transform_7(%arg0: i32, %arg1: i32) -> (i32, i32) {
    %c0_i32 = arith.constant 0 : i32
    %c0_i32_0 = arith.constant 0 : i32
    %c0_i32_1 = arith.constant 0 : i32
    return %c0_i32, %c0_i32_0 : i32, i32
  }
  func.func @transform_8(%arg0: i32, %arg1: i32) -> (i32, i32) {
    %c0_i32 = arith.constant 0 : i32
    %c0_i32_0 = arith.constant 0 : i32
    %c0_i32_1 = arith.constant 0 : i32
    return %c0_i32, %c0_i32_0 : i32, i32
  }
  func.func @transform_9(%arg0: i32, %arg1: i32) -> (i32, i32) {
    %c0_i32 = arith.constant 0 : i32
    %c0_i32_0 = arith.constant 0 : i32
    %c0_i32_1 = arith.constant 0 : i32
    return %c0_i32, %c0_i32_0 : i32, i32
  }
  func.func @transform_10(%arg0: i32, %arg1: i32) -> (i32, i32) {
    %c0_i32 = arith.constant 0 : i32
    %c0_i32_0 = arith.constant 0 : i32
    %c0_i32_1 = arith.constant 0 : i32
    return %c0_i32, %c0_i32_0 : i32, i32
  }
  func.func @transform_11(%arg0: i32, %arg1: i32) -> (i32, i32) {
    %c0_i32 = arith.constant 0 : i32
    %c0_i32_0 = arith.constant 0 : i32
    %c0_i32_1 = arith.constant 0 : i32
    return %c0_i32, %c0_i32_0 : i32, i32
  }
  func.func @transform_12(%arg0: i32, %arg1: i32) -> (i32, i32) {
    %c0_i32 = arith.constant 0 : i32
    %c0_i32_0 = arith.constant 0 : i32
    %c0_i32_1 = arith.constant 0 : i32
    return %c0_i32, %c0_i32_0 : i32, i32
  }
  func.func @transform_13(%arg0: i32, %arg1: i32) -> (i32, i32) {
    %c0_i32 = arith.constant 0 : i32
    %c0_i32_0 = arith.constant 0 : i32
    %c0_i32_1 = arith.constant 0 : i32
    return %c0_i32, %c0_i32_0 : i32, i32
  }
  func.func @transform_14(%arg0: i32, %arg1: i32) -> (i32, i32) {
    %c0_i32 = arith.constant 0 : i32
    %c0_i32_0 = arith.constant 0 : i32
    %c0_i32_1 = arith.constant 0 : i32
    return %c0_i32, %c0_i32_0 : i32, i32
  }
  func.func @transform_15(%arg0: i32, %arg1: i32) -> (i32, i32, i32) {
    %c0_i32 = arith.constant 0 : i32
    %c0_i32_0 = arith.constant 0 : i32
    return %arg0, %c0_i32, %arg1 : i32, i32, i32
  }
}

</mosaic_0001>

<bundles_post_ra>
// kernel: tpu_custom_call.1
= control target key start
LH: loop header
LB: loop body
LE: loop exit
PB: predicated region body
PF: predicated region fallthrough
CT: control target
= control target key end

     0   :  { %s10341_s0 = inlined_call_operand.vmem [shape: f32[2,256,4], index: 0, kind: input, shape index: {}]   ;;  %s10342_s1 = inlined_call_operand.vmem [shape: f32[1,4], index: 1, kind: input, shape index: {}]   ;;  %s10343_s2 = inlined_call_operand.vmem [shape: f32[1,4], index: 2, kind: input, shape index: {}]   ;;  %s10344_s3 = inlined_call_operand.vmem [shape: f32[4,16], index: 3, kind: input, shape index: {}]   ;;  %s10345_s4 = inlined_call_operand.vmem [shape: f32[4,8], index: 4, kind: input, shape index: {}]   ;;  %s10346_s5 = inlined_call_operand.vmem [shape: f32[1,8], index: 5, kind: input, shape index: {}]   ;;  %s10347_s6 = inlined_call_operand.vmem [shape: f32[8,33], index: 6, kind: input, shape index: {}]   ;;  %s10348_s7 = inlined_call_operand.vmem [shape: f32[1,8], index: 7, kind: input, shape index: {}]   ;;  %s10349_s8 = inlined_call_operand.vmem [shape: f32[1,8], index: 8, kind: input, shape index: {}]   ;;  %s10350_s9 = inlined_call_operand.vmem [shape: f32[1,8], index: 9, kind: input, shape index: {}]   ;;  %s10351_s10 = inlined_call_operand.vmem [shape: f32[8,4], index: 10, kind: input, shape index: {}]   ;;  %s10352_s11 = inlined_call_operand.vmem [shape: f32[1,128], index: 11, kind: input, shape index: {}]   ;;  %s10353_s12 = inlined_call_operand.vmem [shape: f32[8,128], index: 12, kind: input, shape index: {}]   ;;  %s10354_s13 = inlined_call_operand.vmem [shape: f32[16,128], index: 13, kind: input, shape index: {}]   ;;  %s10355_s14 = inlined_call_operand.vmem [shape: f32[128,8], index: 14, kind: input, shape index: {}]   ;;  %s10356_s15 = inlined_call_operand.hbm [shape: f32[2,4,256], index: 15, kind: output, shape index: {}]  }
   0x1   :  { %10405 = sst [smem:[#allocation67_spill]] %s10341_s0 }
   0x2   :  { %10406 = sst [smem:[#allocation68_spill]] %s10342_s1 }
   0x3   :  { %10407 = sst [smem:[#allocation69_spill]] %s10343_s2 }
   0x4   :  { %10408 = sst [smem:[#allocation70_spill]] %s10344_s3 }
   0x5   :  { %10409 = sst [smem:[#allocation71_spill]] %s10345_s4 }
   0x6   :  { %20 = vsyncpa [#allocation11], 0 }
   0x7   :  { %22 = vsyncpa [#allocation11 + $0x1], 0  ;;  %s7682_s18 = smov 0   ;;  %s7684_s19 = smov 0  }
   0x8   :  { %s7686_s20 = smov 0   ;;  %s7688_s21 = smov 0  }
   0x9   :  { %s7690_s22 = smov 0   ;;  %s7692_s23 = smov 0  }
   0xa LB: > { %10410 = sst [smem:[#allocation13_spill]] %s7564_s18  ;;  %s5946_s24 = sadd.s32 4294967295, %s7584_s23   ;;  %s7584_s23 = sphi %s7692_s23, %s28_s23   ;;  %s7580_s22 = sphi %s7690_s22, %s10533_s22   ;;  %s7576_s21 = sphi %s7688_s21, %s10532_s21   ;;  %s7572_s20 = sphi %s7686_s20, %s10531_s20   ;;  %s7568_s19 = sphi %s7684_s19, %s10530_s19   ;;  %s7564_s18 = sphi %s7682_s18, %s10529_s18  }
   0xb   : > { %s5947_s25 = sadd.s32 4294967294, %s7584_s23   ;;  %s40_s26 = sadd.s32 1, %s7580_s22 }
   0xc   : > { %s371_s27 = sadd.s32 1, %s7572_s20  ;;  %p42_p0 = scmp.ge.s32.totalorder %s40_s26, 2 }
   0xd   : > { %p381_p1 = scmp.ne.s32.totalorder %s7572_s20, %s7568_s19  ;;  %p382_p2 = scmp.eq.s32.totalorder %s5946_s24, 1 }
   0xe   : > { %p387_p3 = scmp.ne.s32.totalorder %s7568_s19, %s7564_s18  ;;  %s10535_s26 = smov (%p42_p0, %s40_s26), 0 }
   0xf   : > { %10411 = sst [smem:[#allocation14_spill]] %s10535_s26  ;;  %p7722_p4 = por %p382_p2, %p381_p1 }
  0x10   : > { %p388_p5 = scmp.eq.s32.totalorder %s5947_s25, 1  ;;  %s366_s29 = ssub.s32 %s7580_s22, %s10535_s26 }
  0x11   : > { %p5950_p6 = scmp.ge.s32.totalorder %s7584_s23, 1  ;;  %p369_p7 = scmp.eq.s32.totalorder %s366_s29, 0 }
  0x12   : > { %p7729_p8 = por %p388_p5, %p387_p3  ;;  %p461_p9 = scmp.lt.s32.totalorder %s7584_s23, 3 }
  0x13   : > { %s7735_s16 = scalar_select %p369_p7, %s7572_s20, %s371_s27  }
  0x14   : > { %p462_p10 = pnand %p5950_p6, %p461_p9 }
  0x16   : > { %465 = sbr.rel (%p462_p10) target bundleno = 2039 (0x7f7), region = 80 }
  0x1b   : > { %p514_p11 = scmp.lt.s32.totalorder %s7576_s21, 1  ;;  %vm563_vm0 = vcmask 31744   ;;  %s10414_s0 = sld [smem:[#allocation67_spill]]  ;;  %vm1156_vm1 = vcmask 1043456   ;;  %vm529_vm2 = vcmask 64512   ;;  %vm3935_vm3 = vcmask 130048  }
  0x1c   : > { %s10415_s3 = sld [smem:[#allocation70_spill]]  ;;  %s10389_s29 = sand.u32 1, %s7568_s19  }
  0x1d   : > { %s515_s17 = scalar_select %p514_p11, %s7576_s21, 1 }
  0x1e   : > { %s10416_s1 = sld [smem:[#allocation68_spill]]  ;;  %s7597_s25 = smov 111  }
  0x1f   : > { %s6204_s24 = sshll.u32 %s515_s17, 8  ;;  %s8050_s17 = sshll.u32 %s10389_s29, 3 }
  0x20   : > { %s10417_s2 = sld [smem:[#allocation69_spill]]  ;;  %s512_s29 = scalar_lea.vmem [#allocation10], %s8050_s17 }
  0x21   : > { %s7742_s26 = scalar_lea.vmem %s10414_s0, %s6204_s24  ;;  %s10420_s4 = sld [smem:[#allocation71_spill]] }
  0x22   : > { %v7745_v0 = vld [vmem:[%s7742_s26] sm:$0xff]  ;;  %v7748_v1 = vld [vmem:[%s7742_s26 + $0x10] sm:$0xff]  ;;  %v7751_v2 = vld [vmem:[%s7742_s26 + $0x8] sm:$0xff]  ;;  %s7596_s24 = smov 127   ;;  %s9893_s18 = smov 0  }
  0x23   : > { %v564_v3 = vsel %vm563_vm0, %v7745_v0, 0.0  ;;  %v570_v4 = vsel %vm563_vm0, %v7748_v1, 0.0  ;;  %v7758_v5 = vld [vmem:[%s7742_s26 + $0x18] sm:$0xff]  ;;  %v567_v6 = vsel %vm563_vm0, %v7751_v2, 0.0  ;;  %v7765_v8 = vld [vmem:[%s7742_s26 + $0x20] sm:$0xff]  ;;  %v7768_v9 = vld [vmem:[%s7742_s26 + $0x28] sm:$0xff] }
  0x24   : > { %565 = vadd.xlane.f32.xlu0 %v564_v3  ;;  %571 = vadd.xlane.f32.xlu1 %v570_v4  ;;  %v573_v7 = vsel %vm563_vm0, %v7758_v5, 0.0  ;;  %v576_v10 = vsel %vm563_vm0, %v7765_v8, 0.0  ;;  %v579_v11 = vsel %vm563_vm0, %v7768_v9, 0.0  ;;  %v7775_v12 = vld [vmem:[%s7742_s26 + $0x30] sm:$0xff]  ;;  %v7778_v13 = vld [vmem:[%s7742_s26 + $0x38] sm:$0xff]  ;;  %v7785_v16 = vld [vmem:[%s7742_s26 + $0x40] sm:$0xff] }
  0x25   : > { %v582_v14 = vsel %vm563_vm0, %v7775_v12, 0.0  ;;  %v585_v15 = vsel %vm563_vm0, %v7778_v13, 0.0  ;;  %v7788_v17 = vld [vmem:[%s7742_s26 + $0x48] sm:$0xff]  ;;  %v588_v18 = vsel %vm563_vm0, %v7785_v16, 0.0  ;;  %v7795_v20 = vld [vmem:[%s7742_s26 + $0x50] sm:$0xff]  ;;  %v7798_v21 = vld [vmem:[%s7742_s26 + $0x58] sm:$0xff] }
  0x26   : > { %v591_v19 = vsel %vm563_vm0, %v7788_v17, 0.0  ;;  %v594_v22 = vsel %vm563_vm0, %v7795_v20, 0.0  ;;  %v597_v23 = vsel %vm563_vm0, %v7798_v21, 0.0  ;;  %v7805_v24 = vld [vmem:[%s7742_s26 + $0x60] sm:$0xff]  ;;  %v7808_v25 = vld [vmem:[%s7742_s26 + $0x68] sm:$0xff]  ;;  %v7815_v28 = vld [vmem:[%s7742_s26 + $0x70] sm:$0xff] }
  0x27   : > { %v600_v26 = vsel %vm563_vm0, %v7805_v24, 0.0  ;;  %v603_v27 = vsel %vm563_vm0, %v7808_v25, 0.0  ;;  %v7818_v29 = vld [vmem:[%s7742_s26 + $0x78] sm:$0xff]  ;;  %v606_v30 = vsel %vm563_vm0, %v7815_v28, 0.0  ;;  %v7825_v32 = vld [vmem:[%s7742_s26 + $0x80] sm:$0xff]  ;;  %v7828_v33 = vld [vmem:[%s7742_s26 + $0x88] sm:$0xff] }
  0x28   : > { %568 = vadd.xlane.f32.xlu0 %v567_v6  ;;  %574 = vadd.xlane.f32.xlu1 %v573_v7  ;;  %v609_v31 = vsel %vm563_vm0, %v7818_v29, 0.0  ;;  %v612_v34 = vsel %vm563_vm0, %v7825_v32, 0.0  ;;  %v615_v35 = vsel %vm563_vm0, %v7828_v33, 0.0  ;;  %v7835_v36 = vld [vmem:[%s7742_s26 + $0x90] sm:$0xff]  ;;  %v7838_v37 = vld [vmem:[%s7742_s26 + $0x98] sm:$0xff]  ;;  %v7845_v40 = vld [vmem:[%s7742_s26 + $0xa0] sm:$0xff] }
  0x29   : > { %v618_v38 = vsel %vm563_vm0, %v7835_v36, 0.0  ;;  %v621_v39 = vsel %vm563_vm0, %v7838_v37, 0.0  ;;  %v7848_v41 = vld [vmem:[%s7742_s26 + $0xa8] sm:$0xff]  ;;  %v624_v42 = vsel %vm563_vm0, %v7845_v40, 0.0  ;;  %v7855_v44 = vld [vmem:[%s7742_s26 + $0xb0] sm:$0xff]  ;;  %v7858_v45 = vld [vmem:[%s7742_s26 + $0xb8] sm:$0xff] }
  0x2a   : > { %v627_v43 = vsel %vm563_vm0, %v7848_v41, 0.0  ;;  %v630_v46 = vsel %vm563_vm0, %v7855_v44, 0.0  ;;  %v633_v47 = vsel %vm563_vm0, %v7858_v45, 0.0  ;;  %v7865_v48 = vld [vmem:[%s7742_s26 + $0xc0] sm:$0xff]  ;;  %v7868_v49 = vld [vmem:[%s7742_s26 + $0xc8] sm:$0xff]  ;;  %v7875_v52 = vld [vmem:[%s7742_s26 + $0xd0] sm:$0xff] }
  0x2b   : > { %v636_v50 = vsel %vm563_vm0, %v7865_v48, 0.0  ;;  %v639_v51 = vsel %vm563_vm0, %v7868_v49, 0.0  ;;  %v7878_v53 = vld [vmem:[%s7742_s26 + $0xd8] sm:$0xff]  ;;  %v642_v54 = vsel %vm563_vm0, %v7875_v52, 0.0  ;;  %v7885_v56 = vld [vmem:[%s7742_s26 + $0xe0] sm:$0xff]  ;;  %v7888_v57 = vld [vmem:[%s7742_s26 + $0xe8] sm:$0xff] }
  0x2c   : > { %577 = vadd.xlane.f32.xlu0 %v576_v10  ;;  %580 = vadd.xlane.f32.xlu1 %v579_v11  ;;  %v645_v55 = vsel %vm563_vm0, %v7878_v53, 0.0  ;;  %v648_v58 = vsel %vm563_vm0, %v7885_v56, 0.0  ;;  %v651_v59 = vsel %vm563_vm0, %v7888_v57, 0.0  ;;  %v7895_v60 = vld [vmem:[%s7742_s26 + $0xf0] sm:$0xff]  ;;  %v7898_v61 = vld [vmem:[%s7742_s26 + $0xf8] sm:$0xff] }
  0x2d   : > { %v654_v62 = vsel %vm563_vm0, %v7895_v60, 0.0  ;;  %v657_v63 = vsel %vm563_vm0, %v7898_v61, 0.0 }
  0x30   : > { %583 = vadd.xlane.f32.xlu0 %v582_v14  ;;  %586 = vadd.xlane.f32.xlu1 %v585_v15 }
  0x34   : > { %589 = vadd.xlane.f32.xlu0 %v588_v18  ;;  %592 = vadd.xlane.f32.xlu1 %v591_v19 }
  0x38   : > { %595 = vadd.xlane.f32.xlu0 %v594_v22  ;;  %598 = vadd.xlane.f32.xlu1 %v597_v23 }
  0x3c   : > { %601 = vadd.xlane.f32.xlu0 %v600_v26  ;;  %604 = vadd.xlane.f32.xlu1 %v603_v27 }
  0x40   : > { %607 = vadd.xlane.f32.xlu0 %v606_v30  ;;  %610 = vadd.xlane.f32.xlu1 %v609_v31 }
  0x44   : > { %613 = vadd.xlane.f32.xlu0 %v612_v34  ;;  %616 = vadd.xlane.f32.xlu1 %v615_v35 }
  0x48   : > { %619 = vadd.xlane.f32.xlu0 %v618_v38  ;;  %622 = vadd.xlane.f32.xlu1 %v621_v39 }
  0x4c   : > { %625 = vadd.xlane.f32.xlu0 %v624_v42  ;;  %628 = vadd.xlane.f32.xlu1 %v627_v43 }
  0x50   : > { %631 = vadd.xlane.f32.xlu0 %v630_v46  ;;  %634 = vadd.xlane.f32.xlu1 %v633_v47 }
  0x54   : > { %637 = vadd.xlane.f32.xlu0 %v636_v50  ;;  %640 = vadd.xlane.f32.xlu1 %v639_v51 }
  0x58   : > { %643 = vadd.xlane.f32.xlu0 %v642_v54  ;;  %646 = vadd.xlane.f32.xlu1 %v645_v55 }
  0x5c   : > { %649 = vadd.xlane.f32.xlu0 %v648_v58  ;;  %652 = vadd.xlane.f32.xlu1 %v651_v59 }
  0x60   : > { %655 = vadd.xlane.f32.xlu0 %v654_v62  ;;  %658 = vadd.xlane.f32.xlu1 %v657_v63 }
  0xad   : > { %v566_v3 = vpop.xlane.xlu0 %565  ;;  %v572_v4 = vpop.xlane.xlu1 %571 }
  0xae   : > { %v661_v6 = vmul.f32 0.25, %v566_v3  ;;  %v663_v7 = vmul.f32 0.25, %v572_v4 }
  0xb0   : > { %v7905_v10 = vsub.f32 %v7745_v0, %v661_v6  ;;  %v7908_v11 = vsub.f32 %v7748_v1, %v663_v7 }
  0xb1   : > { %v569_v14 = vpop.xlane.xlu0 %568  ;;  %v575_v15 = vpop.xlane.xlu1 %574 }
  0xb2   : > { %v662_v18 = vmul.f32 0.25, %v569_v14  ;;  %v664_v19 = vmul.f32 0.25, %v575_v15  ;;  %v725_v22 = vmul.f32 %v7905_v10, %v7905_v10  ;;  %v727_v23 = vmul.f32 %v7908_v11, %v7908_v11 }
  0xb4   : > { %v7915_v26 = vsub.f32 %v7751_v2, %v662_v18  ;;  %v7918_v27 = vsub.f32 %v7758_v5, %v664_v19  ;;  %v757_v0 = vsel %vm563_vm0, %v725_v22, 0.0  ;;  %v763_v31 = vsel %vm563_vm0, %v727_v23, 0.0 }
  0xb5   : > { %758 = vadd.xlane.f32.xlu0 %v757_v0  ;;  %v578_v1 = vpop.xlane.xlu0 %577  ;;  %v581_v30 = vpop.xlane.xlu1 %580 }
  0xb6   : > { %v665_v34 = vmul.f32 0.25, %v578_v1  ;;  %v666_v35 = vmul.f32 0.25, %v581_v30  ;;  %v726_v38 = vmul.f32 %v7915_v26, %v7915_v26  ;;  %v728_v39 = vmul.f32 %v7918_v27, %v7918_v27 }
  0xb8   : > { %v7927_v2 = vsub.f32 %v7765_v8, %v665_v34  ;;  %v7930_v5 = vsub.f32 %v7768_v9, %v666_v35  ;;  %v760_v42 = vsel %vm563_vm0, %v726_v38, 0.0  ;;  %v766_v47 = vsel %vm563_vm0, %v728_v39, 0.0 }
  0xb9   : > { %764 = vadd.xlane.f32.xlu0 %v763_v31  ;;  %761 = vadd.xlane.f32.xlu1 %v760_v42  ;;  %v584_v43 = vpop.xlane.xlu0 %583  ;;  %v587_v46 = vpop.xlane.xlu1 %586 }
  0xba   : > { %v667_v50 = vmul.f32 0.25, %v584_v43  ;;  %v668_v51 = vmul.f32 0.25, %v587_v46  ;;  %v729_v54 = vmul.f32 %v7927_v2, %v7927_v2  ;;  %v730_v8 = vmul.f32 %v7930_v5, %v7930_v5 }
  0xbc   : > { %v7939_v55 = vsub.f32 %v7775_v12, %v667_v50  ;;  %v7942_v9 = vsub.f32 %v7778_v13, %v668_v51  ;;  %v769_v58 = vsel %vm563_vm0, %v729_v54, 0.0  ;;  %v772_v63 = vsel %vm563_vm0, %v730_v8, 0.0 }
  0xbd   : > { %767 = vadd.xlane.f32.xlu1 %v766_v47  ;;  %770 = vadd.xlane.f32.xlu0 %v769_v58  ;;  %v590_v59 = vpop.xlane.xlu0 %589  ;;  %v593_v62 = vpop.xlane.xlu1 %592 }
  0xbe   : > { %v669_v3 = vmul.f32 0.25, %v590_v59  ;;  %v670_v4 = vmul.f32 0.25, %v593_v62  ;;  %v731_v6 = vmul.f32 %v7939_v55, %v7939_v55  ;;  %v732_v12 = vmul.f32 %v7942_v9, %v7942_v9 }
  0xc0   : > { %v7951_v7 = vsub.f32 %v7785_v16, %v669_v3  ;;  %v7954_v13 = vsub.f32 %v7788_v17, %v670_v4  ;;  %v775_v14 = vsel %vm563_vm0, %v731_v6, 0.0  ;;  %v778_v19 = vsel %vm563_vm0, %v732_v12, 0.0 }
  0xc1   : > { %773 = vadd.xlane.f32.xlu1 %v772_v63  ;;  %776 = vadd.xlane.f32.xlu0 %v775_v14  ;;  %v596_v15 = vpop.xlane.xlu0 %595  ;;  %v599_v18 = vpop.xlane.xlu1 %598 }
  0xc2   : > { %v671_v22 = vmul.f32 0.25, %v596_v15  ;;  %v672_v23 = vmul.f32 0.25, %v599_v18  ;;  %v733_v0 = vmul.f32 %v7951_v7, %v7951_v7  ;;  %v734_v16 = vmul.f32 %v7954_v13, %v7954_v13 }
  0xc4   : > { %v7963_v1 = vsub.f32 %v7795_v20, %v671_v22  ;;  %v7966_v17 = vsub.f32 %v7798_v21, %v672_v23  ;;  %v781_v30 = vsel %vm563_vm0, %v733_v0, 0.0  ;;  %v784_v35 = vsel %vm563_vm0, %v734_v16, 0.0 }
  0xc5   : > { %779 = vadd.xlane.f32.xlu1 %v778_v19  ;;  %782 = vadd.xlane.f32.xlu0 %v781_v30  ;;  %v602_v31 = vpop.xlane.xlu0 %601  ;;  %v605_v34 = vpop.xlane.xlu1 %604 }
  0xc6   : > { %v673_v38 = vmul.f32 0.25, %v602_v31  ;;  %v674_v39 = vmul.f32 0.25, %v605_v34  ;;  %v735_v42 = vmul.f32 %v7963_v1, %v7963_v1  ;;  %v736_v20 = vmul.f32 %v7966_v17, %v7966_v17 }
  0xc8   : > { %v7975_v43 = vsub.f32 %v7805_v24, %v673_v38  ;;  %v7978_v21 = vsub.f32 %v7808_v25, %v674_v39  ;;  %v787_v46 = vsel %vm563_vm0, %v735_v42, 0.0  ;;  %v790_v51 = vsel %vm563_vm0, %v736_v20, 0.0 }
  0xc9   : > { %785 = vadd.xlane.f32.xlu1 %v784_v35  ;;  %788 = vadd.xlane.f32.xlu0 %v787_v46  ;;  %v608_v47 = vpop.xlane.xlu0 %607  ;;  %v611_v50 = vpop.xlane.xlu1 %610 }
  0xca   : > { %v675_v54 = vmul.f32 0.25, %v608_v47  ;;  %v676_v8 = vmul.f32 0.25, %v611_v50  ;;  %v737_v58 = vmul.f32 %v7975_v43, %v7975_v43  ;;  %v738_v24 = vmul.f32 %v7978_v21, %v7978_v21 }
  0xcc   : > { %v7987_v59 = vsub.f32 %v7815_v28, %v675_v54  ;;  %v7990_v25 = vsub.f32 %v7818_v29, %v676_v8  ;;  %v793_v62 = vsel %vm563_vm0, %v737_v58, 0.0  ;;  %v796_v4 = vsel %vm563_vm0, %v738_v24, 0.0  ;;  %v1059_v58 = vld [vmem:[%s10415_s3] sm:$0xf] }
  0xcd   : > { %791 = vadd.xlane.f32.xlu1 %v790_v51  ;;  %794 = vadd.xlane.f32.xlu0 %v793_v62  ;;  %v614_v63 = vpop.xlane.xlu0 %613  ;;  %v617_v3 = vpop.xlane.xlu1 %616 }
  0xce   : > { %v677_v6 = vmul.f32 0.25, %v614_v63  ;;  %v678_v12 = vmul.f32 0.25, %v617_v3  ;;  %v739_v14 = vmul.f32 %v7987_v59, %v7987_v59  ;;  %v740_v28 = vmul.f32 %v7990_v25, %v7990_v25  ;;  %6473 = vmatprep.subr.msk.mxu0 %vm1156_vm1, %v1059_v58 }
  0xcf   : > { %6474 = vmatpush3.msk.msra.mxu0 %vm1156_vm1, %v1059_v58 }
  0xd0   : > { %v7999_v15 = vsub.f32 %v7825_v32, %v677_v6  ;;  %v8002_v29 = vsub.f32 %v7828_v33, %v678_v12  ;;  %v799_v18 = vsel %vm563_vm0, %v739_v14, 0.0  ;;  %v802_v23 = vsel %vm563_vm0, %v740_v28, 0.0 }
  0xd1   : > { %797 = vadd.xlane.f32.xlu1 %v796_v4  ;;  %800 = vadd.xlane.f32.xlu0 %v799_v18  ;;  %v620_v19 = vpop.xlane.xlu0 %619  ;;  %v623_v22 = vpop.xlane.xlu1 %622 }
  0xd2   : > { %v679_v0 = vmul.f32 0.25, %v620_v19  ;;  %v680_v16 = vmul.f32 0.25, %v623_v22  ;;  %v741_v30 = vmul.f32 %v7999_v15, %v7999_v15  ;;  %v742_v32 = vmul.f32 %v8002_v29, %v8002_v29 }
  0xd4   : > { %v8011_v31 = vsub.f32 %v7835_v36, %v679_v0  ;;  %v8014_v33 = vsub.f32 %v7838_v37, %v680_v16  ;;  %v805_v34 = vsel %vm563_vm0, %v741_v30, 0.0  ;;  %v808_v39 = vsel %vm563_vm0, %v742_v32, 0.0 }
  0xd5   : > { %803 = vadd.xlane.f32.xlu1 %v802_v23  ;;  %806 = vadd.xlane.f32.xlu0 %v805_v34  ;;  %v626_v35 = vpop.xlane.xlu0 %625  ;;  %v629_v38 = vpop.xlane.xlu1 %628 }
  0xd6   : > { %v681_v42 = vmul.f32 0.25, %v626_v35  ;;  %v682_v20 = vmul.f32 0.25, %v629_v38  ;;  %v743_v46 = vmul.f32 %v8011_v31, %v8011_v31  ;;  %v744_v36 = vmul.f32 %v8014_v33, %v8014_v33 }
  0xd8   : > { %v8023_v47 = vsub.f32 %v7845_v40, %v681_v42  ;;  %v8026_v37 = vsub.f32 %v7848_v41, %v682_v20  ;;  %v811_v50 = vsel %vm563_vm0, %v743_v46, 0.0  ;;  %v814_v8 = vsel %vm563_vm0, %v744_v36, 0.0 }
  0xd9   : > { %809 = vadd.xlane.f32.xlu1 %v808_v39  ;;  %812 = vadd.xlane.f32.xlu0 %v811_v50  ;;  %v632_v51 = vpop.xlane.xlu0 %631  ;;  %v635_v54 = vpop.xlane.xlu1 %634 }
  0xda   : > { %v683_v40 = vmul.f32 0.25, %v632_v51  ;;  %v684_v24 = vmul.f32 0.25, %v635_v54  ;;  %v745_v41 = vmul.f32 %v8023_v47, %v8023_v47  ;;  %v746_v62 = vmul.f32 %v8026_v37, %v8026_v37 }
  0xdc   : > { %v8040_v63 = vsub.f32 %v7855_v44, %v683_v40  ;;  %v8043_v3 = vsub.f32 %v7858_v45, %v684_v24  ;;  %v817_v4 = vsel %vm563_vm0, %v745_v41, 0.0  ;;  %v820_v14 = vsel %vm563_vm0, %v746_v62, 0.0 }
  0xdd   : > { %815 = vadd.xlane.f32.xlu1 %v814_v8  ;;  %818 = vadd.xlane.f32.xlu0 %v817_v4  ;;  %v638_v6 = vpop.xlane.xlu0 %637  ;;  %v641_v12 = vpop.xlane.xlu1 %640 }
  0xde   : > { %v685_v28 = vmul.f32 0.25, %v638_v6  ;;  %v686_v18 = vmul.f32 0.25, %v641_v12  ;;  %v747_v44 = vmul.f32 %v8040_v63, %v8040_v63  ;;  %v748_v45 = vmul.f32 %v8043_v3, %v8043_v3 }
  0xe0   : > { %v8057_v19 = vsub.f32 %v7865_v48, %v685_v28  ;;  %v8060_v22 = vsub.f32 %v7868_v49, %v686_v18  ;;  %v823_v23 = vsel %vm563_vm0, %v747_v44, 0.0  ;;  %v826_v30 = vsel %vm563_vm0, %v748_v45, 0.0 }
  0xe1   : > { %821 = vadd.xlane.f32.xlu1 %v820_v14  ;;  %824 = vadd.xlane.f32.xlu0 %v823_v23  ;;  %v644_v0 = vpop.xlane.xlu0 %643  ;;  %v647_v16 = vpop.xlane.xlu1 %646 }
  0xe2   : > { %v687_v32 = vmul.f32 0.25, %v644_v0  ;;  %v688_v34 = vmul.f32 0.25, %v647_v16  ;;  %v749_v35 = vmul.f32 %v8057_v19, %v8057_v19  ;;  %v750_v48 = vmul.f32 %v8060_v22, %v8060_v22 }
  0xe4   : > { %v8069_v38 = vsub.f32 %v7875_v52, %v687_v32  ;;  %v8072_v49 = vsub.f32 %v7878_v53, %v688_v34  ;;  %v829_v39 = vsel %vm563_vm0, %v749_v35, 0.0  ;;  %v832_v46 = vsel %vm563_vm0, %v750_v48, 0.0 }
  0xe5   : > { %827 = vadd.xlane.f32.xlu1 %v826_v30  ;;  %830 = vadd.xlane.f32.xlu0 %v829_v39  ;;  %v650_v42 = vpop.xlane.xlu0 %649  ;;  %v653_v20 = vpop.xlane.xlu1 %652 }
  0xe6   : > { %v689_v36 = vmul.f32 0.25, %v650_v42  ;;  %v690_v50 = vmul.f32 0.25, %v653_v20  ;;  %v751_v51 = vmul.f32 %v8069_v38, %v8069_v38  ;;  %v752_v52 = vmul.f32 %v8072_v49, %v8072_v49 }
  0xe8   : > { %v8081_v54 = vsub.f32 %v7885_v56, %v689_v36  ;;  %v8084_v53 = vsub.f32 %v7888_v57, %v690_v50  ;;  %v835_v8 = vsel %vm563_vm0, %v751_v51, 0.0  ;;  %v838_v24 = vsel %vm563_vm0, %v752_v52, 0.0 }
  0xe9   : > { %833 = vadd.xlane.f32.xlu1 %v832_v46  ;;  %836 = vadd.xlane.f32.xlu0 %v835_v8  ;;  %v656_v58 = vpop.xlane.xlu0 %655  ;;  %v659_v40 = vpop.xlane.xlu1 %658 }
  0xea   : > { %v691_v41 = vmul.f32 0.25, %v656_v58  ;;  %v692_v62 = vmul.f32 0.25, %v659_v40  ;;  %v753_v4 = vmul.f32 %v8081_v54, %v8081_v54  ;;  %v754_v56 = vmul.f32 %v8084_v53, %v8084_v53 }
  0xec   : > { %v8093_v6 = vsub.f32 %v7895_v60, %v691_v41  ;;  %v8096_v57 = vsub.f32 %v7898_v61, %v692_v62  ;;  %v841_v12 = vsel %vm563_vm0, %v753_v4, 0.0  ;;  %v844_v14 = vsel %vm563_vm0, %v754_v56, 0.0 }
  0xed   : > { %839 = vadd.xlane.f32.xlu1 %v838_v24  ;;  %842 = vadd.xlane.f32.xlu0 %v841_v12  ;;  %v8109_v12 = vld [vmem:[%s10416_s1] ss:$0 sm:$0xff] }
  0xee   : > { %v755_v28 = vmul.f32 %v8093_v6, %v8093_v6  ;;  %v756_v18 = vmul.f32 %v8096_v57, %v8096_v57 }
  0xf0   : > { %v847_v44 = vsel %vm563_vm0, %v755_v28, 0.0  ;;  %v850_v60 = vsel %vm563_vm0, %v756_v18, 0.0 }
  0xf1   : > { %845 = vadd.xlane.f32.xlu1 %v844_v14  ;;  %848 = vadd.xlane.f32.xlu0 %v847_v44 }
  0xf5   : > { %851 = vadd.xlane.f32.xlu1 %v850_v60 }
 0x13e   : > { %v759_v61 = vpop.xlane.xlu0 %758 }
 0x13f   : > { %v853_v45 = vmul.f32 0.25, %v759_v61  ;;  %v8115_v61 = vld [vmem:[%s10417_s2] ss:$0 sm:$0xff] }
 0x141   : > { %v885_v23 = vadd.f32 1e-05, %v853_v45 }
 0x142   : > { %v762_v0 = vpop.xlane.xlu1 %761  ;;  %v765_v16 = vpop.xlane.xlu0 %764 }
 0x143   : > { %6979 = vrsqrt.f32 %v885_v23  ;;  %v854_v30 = vmul.f32 0.25, %v762_v0  ;;  %v855_v32 = vmul.f32 0.25, %v765_v16 }
 0x145   : > { %v886_v34 = vadd.f32 1e-05, %v854_v30  ;;  %v887_v35 = vadd.f32 1e-05, %v855_v32 }
 0x146   : > { %v768_v48 = vpop.xlane.xlu1 %767  ;;  %v771_v39 = vpop.xlane.xlu0 %770 }
 0x147   : > { %6981 = vrsqrt.f32 %v886_v34  ;;  %v856_v42 = vmul.f32 0.25, %v768_v48  ;;  %v857_v20 = vmul.f32 0.25, %v771_v39 }
 0x148   : > { %6983 = vrsqrt.f32 %v887_v35 }
 0x149   : > { %v888_v46 = vadd.f32 1e-05, %v856_v42  ;;  %v889_v36 = vadd.f32 1e-05, %v857_v20 }
 0x14a   : > { %v774_v50 = vpop.xlane.xlu1 %773  ;;  %v777_v51 = vpop.xlane.xlu0 %776 }
 0x14b   : > { %6985 = vrsqrt.f32 %v888_v46  ;;  %v858_v52 = vmul.f32 0.25, %v774_v50  ;;  %v859_v8 = vmul.f32 0.25, %v777_v51 }
 0x14c   : > { %6987 = vrsqrt.f32 %v889_v36 }
 0x14d   : > { %v890_v58 = vadd.f32 1e-05, %v858_v52  ;;  %v891_v40 = vadd.f32 1e-05, %v859_v8 }
 0x14e   : > { %v780_v24 = vpop.xlane.xlu1 %779  ;;  %v783_v41 = vpop.xlane.xlu0 %782 }
 0x14f   : > { %6989 = vrsqrt.f32 %v890_v58  ;;  %v860_v62 = vmul.f32 0.25, %v780_v24  ;;  %v861_v4 = vmul.f32 0.25, %v783_v41 }
 0x150   : > { %v6980_v56 = vpop.eup %6979  ;;  %6991 = vrsqrt.f32 %v891_v40 }
 0x151   : > { %v892_v14 = vadd.f32 1e-05, %v860_v62  ;;  %v893_v28 = vadd.f32 1e-05, %v861_v4  ;;  %v949_v18 = vmul.f32 %v6980_v56, %v7905_v10 }
 0x152   : > { %v786_v44 = vpop.xlane.xlu1 %785  ;;  %v789_v60 = vpop.xlane.xlu0 %788 }
 0x153   : > { %6993 = vrsqrt.f32 %v892_v14  ;;  %v862_v45 = vmul.f32 0.25, %v786_v44  ;;  %v863_v23 = vmul.f32 0.25, %v789_v60  ;;  %v988_v0 = vmul.f32 %v8109_v12, %v949_v18 }
 0x154   : > { %v6982_v16 = vpop.eup %6981  ;;  %6995 = vrsqrt.f32 %v893_v28 }
 0x155   : > { %v6984_v30 = vpop.eup %6983  ;;  %v894_v32 = vadd.f32 1e-05, %v862_v45  ;;  %v895_v34 = vadd.f32 1e-05, %v863_v23  ;;  %v1027_v35 = vadd.f32 %v8115_v61, %v988_v0  ;;  %v950_v10 = vmul.f32 %v6982_v16, %v7915_v26 }
 0x156   : > { %v792_v48 = vpop.xlane.xlu1 %791  ;;  %v795_v39 = vpop.xlane.xlu0 %794  ;;  %v951_v42 = vmul.f32 %v6984_v30, %v7908_v11 }
 0x157   : > { %6997 = vrsqrt.f32 %v894_v32  ;;  %v864_v20 = vmul.f32 0.25, %v792_v48  ;;  %v865_v46 = vmul.f32 0.25, %v795_v39  ;;  %6475 = vmatprep.mubr.msk.f32.mxu0 %vm563_vm0, %v1027_v35  ;;  %v989_v36 = vmul.f32 %v8109_v12, %v950_v10 }
 0x158   : > { %v6986_v50 = vpop.eup %6985  ;;  %6999 = vrsqrt.f32 %v895_v34  ;;  %v990_v51 = vmul.f32 %v8109_v12, %v951_v42 }
 0x159   : > { %v6988_v52 = vpop.eup %6987  ;;  %v896_v8 = vadd.f32 1e-05, %v864_v20  ;;  %v897_v58 = vadd.f32 1e-05, %v865_v46  ;;  %v1028_v26 = vadd.f32 %v8115_v61, %v989_v36  ;;  %v952_v40 = vmul.f32 %v6986_v50, %v7918_v27 }
 0x15a   : > { %v798_v24 = vpop.xlane.xlu1 %797  ;;  %v801_v11 = vpop.xlane.xlu0 %800  ;;  %v1029_v41 = vadd.f32 %v8115_v61, %v990_v51  ;;  %v953_v62 = vmul.f32 %v6988_v52, %v7927_v2 }
 0x15b   : > { %7001 = vrsqrt.f32 %v896_v8  ;;  %v866_v4 = vmul.f32 0.25, %v798_v24  ;;  %v867_v56 = vmul.f32 0.25, %v801_v11  ;;  %6476 = vmatmul.mubr.msk.f32.vlgmr.msra.gmra.mxu0 %vm563_vm0, %v1028_v26  ;;  %v991_v14 = vmul.f32 %v8109_v12, %v952_v40 }
 0x15c   : > { %v6990_v28 = vpop.eup %6989  ;;  %7003 = vrsqrt.f32 %v897_v58  ;;  %6478 = vmatprep.mubr.msk.f32.mxu0 %vm563_vm0, %v1029_v41  ;;  %v992_v18 = vmul.f32 %v8109_v12, %v953_v62 }
 0x15d   : > { %v6992_v27 = vpop.eup %6991  ;;  %v898_v44 = vadd.f32 1e-05, %v866_v4  ;;  %v899_v60 = vadd.f32 1e-05, %v867_v56  ;;  %v1030_v45 = vadd.f32 %v8115_v61, %v991_v14  ;;  %v954_v2 = vmul.f32 %v6990_v28, %v7930_v5 }
 0x15e   : > { %v804_v23 = vpop.xlane.xlu1 %803  ;;  %v807_v0 = vpop.xlane.xlu0 %806  ;;  %v1031_v16 = vadd.f32 %v8115_v61, %v992_v18  ;;  %v955_v30 = vmul.f32 %v6992_v27, %v7939_v55 }
 0x15f   : > { %7005 = vrsqrt.f32 %v898_v44  ;;  %v868_v32 = vmul.f32 0.25, %v804_v23  ;;  %v869_v34 = vmul.f32 0.25, %v807_v0  ;;  %6479 = vmatmul.mubr.msk.f32.gmra.mxu0 %vm563_vm0, %v1030_v45  ;;  %v993_v35 = vmul.f32 %v8109_v12, %v954_v2 }
 0x160   : > { %v6994_v10 = vpop.eup %6993  ;;  %7007 = vrsqrt.f32 %v899_v60  ;;  %6481 = vmatprep.mubr.msk.f32.mxu0 %vm563_vm0, %v1031_v16  ;;  %v994_v48 = vmul.f32 %v8109_v12, %v955_v30 }
 0x161   : > { %v6996_v5 = vpop.eup %6995  ;;  %v900_v39 = vadd.f32 1e-05, %v868_v32  ;;  %v901_v42 = vadd.f32 1e-05, %v869_v34  ;;  %v1032_v20 = vadd.f32 %v8115_v61, %v993_v35  ;;  %v956_v55 = vmul.f32 %v6994_v10, %v7942_v9 }
 0x162   : > { %v810_v46 = vpop.xlane.xlu1 %809  ;;  %v813_v36 = vpop.xlane.xlu0 %812  ;;  %v1033_v50 = vadd.f32 %v8115_v61, %v994_v48  ;;  %v957_v51 = vmul.f32 %v6996_v5, %v7951_v7 }
 0x163   : > { %7009 = vrsqrt.f32 %v900_v39  ;;  %v870_v52 = vmul.f32 0.25, %v810_v46  ;;  %v871_v8 = vmul.f32 0.25, %v813_v36  ;;  %6482 = vmatmul.mubr.msk.f32.gmra.mxu0 %vm563_vm0, %v1032_v20  ;;  %v995_v58 = vmul.f32 %v8109_v12, %v956_v55 }
 0x164   : > { %v6998_v26 = vpop.eup %6997  ;;  %7011 = vrsqrt.f32 %v901_v42  ;;  %6484 = vmatprep.mubr.msk.f32.mxu0 %vm563_vm0, %v1033_v50  ;;  %v996_v40 = vmul.f32 %v8109_v12, %v957_v51 }
 0x165   : > { %v7000_v9 = vpop.eup %6999  ;;  %v902_v24 = vadd.f32 1e-05, %v870_v52  ;;  %v903_v11 = vadd.f32 1e-05, %v871_v8  ;;  %v1034_v41 = vadd.f32 %v8115_v61, %v995_v58  ;;  %v958_v7 = vmul.f32 %v6998_v26, %v7954_v13 }
 0x166   : > { %v816_v62 = vpop.xlane.xlu1 %815  ;;  %v819_v4 = vpop.xlane.xlu0 %818  ;;  %v1035_v56 = vadd.f32 %v8115_v61, %v996_v40  ;;  %v959_v14 = vmul.f32 %v7000_v9, %v7963_v1 }
 0x167   : > { %7013 = vrsqrt.f32 %v902_v24  ;;  %v872_v28 = vmul.f32 0.25, %v816_v62  ;;  %v873_v18 = vmul.f32 0.25, %v819_v4  ;;  %6485 = vmatmul.mubr.msk.f32.gmra.mxu0 %vm563_vm0, %v1034_v41  ;;  %v997_v27 = vmul.f32 %v8109_v12, %v958_v7 }
 0x168   : > { %v7002_v44 = vpop.eup %7001  ;;  %7015 = vrsqrt.f32 %v903_v11  ;;  %6487 = vmatprep.mubr.msk.f32.mxu0 %vm563_vm0, %v1035_v56  ;;  %v998_v60 = vmul.f32 %v8109_v12, %v959_v14 }
 0x169   : > { %v7004_v13 = vpop.eup %7003  ;;  %v904_v45 = vadd.f32 1e-05, %v872_v28  ;;  %v905_v2 = vadd.f32 1e-05, %v873_v18  ;;  %v1036_v23 = vadd.f32 %v8115_v61, %v997_v27  ;;  %v960_v1 = vmul.f32 %v7002_v44, %v7966_v17 }
 0x16a   : > { %v822_v0 = vpop.xlane.xlu1 %821  ;;  %v825_v16 = vpop.xlane.xlu0 %824  ;;  %v1037_v30 = vadd.f32 %v8115_v61, %v998_v60  ;;  %v961_v32 = vmul.f32 %v7004_v13, %v7975_v43 }
 0x16b   : > { %7017 = vrsqrt.f32 %v904_v45  ;;  %v874_v34 = vmul.f32 0.25, %v822_v0  ;;  %v875_v35 = vmul.f32 0.25, %v825_v16  ;;  %6488 = vmatmul.mubr.msk.f32.gmra.mxu0 %vm563_vm0, %v1036_v23  ;;  %v999_v10 = vmul.f32 %v8109_v12, %v960_v1 }
 0x16c   : > { %v7006_v48 = vpop.eup %7005  ;;  %7019 = vrsqrt.f32 %v905_v2  ;;  %6490 = vmatprep.mubr.msk.f32.mxu0 %vm563_vm0, %v1037_v30  ;;  %v1000_v5 = vmul.f32 %v8109_v12, %v961_v32 }
 0x16d   : > { %v7008_v17 = vpop.eup %7007  ;;  %v906_v39 = vadd.f32 1e-05, %v874_v34  ;;  %v907_v42 = vadd.f32 1e-05, %v875_v35  ;;  %v1038_v20 = vadd.f32 %v8115_v61, %v999_v10  ;;  %v962_v43 = vmul.f32 %v7006_v48, %v7978_v21 }
 0x16e   : > { %v828_v55 = vpop.xlane.xlu1 %827  ;;  %v831_v46 = vpop.xlane.xlu0 %830  ;;  %v1039_v36 = vadd.f32 %v8115_v61, %v1000_v5  ;;  %v963_v50 = vmul.f32 %v7008_v17, %v7987_v59 }
 0x16f   : > { %7021 = vrsqrt.f32 %v906_v39  ;;  %v876_v51 = vmul.f32 0.25, %v828_v55  ;;  %v877_v52 = vmul.f32 0.25, %v831_v46  ;;  %6491 = vmatmul.mubr.msk.f32.gmra.mxu0 %vm563_vm0, %v1038_v20  ;;  %v1001_v8 = vmul.f32 %v8109_v12, %v962_v43 }
 0x170   : > { %v7010_v58 = vpop.eup %7009  ;;  %7023 = vrsqrt.f32 %v907_v42  ;;  %6493 = vmatprep.mubr.msk.f32.mxu0 %vm563_vm0, %v1039_v36  ;;  %v1002_v26 = vmul.f32 %v8109_v12, %v963_v50 }
 0x171   : > { %v7012_v21 = vpop.eup %7011  ;;  %v908_v40 = vadd.f32 1e-05, %v876_v51  ;;  %v909_v9 = vadd.f32 1e-05, %v877_v52  ;;  %v1040_v24 = vadd.f32 %v8115_v61, %v1001_v8  ;;  %v964_v59 = vmul.f32 %v7010_v58, %v7990_v25 }
 0x172   : > { %v834_v11 = vpop.xlane.xlu1 %833  ;;  %v837_v41 = vpop.xlane.xlu0 %836  ;;  %v1041_v7 = vadd.f32 %v8115_v61, %v1002_v26  ;;  %v965_v62 = vmul.f32 %v7012_v21, %v7999_v15 }
 0x173   : > { %7025 = vrsqrt.f32 %v908_v40  ;;  %v878_v4 = vmul.f32 0.25, %v834_v11  ;;  %v879_v56 = vmul.f32 0.25, %v837_v41  ;;  %6494 = vmatmul.mubr.msk.f32.gmra.mxu0 %vm563_vm0, %v1040_v24  ;;  %v1003_v14 = vmul.f32 %v8109_v12, %v964_v59 }
 0x174   : > { %v7014_v28 = vpop.eup %7013  ;;  %7027 = vrsqrt.f32 %v909_v9  ;;  %6496 = vmatprep.mubr.msk.f32.mxu0 %vm563_vm0, %v1041_v7  ;;  %v1004_v18 = vmul.f32 %v8109_v12, %v965_v62 }
 0x175   : > { %v7016_v25 = vpop.eup %7015  ;;  %v910_v27 = vadd.f32 1e-05, %v878_v4  ;;  %v911_v44 = vadd.f32 1e-05, %v879_v56  ;;  %v1042_v60 = vadd.f32 %v8115_v61, %v1003_v14  ;;  %v966_v15 = vmul.f32 %v7014_v28, %v8002_v29 }
 0x176   : > { %v840_v13 = vpop.xlane.xlu1 %839  ;;  %v843_v45 = vpop.xlane.xlu0 %842  ;;  %v1043_v2 = vadd.f32 %v8115_v61, %v1004_v18  ;;  %v967_v23 = vmul.f32 %v7016_v25, %v8011_v31 }
 0x177   : > { %7029 = vrsqrt.f32 %v910_v27  ;;  %v880_v1 = vmul.f32 0.25, %v840_v13  ;;  %v881_v0 = vmul.f32 0.25, %v843_v45  ;;  %6497 = vmatmul.mubr.msk.f32.gmra.mxu0 %vm563_vm0, %v1042_v60  ;;  %v1005_v16 = vmul.f32 %v8109_v12, %v966_v15 }
 0x178   : > { %v7018_v30 = vpop.eup %7017  ;;  %7031 = vrsqrt.f32 %v911_v44  ;;  %6499 = vmatprep.mubr.msk.f32.mxu0 %vm563_vm0, %v1043_v2  ;;  %v1006_v32 = vmul.f32 %v8109_v12, %v967_v23 }
 0x179   : > { %v7020_v29 = vpop.eup %7019  ;;  %v912_v34 = vadd.f32 1e-05, %v880_v1  ;;  %v913_v35 = vadd.f32 1e-05, %v881_v0  ;;  %v1044_v10 = vadd.f32 %v8115_v61, %v1005_v16  ;;  %v968_v31 = vmul.f32 %v7018_v30, %v8014_v33 }
 0x17a   : > { %v846_v48 = vpop.xlane.xlu1 %845  ;;  %v849_v5 = vpop.xlane.xlu0 %848  ;;  %v1045_v17 = vadd.f32 %v8115_v61, %v1006_v32  ;;  %v969_v39 = vmul.f32 %v7020_v29, %v8023_v47 }
 0x17b   : > { %7033 = vrsqrt.f32 %v912_v34  ;;  %v882_v42 = vmul.f32 0.25, %v846_v48  ;;  %v883_v20 = vmul.f32 0.25, %v849_v5  ;;  %6500 = vmatmul.mubr.msk.f32.gmra.mxu0 %vm563_vm0, %v1044_v10  ;;  %v1007_v43 = vmul.f32 %v8109_v12, %v968_v31 }
 0x17c   : > { %v7022_v55 = vpop.eup %7021  ;;  %7035 = vrsqrt.f32 %v913_v35  ;;  %6502 = vmatprep.mubr.msk.f32.mxu0 %vm563_vm0, %v1045_v17  ;;  %v1008_v46 = vmul.f32 %v8109_v12, %v969_v39  ;;  %v7594_v10 = vmov 0.0  }
 0x17d   : > { %v7024_v33 = vpop.eup %7023  ;;  %v914_v36 = vadd.f32 1e-05, %v882_v42  ;;  %v915_v50 = vadd.f32 1e-05, %v883_v20  ;;  %v1046_v51 = vadd.f32 %v8115_v61, %v1007_v43  ;;  %v970_v47 = vmul.f32 %v7022_v55, %v8026_v37  ;;  %528 = vst [vmem:[#allocation2] sm:$0x1] %v7594_v10 }
 0x17e   : > { %v852_v52 = vpop.xlane.xlu1 %851  ;;  %v1047_v8 = vadd.f32 %v8115_v61, %v1008_v46  ;;  %v971_v58 = vmul.f32 %v7024_v33, %v8040_v63  ;;  %530 = vst.msk [vmem:[#allocation3] sm:$0xff] %vm529_vm2, %v7594_v10  ;;  %v1578_v55 = vld [vmem:[%s10420_s4] sm:$0xf] }
 0x17f   : > { %7037 = vrsqrt.f32 %v914_v36  ;;  %v884_v26 = vmul.f32 0.25, %v852_v52  ;;  %6503 = vmatmul.mubr.msk.f32.gmra.mxu0 %vm563_vm0, %v1046_v51  ;;  %v1009_v21 = vmul.f32 %v8109_v12, %v970_v47 }
 0x180   : > { %v7026_v40 = vpop.eup %7025  ;;  %7039 = vrsqrt.f32 %v915_v50  ;;  %6505 = vmatprep.mubr.msk.f32.mxu0 %vm563_vm0, %v1047_v8  ;;  %v1010_v9 = vmul.f32 %v8109_v12, %v971_v58 }
 0x181   : > { %v7028_v24 = vpop.eup %7027  ;;  %v916_v59 = vadd.f32 1e-05, %v884_v26  ;;  %v1048_v37 = vadd.f32 %v8115_v61, %v1009_v21  ;;  %v972_v11 = vmul.f32 %v7026_v40, %v8043_v3 }
 0x182   : > { %v1049_v63 = vadd.f32 %v8115_v61, %v1010_v9  ;;  %v973_v41 = vmul.f32 %v7028_v24, %v8057_v19 }
 0x183   : > { %7041 = vrsqrt.f32 %v916_v59  ;;  %6506 = vmatmul.mubr.msk.f32.gmra.mxu0 %vm563_vm0, %v1048_v37  ;;  %v1011_v7 = vmul.f32 %v8109_v12, %v972_v11 }
 0x184   : > { %v7030_v62 = vpop.eup %7029  ;;  %6508 = vmatprep.mubr.msk.f32.mxu0 %vm563_vm0, %v1049_v63  ;;  %v1012_v4 = vmul.f32 %v8109_v12, %v973_v41  ;;  %v8248_v31 = vld [vmem:[#allocation2] sm:$0x1]  }
 0x185   : > { %v7032_v56 = vpop.eup %7031  ;;  %v1050_v14 = vadd.f32 %v8115_v61, %v1011_v7  ;;  %v974_v28 = vmul.f32 %v7030_v62, %v8060_v22  ;;  %10418 = vst [vmem:[#allocation15_spill] sm:$0xff] %v8248_v31 }
 0x186   : > { %v1051_v3 = vadd.f32 %v8115_v61, %v1012_v4  ;;  %v975_v18 = vmul.f32 %v7032_v56, %v8069_v38 }
 0x187   : > { %6509 = vmatmul.mubr.msk.f32.gmra.mxu0 %vm563_vm0, %v1050_v14  ;;  %v1013_v19 = vmul.f32 %v8109_v12, %v974_v28 }
 0x188   : > { %v7034_v25 = vpop.eup %7033  ;;  %6511 = vmatprep.mubr.msk.f32.mxu0 %vm563_vm0, %v1051_v3  ;;  %v1014_v27 = vmul.f32 %v8109_v12, %v975_v18 }
 0x189   : > { %v7036_v44 = vpop.eup %7035  ;;  %v1052_v60 = vadd.f32 %v8115_v61, %v1013_v19  ;;  %v976_v15 = vmul.f32 %v7034_v25, %v8072_v49 }
 0x18a   : > { %v1053_v22 = vadd.f32 %v8115_v61, %v1014_v27  ;;  %v977_v13 = vmul.f32 %v7036_v44, %v8081_v54 }
 0x18b   : > { %6512 = vmatmul.mubr.msk.f32.gmra.mxu0 %vm563_vm0, %v1052_v60  ;;  %v1015_v38 = vmul.f32 %v8109_v12, %v976_v15 }
 0x18c   : > { %v7038_v45 = vpop.eup %7037  ;;  %6514 = vmatprep.mubr.msk.f32.mxu0 %vm563_vm0, %v1053_v22  ;;  %v1016_v2 = vmul.f32 %v8109_v12, %v977_v13 }
 0x18d   : > { %v7040_v23 = vpop.eup %7039  ;;  %v1054_v1 = vadd.f32 %v8115_v61, %v1015_v38  ;;  %v978_v0 = vmul.f32 %v7038_v45, %v8084_v53 }
 0x18e   : > { %v1055_v49 = vadd.f32 %v8115_v61, %v1016_v2  ;;  %v979_v16 = vmul.f32 %v7040_v23, %v8093_v6  ;;  %v8308_v23 = vld [vmem:[%s10346_s5] ss:$0 sm:$0xff] }
 0x18f   : > { %6515 = vmatmul.mubr.msk.f32.gmra.mxu0 %vm563_vm0, %v1054_v1  ;;  %v1017_v54 = vmul.f32 %v8109_v12, %v978_v0 }
 0x190   : > { %v7042_v30 = vpop.eup %7041  ;;  %6517 = vmatprep.mubr.msk.f32.mxu0 %vm563_vm0, %v1055_v49  ;;  %v1018_v32 = vmul.f32 %v8109_v12, %v979_v16 }
 0x191   : > { %v1056_v29 = vadd.f32 %v8115_v61, %v1017_v54  ;;  %v980_v34 = vmul.f32 %v7042_v30, %v8096_v57  ;;  %v2211_v57 = vld [vmem:[%s10347_s6] sm:$0xff] }
 0x192   : > { %v1057_v35 = vadd.f32 %v8115_v61, %v1018_v32  ;;  %6523 = vmatprep.subr.mxu1 %v2211_v57 }
 0x193   : > { %6518 = vmatmul.mubr.msk.f32.gmra.mxu0 %vm563_vm0, %v1056_v29  ;;  %v1019_v53 = vmul.f32 %v8109_v12, %v980_v34  ;;  %6524 = vmatpush3.msra.mxu1 %v2211_v57  ;;  %v1611_v12 = vlaneseq }
 0x194   : > { %6520 = vmatprep.mubr.msk.f32.mxu0 %vm563_vm0, %v1057_v35 }
 0x195   : > { %v1058_v6 = vadd.f32 %v8115_v61, %v1019_v53  ;;  %v1612_v61 = vshrl.u32 %v1611_v12, 7 }
 0x197   : > { %6521 = vmatmul.mubr.msk.f32.gmra.mxu0 %vm563_vm0, %v1058_v6  ;;  %v1613_v17 = vsub.s32 0, %v1612_v61  ;;  %v1681_v39 = vsub.s32 1, %v1612_v61  ;;  %v1781_v20 = vsub.s32 2, %v1612_v61  ;;  %v1881_v46 = vsub.s32 3, %v1612_v61 }
 0x199   : > { %v8269_v33 = vrot.slane %v1578_v55, %v1613_v17  ;;  %v8271_v36 = vrot.slane %v1578_v55, %v1681_v39  ;;  %v8277_v51 = vrot.slane %v1578_v55, %v1781_v20  ;;  %v8281_v26 = vrot.slane %v1578_v55, %v1881_v46 }
 0x21b   : > { %v8250_v48 = vpop.f32.mrf.mxu0 }
 0x21c   : > { %1547 = vst.msk [vmem:[#allocation3 + $0x10] sm:$0xff] %vm529_vm2, %v8250_v48 }
 0x21d   : > { %v8254_v5 = vpop.f32.mrf.mxu0 }
 0x21e   : > { %1546 = vst.msk [vmem:[#allocation3 + $0x8] sm:$0xff] %vm529_vm2, %v8254_v5 }
 0x21f   : > { %v8258_v42 = vpop.f32.mrf.mxu0 }
 0x220   : > { %1549 = vst.msk [vmem:[#allocation3 + $0x20] sm:$0xff] %vm529_vm2, %v8258_v42 }
 0x221   : > { %v8262_v43 = vpop.f32.mrf.mxu0 }
 0x222   : > { %10419 = vst [vmem:[#allocation16_spill] sm:$0xff] %v8262_v43  ;;  %1548 = vst.msk [vmem:[#allocation3 + $0x18] sm:$0xff] %vm529_vm2, %v8262_v43 }
 0x223   : > { %v8273_v50 = vpop.f32.mrf.mxu0  ;;  %v1848_v59 = vld [vmem:[#allocation3 + $0x10] sm:$0xff] }
 0x224   : > { %10421 = vst [vmem:[#allocation17_spill] sm:$0xff] %v8273_v50  ;;  %1551 = vst.msk [vmem:[#allocation3 + $0x30] sm:$0xff] %vm529_vm2, %v8273_v50  ;;  %v1884_v18 = vmul.f32 %v8281_v26, %v1848_v59 }
 0x225   : > { %v8279_v47 = vpop.f32.mrf.mxu0  ;;  %v1579_v52 = vld [vmem:[#allocation3 + $0x5] sm:$0xff]  ;;  %v1580_v9 = vld [vmem:[#allocation3 + $0xd] sm:$0xff] }
 0x226   : > { %10422 = vst [vmem:[#allocation18_spill] sm:$0xff] %v8279_v47  ;;  %v1647_v8 = vld [vmem:[#allocation3 + $0x6] sm:$0xff]  ;;  %1550 = vst.msk [vmem:[#allocation3 + $0x28] sm:$0xff] %vm529_vm2, %v8279_v47  ;;  %v1615_v21 = vmul.f32 %v8269_v33, %v1579_v52  ;;  %v1648_v24 = vld [vmem:[#allocation3 + $0xe] sm:$0xff]  ;;  %v1616_v63 = vmul.f32 %v8269_v33, %v1580_v9 }
 0x227   : > { %v1747_v58 = vld [vmem:[#allocation3 + $0x7] sm:$0xff]  ;;  %v1683_v40 = vmul.f32 %v8271_v36, %v1647_v8  ;;  %v8287_v37 = vpop.f32.mrf.mxu0  ;;  %v1684_v41 = vmul.f32 %v8271_v36, %v1648_v24  ;;  %v1748_v7 = vld [vmem:[#allocation3 + $0xf] sm:$0xff] }
 0x228   : > { %10423 = vst [vmem:[#allocation19_spill] sm:$0xff] %v8287_v37  ;;  %v1847_v11 = vld [vmem:[#allocation3 + $0x8] sm:$0xff]  ;;  %1553 = vst.msk [vmem:[#allocation3 + $0x40] sm:$0xff] %vm529_vm2, %v8287_v37  ;;  %v1783_v4 = vmul.f32 %v8277_v51, %v1747_v58  ;;  %v1850_v56 = vld [vmem:[#allocation3 + $0x20] sm:$0xff]  ;;  %v1784_v3 = vmul.f32 %v8277_v51, %v1748_v7 }
 0x229   : > { %v1715_v62 = vadd.f32 %v1683_v40, %v1615_v21  ;;  %v8294_v14 = vpop.f32.mrf.mxu0  ;;  %v1716_v28 = vadd.f32 %v1684_v41, %v1616_v63  ;;  %v1581_v19 = vld [vmem:[#allocation3 + $0x15] sm:$0xff]  ;;  %v1883_v60 = vmul.f32 %v8281_v26, %v1847_v11  ;;  %v1582_v38 = vld [vmem:[#allocation3 + $0x1d] sm:$0xff]  ;;  %v1886_v54 = vmul.f32 %v8281_v26, %v1850_v56 }
 0x22a   : > { %10424 = vst [vmem:[#allocation20_spill] sm:$0xff] %v8294_v14  ;;  %v1649_v25 = vld [vmem:[#allocation3 + $0x16] sm:$0xff]  ;;  %1552 = vst.msk [vmem:[#allocation3 + $0x38] sm:$0xff] %vm529_vm2, %v8294_v14  ;;  %v1617_v15 = vmul.f32 %v8269_v33, %v1581_v19  ;;  %v1650_v45 = vld [vmem:[#allocation3 + $0x1e] sm:$0xff]  ;;  %v1618_v0 = vmul.f32 %v8269_v33, %v1582_v38 }
 0x22b   : > { %v1749_v27 = vld [vmem:[#allocation3 + $0x17] sm:$0xff]  ;;  %v1815_v44 = vadd.f32 %v1783_v4, %v1715_v62  ;;  %v1685_v22 = vmul.f32 %v8271_v36, %v1649_v25  ;;  %v8303_v2 = vpop.f32.mrf.mxu0  ;;  %v1816_v1 = vadd.f32 %v1784_v3, %v1716_v28  ;;  %v1686_v49 = vmul.f32 %v8271_v36, %v1650_v45  ;;  %v1750_v16 = vld [vmem:[#allocation3 + $0x1f] sm:$0xff] }
 0x22c   : > { %v1849_v13 = vld [vmem:[#allocation3 + $0x18] sm:$0xff]  ;;  %10425 = vst [vmem:[#allocation21_spill] sm:$0xff] %v8303_v2  ;;  %v1852_v30 = vld [vmem:[#allocation3 + $0x30] sm:$0xff]  ;;  %1555 = vst.msk [vmem:[#allocation3 + $0x50] sm:$0xff] %vm529_vm2, %v8303_v2  ;;  %v1785_v34 = vmul.f32 %v8277_v51, %v1749_v27  ;;  %v1786_v57 = vmul.f32 %v8277_v51, %v1750_v16 }
 0x22d   : > { %v1915_v32 = vadd.f32 %v1883_v60, %v1815_v44  ;;  %v1717_v29 = vadd.f32 %v1685_v22, %v1617_v15  ;;  %v1885_v35 = vmul.f32 %v8281_v26, %v1849_v13  ;;  %v8317_v53 = vpop.f32.mrf.mxu0  ;;  %v1916_v6 = vadd.f32 %v1884_v18, %v1816_v1  ;;  %v1583_v12 = vld [vmem:[#allocation3 + $0x25] sm:$0xff]  ;;  %v1584_v58 = vld [vmem:[#allocation3 + $0x2d] sm:$0xff] }
 0x22e   : > { %10426 = vst [vmem:[#allocation22_spill] sm:$0xff] %v8317_v53  ;;  %v1718_v10 = vadd.f32 %v1686_v49, %v1618_v0  ;;  %v1651_v61 = vld [vmem:[#allocation3 + $0x26] sm:$0xff]  ;;  %v1888_v39 = vmul.f32 %v8281_v26, %v1852_v30  ;;  %1554 = vst.msk [vmem:[#allocation3 + $0x48] sm:$0xff] %vm529_vm2, %v8317_v53  ;;  %v1619_v46 = vmul.f32 %v8269_v33, %v1583_v12  ;;  %v1652_v21 = vld [vmem:[#allocation3 + $0x2e] sm:$0xff] }
 0x22f   : > { %v1751_v17 = vld [vmem:[#allocation3 + $0x27] sm:$0xff]  ;;  %v8324_v20 = vadd.f32 %v8308_v23, %v1915_v32  ;;  %v1817_v55 = vadd.f32 %v1785_v34, %v1717_v29  ;;  %v1687_v52 = vmul.f32 %v8271_v36, %v1651_v61  ;;  %v8328_v40 = vpop.f32.mrf.mxu0  ;;  %v8331_v9 = vadd.f32 %v8308_v23, %v1916_v6  ;;  %v1752_v63 = vld [vmem:[#allocation3 + $0x2f] sm:$0xff] }
 0x230   : > { %v1851_v8 = vld [vmem:[#allocation3 + $0x28] sm:$0xff]  ;;  %10427 = vst [vmem:[#allocation23_spill] sm:$0xff] %v8328_v40  ;;  %v1818_v24 = vadd.f32 %v1786_v57, %v1718_v10  ;;  %v1787_v59 = vmul.f32 %v8277_v51, %v1751_v17  ;;  %1557 = vst.msk [vmem:[#allocation3 + $0x60] sm:$0xff] %vm529_vm2, %v8328_v40  ;;  %v1620_v4 = vmul.f32 %v8269_v33, %v1584_v58  ;;  %v1854_v61 = vld [vmem:[#allocation3 + $0x40] sm:$0xff] }
 0x231   : > { %v1887_v11 = vmul.f32 %v8281_v26, %v1851_v8  ;;  %v1987_v41 = vsub.f32 0.0, %v8324_v20  ;;  %v1917_v7 = vadd.f32 %v1885_v35, %v1817_v55  ;;  %v1719_v62 = vadd.f32 %v1687_v52, %v1619_v46  ;;  %v8339_v56 = vpop.f32.mrf.mxu0  ;;  %v1585_v25 = vld [vmem:[#allocation3 + $0x35] sm:$0xff]  ;;  %v1654_v34 = vld [vmem:[#allocation3 + $0x3e] sm:$0xff] }
 0x232   : > { %10428 = vst [vmem:[#allocation24_spill] sm:$0xff] %v8339_v56  ;;  %v1988_v28 = vsub.f32 0.0, %v8331_v9  ;;  %v1918_v3 = vadd.f32 %v1886_v54, %v1818_v24  ;;  %v1688_v18 = vmul.f32 %v8271_v36, %v1652_v21  ;;  %v1788_v19 = vmul.f32 %v8277_v51, %v1752_v63  ;;  %v1653_v27 = vld [vmem:[#allocation3 + $0x36] sm:$0xff]  ;;  %1556 = vst.msk [vmem:[#allocation3 + $0x58] sm:$0xff] %vm529_vm2, %v8339_v56  ;;  %v1754_v12 = vld [vmem:[#allocation3 + $0x3f] sm:$0xff] }
 0x233   : > { %v1753_v44 = vld [vmem:[#allocation3 + $0x37] sm:$0xff]  ;;  %v2019_v60 = vmul.f32 1.442695, %v1987_v41  ;;  %v8347_v15 = vadd.f32 %v8308_v23, %v1917_v7  ;;  %v1819_v22 = vadd.f32 %v1787_v59, %v1719_v62  ;;  %v1621_v13 = vmul.f32 %v8269_v33, %v1585_v25  ;;  %v8350_v38 = vpop.f32.mrf.mxu0 }
 0x234   : > { %10429 = vst [vmem:[#allocation25_spill] sm:$0xff] %v8350_v38  ;;  %v2021_v45 = vmul.f32 1.442695, %v1988_v28  ;;  %v8353_v1 = vadd.f32 %v8308_v23, %v1918_v3  ;;  %v1720_v0 = vadd.f32 %v1688_v18, %v1620_v4  ;;  %v1689_v49 = vmul.f32 %v8271_v36, %v1653_v27  ;;  %v1853_v16 = vld [vmem:[#allocation3 + $0x38] sm:$0xff]  ;;  %1559 = vst.msk [vmem:[#allocation3 + $0x70] sm:$0xff] %vm529_vm2, %v8350_v38 }
 0x235   : > { %v1586_v54 = vld [vmem:[#allocation3 + $0x3d] sm:$0xff]  ;;  %7043 = vpow2.f32 %v2019_v60  ;;  %v1989_v30 = vsub.f32 0.0, %v8347_v15  ;;  %v1919_v32 = vadd.f32 %v1887_v11, %v1819_v22  ;;  %v1789_v29 = vmul.f32 %v8277_v51, %v1753_v44  ;;  %v8360_v35 = vpop.f32.mrf.mxu0  ;;  %v1587_v11 = vld [vmem:[#allocation3 + $0x45] sm:$0xff]  ;;  %v1588_v25 = vld [vmem:[#allocation3 + $0x4d] sm:$0xff] }
 0x236   : > { %10430 = vst [vmem:[#allocation26_spill] sm:$0xff] %v8360_v35  ;;  %7045 = vpow2.f32 %v2021_v45  ;;  %v1990_v6 = vsub.f32 0.0, %v8353_v1  ;;  %v1820_v10 = vadd.f32 %v1788_v19, %v1720_v0  ;;  %v1721_v57 = vadd.f32 %v1689_v49, %v1621_v13  ;;  %1558 = vst.msk [vmem:[#allocation3 + $0x68] sm:$0xff] %vm529_vm2, %v8360_v35  ;;  %v1655_v63 = vld [vmem:[#allocation3 + $0x46] sm:$0xff]  ;;  %v1656_v27 = vld [vmem:[#allocation3 + $0x4e] sm:$0xff] }
 0x237   : > { %v2023_v17 = vmul.f32 1.442695, %v1989_v30  ;;  %v8366_v55 = vadd.f32 %v8308_v23, %v1919_v32  ;;  %v1889_v46 = vmul.f32 %v8281_v26, %v1853_v16  ;;  %v1622_v52 = vmul.f32 %v8269_v33, %v1586_v54  ;;  %v8370_v8 = vpop.f32.mrf.mxu0  ;;  %v1755_v41 = vld [vmem:[#allocation3 + $0x47] sm:$0xff]  ;;  %v1756_v45 = vld [vmem:[#allocation3 + $0x4f] sm:$0xff] }
 0x238   : > { %10431 = vst [vmem:[#allocation27_spill] sm:$0xff] %v8370_v8  ;;  %v2025_v58 = vmul.f32 1.442695, %v1990_v6  ;;  %v1920_v21 = vadd.f32 %v1888_v39, %v1820_v10  ;;  %v1821_v24 = vadd.f32 %v1789_v29, %v1721_v57  ;;  %v1690_v59 = vmul.f32 %v8271_v36, %v1654_v34  ;;  %1561 = vst.msk [vmem:[#allocation3 + $0x80] sm:$0xff] %vm529_vm2, %v8370_v8  ;;  %v1855_v28 = vld [vmem:[#allocation3 + $0x48] sm:$0xff]  ;;  %v1856_v32 = vld [vmem:[#allocation3 + $0x50] sm:$0xff] }
 0x239   : > { %7047 = vpow2.f32 %v2023_v17  ;;  %v1991_v7 = vsub.f32 0.0, %v8366_v55  ;;  %v1790_v62 = vmul.f32 %v8277_v51, %v1754_v12  ;;  %v1890_v4 = vmul.f32 %v8281_v26, %v1854_v61  ;;  %v8378_v3 = vpop.f32.mrf.mxu0  ;;  %v1589_v29 = vld [vmem:[#allocation3 + $0x55] sm:$0xff] }
 0x23a   : > { %10432 = vst [vmem:[#allocation28_spill] sm:$0xff] %v8378_v3  ;;  %7049 = vpow2.f32 %v2025_v58  ;;  %v8381_v39 = vadd.f32 %v8308_v23, %v1920_v21  ;;  %v1921_v18 = vadd.f32 %v1889_v46, %v1821_v24  ;;  %v1722_v19 = vadd.f32 %v1690_v59, %v1622_v52  ;;  %1560 = vst.msk [vmem:[#allocation3 + $0x78] sm:$0xff] %vm529_vm2, %v8378_v3  ;;  %v1657_v57 = vld [vmem:[#allocation3 + $0x56] sm:$0xff] }
 0x23b   : > { %v2027_v44 = vmul.f32 1.442695, %v1991_v7  ;;  %v1623_v60 = vmul.f32 %v8269_v33, %v1587_v11  ;;  %v1691_v22 = vmul.f32 %v8271_v36, %v1655_v63  ;;  %v1791_v13 = vmul.f32 %v8277_v51, %v1755_v41  ;;  %v8388_v0 = vpop.f32.mrf.mxu0  ;;  %v1757_v58 = vld [vmem:[#allocation3 + $0x57] sm:$0xff] }
 0x23c   : > { %10433 = vst [vmem:[#allocation29_spill] sm:$0xff] %v8388_v0  ;;  %v1992_v49 = vsub.f32 0.0, %v8381_v39  ;;  %v8392_v16 = vadd.f32 %v8308_v23, %v1921_v18  ;;  %v1822_v54 = vadd.f32 %v1790_v62, %v1722_v19  ;;  %v1891_v30 = vmul.f32 %v8281_v26, %v1855_v28  ;;  %1563 = vst.msk [vmem:[#allocation3 + $0x90] sm:$0xff] %vm529_vm2, %v8388_v0  ;;  %v1857_v21 = vld [vmem:[#allocation3 + $0x58] sm:$0xff] }
 0x23d   : > { %7051 = vpow2.f32 %v2027_v44  ;;  %v1723_v34 = vadd.f32 %v1691_v22, %v1623_v60  ;;  %v1624_v6 = vmul.f32 %v8269_v33, %v1588_v25  ;;  %v1692_v10 = vmul.f32 %v8271_v36, %v1656_v27  ;;  %v8399_v12 = vpop.f32.mrf.mxu0  ;;  %v1590_v41 = vld [vmem:[#allocation3 + $0x5d] sm:$0xff] }
 0x23e   : > { %10434 = vst [vmem:[#allocation30_spill] sm:$0xff] %v8399_v12  ;;  %v2029_v61 = vmul.f32 1.442695, %v1992_v49  ;;  %v1993_v17 = vsub.f32 0.0, %v8392_v16  ;;  %v1922_v46 = vadd.f32 %v1890_v4, %v1822_v54  ;;  %v1792_v52 = vmul.f32 %v8277_v51, %v1756_v45  ;;  %1562 = vst.msk [vmem:[#allocation3 + $0x88] sm:$0xff] %vm529_vm2, %v8399_v12  ;;  %v1658_v18 = vld [vmem:[#allocation3 + $0x5e] sm:$0xff] }
 0x23f   : > { %v1823_v24 = vadd.f32 %v1791_v13, %v1723_v34  ;;  %v1724_v59 = vadd.f32 %v1692_v10, %v1624_v6  ;;  %v1892_v11 = vmul.f32 %v8281_v26, %v1856_v32  ;;  %v1625_v63 = vmul.f32 %v8269_v33, %v1589_v29  ;;  %v8407_v7 = vpop.f32.mrf.mxu0  ;;  %v1758_v60 = vld [vmem:[#allocation3 + $0x5f] sm:$0xff] }
 0x240   : > { %10435 = vst [vmem:[#allocation31_spill] sm:$0xff] %v8407_v7  ;;  %7053 = vpow2.f32 %v2029_v61  ;;  %v2031_v62 = vmul.f32 1.442695, %v1993_v17  ;;  %v8410_v4 = vadd.f32 %v8308_v23, %v1922_v46  ;;  %v1693_v28 = vmul.f32 %v8271_v36, %v1657_v57  ;;  %1565 = vst.msk [vmem:[#allocation3 + $0xa0] sm:$0xff] %vm529_vm2, %v8407_v7  ;;  %v1858_v10 = vld [vmem:[#allocation3 + $0x60] sm:$0xff] }
 0x241   : > { %v1923_v19 = vadd.f32 %v1891_v30, %v1823_v24  ;;  %v1824_v25 = vadd.f32 %v1792_v52, %v1724_v59  ;;  %v1793_v27 = vmul.f32 %v8277_v51, %v1757_v58  ;;  %v1893_v44 = vmul.f32 %v8281_v26, %v1857_v21  ;;  %v8417_v13 = vpop.f32.mrf.mxu0  ;;  %v1591_v57 = vld [vmem:[#allocation3 + $0x65] sm:$0xff] }
 0x242   : > { %v7044_v22 = vpop.eup %7043  ;;  %10436 = vst [vmem:[#allocation32_spill] sm:$0xff] %v8417_v13  ;;  %7055 = vpow2.f32 %v2031_v62  ;;  %v1994_v45 = vsub.f32 0.0, %v8410_v4  ;;  %v1725_v49 = vadd.f32 %v1693_v28, %v1625_v63  ;;  %v1626_v54 = vmul.f32 %v8269_v33, %v1590_v41  ;;  %1564 = vst.msk [vmem:[#allocation3 + $0x98] sm:$0xff] %vm529_vm2, %v8417_v13 }
 0x243   : > { %v7046_v32 = vpop.eup %7045  ;;  %v2083_v30 = vadd.f32 1.0, %v7044_v22  ;;  %v8424_v29 = vadd.f32 %v8308_v23, %v1923_v19  ;;  %v1924_v34 = vadd.f32 %v1892_v11, %v1824_v25  ;;  %v1694_v6 = vmul.f32 %v8271_v36, %v1658_v18  ;;  %v8427_v61 = vpop.f32.mrf.mxu0  ;;  %v1659_v11 = vld [vmem:[#allocation3 + $0x66] sm:$0xff] }
 0x244   : > { %10437 = vst [vmem:[#allocation33_spill] sm:$0xff] %v8427_v61  ;;  %v2084_v17 = vadd.f32 1.0, %v7046_v32  ;;  %v2033_v46 = vmul.f32 1.442695, %v1994_v45  ;;  %v1825_v52 = vadd.f32 %v1793_v27, %v1725_v49  ;;  %v1794_v58 = vmul.f32 %v8277_v51, %v1758_v60  ;;  %1567 = vst.msk [vmem:[#allocation3 + $0xb0] sm:$0xff] %vm529_vm2, %v8427_v61  ;;  %v1759_v19 = vld [vmem:[#allocation3 + $0x67] sm:$0xff] }
 0x245   : > { %7057 = vrcp.f32 %v2083_v30  ;;  %v1995_v21 = vsub.f32 0.0, %v8424_v29  ;;  %v8434_v24 = vadd.f32 %v8308_v23, %v1924_v34  ;;  %v1726_v59 = vadd.f32 %v1694_v6, %v1626_v54  ;;  %v8436_v41 = vpop.f32.mrf.mxu0  ;;  %v1859_v25 = vld [vmem:[#allocation3 + $0x68] sm:$0xff] }
 0x246   : > { %v7048_v63 = vpop.eup %7047  ;;  %10438 = vst [vmem:[#allocation34_spill] sm:$0xff] %v8436_v41  ;;  %7059 = vrcp.f32 %v2084_v17  ;;  %v1925_v62 = vadd.f32 %v1893_v44, %v1825_v52  ;;  %v1894_v28 = vmul.f32 %v8281_v26, %v1858_v10  ;;  %v1627_v18 = vmul.f32 %v8269_v33, %v1591_v57  ;;  %1566 = vst.msk [vmem:[#allocation3 + $0xa8] sm:$0xff] %vm529_vm2, %v8436_v41  ;;  %v1592_v34 = vld [vmem:[#allocation3 + $0x6d] sm:$0xff] }
 0x247   : > { %v7050_v27 = vpop.eup %7049  ;;  %v2085_v60 = vadd.f32 1.0, %v7048_v63  ;;  %7061 = vpow2.f32 %v2033_v46  ;;  %v2035_v22 = vmul.f32 1.442695, %v1995_v21  ;;  %v1996_v45 = vsub.f32 0.0, %v8434_v24  ;;  %v8443_v49 = vpop.f32.mrf.mxu0  ;;  %v1660_v6 = vld [vmem:[#allocation3 + $0x6e] sm:$0xff] }
 0x248   : > { %10439 = vst [vmem:[#allocation35_spill] sm:$0xff] %v8443_v49  ;;  %v2086_v54 = vadd.f32 1.0, %v7050_v27  ;;  %v8446_v44 = vadd.f32 %v8308_v23, %v1925_v62  ;;  %v1826_v32 = vadd.f32 %v1794_v58, %v1726_v59  ;;  %v1695_v30 = vmul.f32 %v8271_v36, %v1659_v11  ;;  %1569 = vst.msk [vmem:[#allocation3 + $0xc0] sm:$0xff] %vm529_vm2, %v8443_v49  ;;  %v1760_v11 = vld [vmem:[#allocation3 + $0x6f] sm:$0xff] }
 0x249   : > { %7063 = vrcp.f32 %v2085_v60  ;;  %v2037_v10 = vmul.f32 1.442695, %v1996_v45  ;;  %v1795_v57 = vmul.f32 %v8277_v51, %v1759_v19  ;;  %v1895_v17 = vmul.f32 %v8281_v26, %v1859_v25  ;;  %v8453_v52 = vpop.f32.mrf.mxu0  ;;  %v1860_v63 = vld [vmem:[#allocation3 + $0x70] sm:$0xff] }
 0x24a   : > { %v7052_v46 = vpop.eup %7051  ;;  %10440 = vst [vmem:[#allocation36_spill] sm:$0xff] %v8453_v52  ;;  %7065 = vrcp.f32 %v2086_v54  ;;  %v1997_v21 = vsub.f32 0.0, %v8446_v44  ;;  %v1926_v58 = vadd.f32 %v1894_v28, %v1826_v32  ;;  %v1727_v59 = vadd.f32 %v1695_v30, %v1627_v18  ;;  %1568 = vst.msk [vmem:[#allocation3 + $0xb8] sm:$0xff] %vm529_vm2, %v8453_v52  ;;  %v1593_v18 = vld [vmem:[#allocation3 + $0x75] sm:$0xff] }
 0x24b   : > { %v2087_v62 = vadd.f32 1.0, %v7052_v46  ;;  %7067 = vpow2.f32 %v2035_v22  ;;  %v1628_v27 = vmul.f32 %v8269_v33, %v1592_v34  ;;  %v1696_v19 = vmul.f32 %v8271_v36, %v1660_v6  ;;  %v8460_v25 = vpop.f32.mrf.mxu0  ;;  %v1661_v54 = vld [vmem:[#allocation3 + $0x76] sm:$0xff] }
 0x24c   : > { %10441 = vst [vmem:[#allocation37_spill] sm:$0xff] %v8460_v25  ;;  %7069 = vpow2.f32 %v2037_v10  ;;  %v2039_v60 = vmul.f32 1.442695, %v1997_v21  ;;  %v8463_v45 = vadd.f32 %v8308_v23, %v1926_v58  ;;  %v1827_v28 = vadd.f32 %v1795_v57, %v1727_v59  ;;  %v1761_v32 = vld [vmem:[#allocation3 + $0x77] sm:$0xff]  ;;  %1571 = vst.msk [vmem:[#allocation3 + $0xd0] sm:$0xff] %vm529_vm2, %v8460_v25 }
 0x24d   : > { %v7054_v30 = vpop.eup %7053  ;;  %7071 = vrcp.f32 %v2087_v62  ;;  %v1728_v22 = vadd.f32 %v1696_v19, %v1628_v27  ;;  %v1796_v34 = vmul.f32 %v8277_v51, %v1760_v11  ;;  %v1896_v6 = vmul.f32 %v8281_v26, %v1860_v63  ;;  %v8469_v46 = vpop.f32.mrf.mxu0  ;;  %v1861_v58 = vld [vmem:[#allocation3 + $0x78] sm:$0xff]  ;;  %v1768_v8 = vld [vmem:[#allocation3 + $0xaf] sm:$0xff] }
 0x24e   : > { %10442 = vst [vmem:[#allocation38_spill] sm:$0xff] %v8469_v46  ;;  %v2088_v10 = vadd.f32 1.0, %v7054_v30  ;;  %7073 = vpow2.f32 %v2039_v60  ;;  %v1998_v21 = vsub.f32 0.0, %v8463_v45  ;;  %v1927_v57 = vadd.f32 %v1895_v17, %v1827_v28  ;;  %v1594_v59 = vld [vmem:[#allocation3 + $0x7d] sm:$0xff]  ;;  %1570 = vst.msk [vmem:[#allocation3 + $0xc8] sm:$0xff] %vm529_vm2, %v8469_v46 }
 0x24f   : > { %v7056_v31 = vpop.eup %7055  ;;  %v1828_v25 = vadd.f32 %v1796_v34, %v1728_v22  ;;  %v1629_v62 = vmul.f32 %v8269_v33, %v1593_v18  ;;  %v1697_v11 = vmul.f32 %v8271_v36, %v1661_v54  ;;  %v1797_v63 = vmul.f32 %v8277_v51, %v1761_v32  ;;  %v1662_v27 = vld [vmem:[#allocation3 + $0x7e] sm:$0xff]  ;;  %v8477_v30 = vpop.f32.mrf.mxu0 }
 0x250   : > { %v1762_v19 = vld [vmem:[#allocation3 + $0x7f] sm:$0xff]  ;;  %10443 = vst [vmem:[#allocation39_spill] sm:$0xff] %v8477_v30  ;;  %7075 = vrcp.f32 %v2088_v10  ;;  %v2089_v60 = vadd.f32 1.0, %v7056_v31  ;;  %v2041_v17 = vmul.f32 1.442695, %v1998_v21  ;;  %v8480_v28 = vadd.f32 %v8308_v23, %v1927_v57  ;;  %1573 = vst.msk [vmem:[#allocation3 + $0xe0] sm:$0xff] %vm529_vm2, %v8477_v30 }
 0x251   : > { %v1928_v22 = vadd.f32 %v1896_v6, %v1828_v25  ;;  %v1729_v34 = vadd.f32 %v1697_v11, %v1629_v62  ;;  %v1897_v18 = vmul.f32 %v8281_v26, %v1861_v58  ;;  %v1630_v54 = vmul.f32 %v8269_v33, %v1594_v59  ;;  %v1862_v32 = vld [vmem:[#allocation3 + $0x80] sm:$0xff]  ;;  %v8486_v52 = vpop.f32.mrf.mxu0 }
 0x252   : > { %v7058_v46 = vpop.eup %7057  ;;  %10444 = vst [vmem:[#allocation40_spill] sm:$0xff] %v8486_v52  ;;  %7077 = vrcp.f32 %v2089_v60  ;;  %v1999_v31 = vsub.f32 0.0, %v8480_v28  ;;  %v1698_v10 = vmul.f32 %v8271_v36, %v1662_v27  ;;  %v1798_v21 = vmul.f32 %v8277_v51, %v1762_v19  ;;  %v1595_v57 = vld [vmem:[#allocation3 + $0x85] sm:$0xff]  ;;  %1572 = vst.msk [vmem:[#allocation3 + $0xd8] sm:$0xff] %vm529_vm2, %v8486_v52 }
 0x253   : > { %v7060_v49 = vpop.eup %7059  ;;  %v8494_v25 = vmul.f32 %v7058_v46, %v8324_v20  ;;  %7079 = vpow2.f32 %v2041_v17  ;;  %v8497_v6 = vadd.f32 %v8308_v23, %v1928_v22  ;;  %v1829_v58 = vadd.f32 %v1797_v63, %v1729_v34  ;;  %v1663_v59 = vld [vmem:[#allocation3 + $0x86] sm:$0xff]  ;;  %v8499_v60 = vpop.f32.mrf.mxu0 }
 0x254   : > { %v1763_v62 = vld [vmem:[#allocation3 + $0x87] sm:$0xff]  ;;  %v7062_v11 = vpop.eup %7061  ;;  %10445 = vst [vmem:[#allocation41_spill] sm:$0xff] %v8499_v60  ;;  %v8502_v27 = vmul.f32 %v7060_v49, %v8331_v9  ;;  %v2043_v19 = vmul.f32 1.442695, %v1999_v31  ;;  %v1730_v30 = vadd.f32 %v1698_v10, %v1630_v54  ;;  %v1898_v52 = vmul.f32 %v8281_v26, %v1862_v32  ;;  %1575 = vst.msk [vmem:[#allocation3 + $0xf0] sm:$0xff] %vm529_vm2, %v8499_v60 }
 0x255   : > { %2179 = vst.msk [vmem:[#allocation5] sm:$0xff] %vm529_vm2, %v8494_v25  ;;  %6525 = vmatprep.mubr.msk.f32.mxu1 %vm529_vm2, %v8494_v25  ;;  %v2090_v20 = vadd.f32 1.0, %v7062_v11  ;;  %v2000_v46 = vsub.f32 0.0, %v8497_v6  ;;  %v1929_v63 = vadd.f32 %v1897_v18, %v1829_v58  ;;  %v1631_v9 = vmul.f32 %v8269_v33, %v1595_v57  ;;  %v1863_v49 = vld [vmem:[#allocation3 + $0x88] sm:$0xff]  ;;  %v8513_v22 = vpop.f32.mrf.mxu0 }
 0x256   : > { %v7064_v17 = vpop.eup %7063  ;;  %10446 = vst [vmem:[#allocation42_spill] sm:$0xff] %v8513_v22  ;;  %2180 = vst.msk [vmem:[#allocation5 + $0x8] sm:$0xff] %vm529_vm2, %v8502_v27  ;;  %6526 = vmatmul.mubr.msk.f32.vlgmr.msra.gmra.mxu1 %vm529_vm2, %v8502_v27  ;;  %7081 = vpow2.f32 %v2043_v19  ;;  %v1830_v34 = vadd.f32 %v1798_v21, %v1730_v30  ;;  %v1699_v54 = vmul.f32 %v8271_v36, %v1663_v59  ;;  %v1596_v31 = vld [vmem:[#allocation3 + $0x8d] sm:$0xff] }
 0x257   : > { %v1799_v32 = vmul.f32 %v8277_v51, %v1763_v62  ;;  %v7066_v18 = vpop.eup %7065  ;;  %1574 = vst.msk [vmem:[#allocation3 + $0xe8] sm:$0xff] %vm529_vm2, %v8513_v22  ;;  %v8524_v10 = vmul.f32 %v7064_v17, %v8347_v15  ;;  %7083 = vrcp.f32 %v2090_v20  ;;  %v2045_v57 = vmul.f32 1.442695, %v2000_v46  ;;  %v1664_v11 = vld [vmem:[#allocation3 + $0x8e] sm:$0xff]  ;;  %v8529_v30 = vpop.f32.mrf.mxu0 }
 0x258   : > { %v8527_v58 = vadd.f32 %v8308_v23, %v1929_v63  ;;  %v7068_v19 = vpop.eup %7067  ;;  %10447 = vst [vmem:[#allocation43_spill] sm:$0xff] %v8529_v30  ;;  %v8532_v21 = vmul.f32 %v7066_v18, %v8353_v1  ;;  %v1930_v59 = vadd.f32 %v1898_v52, %v1830_v34  ;;  %v1731_v62 = vadd.f32 %v1699_v54, %v1631_v9  ;;  %v1764_v22 = vld [vmem:[#allocation3 + $0x8f] sm:$0xff]  ;;  %v1771_v35 = vld [vmem:[#allocation3 + $0xc7] sm:$0xff] }
 0x259   : > { %v1899_v60 = vmul.f32 %v8281_v26, %v1863_v49  ;;  %v7070_v41 = vpop.eup %7069  ;;  %1577 = vst.msk [vmem:[#allocation3 + $0x100] sm:$0xff] %vm529_vm2, %v8529_v30  ;;  %2181 = vst.msk [vmem:[#allocation5 + $0x10] sm:$0xff] %vm529_vm2, %v8524_v10  ;;  %6528 = vmatprep.mubr.msk.f32.mxu1 %vm529_vm2, %v8524_v10  ;;  %v2091_v15 = vadd.f32 1.0, %v7068_v19  ;;  %7085 = vpow2.f32 %v2045_v57  ;;  %v1632_v52 = vmul.f32 %v8269_v33, %v1596_v31  ;;  %v8543_v46 = vpop.f32.mrf.mxu0  ;;  %v1864_v34 = vld [vmem:[#allocation3 + $0x90] sm:$0xff]  ;;  %v1865_v30 = vld [vmem:[#allocation3 + $0x98] sm:$0xff] }
 0x25a   : > { %v2001_v1 = vsub.f32 0.0, %v8527_v58  ;;  %v7072_v20 = vpop.eup %7071  ;;  %10448 = vst [vmem:[#allocation44_spill] sm:$0xff] %v8543_v46  ;;  %2182 = vst.msk [vmem:[#allocation5 + $0x18] sm:$0xff] %vm529_vm2, %v8532_v21  ;;  %6529 = vmatmul.mubr.msk.f32.gmra.mxu1 %vm529_vm2, %v8532_v21  ;;  %v2092_v63 = vadd.f32 1.0, %v7070_v41  ;;  %v8550_v9 = vadd.f32 %v8308_v23, %v1930_v59  ;;  %v1831_v49 = vadd.f32 %v1799_v32, %v1731_v62  ;;  %v1597_v54 = vld [vmem:[#allocation3 + $0x95] sm:$0xff] }
 0x25b   : > { %v1700_v17 = vmul.f32 %v8271_v36, %v1664_v11  ;;  %v7074_v18 = vpop.eup %7073  ;;  %1576 = vst.msk [vmem:[#allocation3 + $0xf8] sm:$0xff] %vm529_vm2, %v8543_v46  ;;  %v8556_v31 = vmul.f32 %v7072_v20, %v8366_v55  ;;  %7087 = vrcp.f32 %v2091_v15  ;;  %v1800_v19 = vmul.f32 %v8277_v51, %v1764_v22  ;;  %v1665_v62 = vld [vmem:[#allocation3 + $0x96] sm:$0xff] }
 0x25c   : > { %v2047_v57 = vmul.f32 1.442695, %v2001_v1  ;;  %7089 = vrcp.f32 %v2092_v63  ;;  %v2093_v41 = vadd.f32 1.0, %v7074_v18  ;;  %v2002_v59 = vsub.f32 0.0, %v8550_v9  ;;  %v1765_v11 = vld [vmem:[#allocation3 + $0x97] sm:$0xff] }
 0x25d   : > { %v1931_v32 = vadd.f32 %v1899_v60, %v1831_v49  ;;  %v7076_v61 = vpop.eup %7075  ;;  %2183 = vst.msk [vmem:[#allocation5 + $0x20] sm:$0xff] %vm529_vm2, %v8556_v31  ;;  %6531 = vmatprep.mubr.msk.f32.mxu1 %vm529_vm2, %v8556_v31  ;;  %v1732_v55 = vadd.f32 %v1700_v17, %v1632_v52  ;;  %v1900_v15 = vmul.f32 %v8281_v26, %v1864_v34  ;;  %v1598_v1 = vld [vmem:[#allocation3 + $0x9d] sm:$0xff] }
 0x25e   : > { %7091 = vpow2.f32 %v2047_v57  ;;  %v1633_v22 = vmul.f32 %v8269_v33, %v1597_v54  ;;  %v8567_v20 = vmul.f32 %v7076_v61, %v8381_v39  ;;  %v2049_v60 = vmul.f32 1.442695, %v2002_v59  ;;  %v1666_v49 = vld [vmem:[#allocation3 + $0x9e] sm:$0xff]  ;;  %v1776_v40 = vld [vmem:[#allocation3 + $0xef] sm:$0xff] }
 0x25f   : > { %7093 = vrcp.f32 %v2093_v41  ;;  %v8570_v63 = vadd.f32 %v8308_v23, %v1931_v32  ;;  %v7078_v18 = vpop.eup %7077  ;;  %v1832_v46 = vadd.f32 %v1800_v19, %v1732_v55  ;;  %v1701_v13 = vmul.f32 %v8271_v36, %v1665_v62  ;;  %v1766_v34 = vld [vmem:[#allocation3 + $0x9f] sm:$0xff]  ;;  %v1767_v55 = vld [vmem:[#allocation3 + $0xa7] sm:$0xff] }
 0x260   : > { %v1801_v52 = vmul.f32 %v8277_v51, %v1765_v11  ;;  %v1901_v17 = vmul.f32 %v8281_v26, %v1865_v30  ;;  %v1866_v54 = vld [vmem:[#allocation3 + $0xa0] sm:$0xff]  ;;  %v7080_v7 = vpop.eup %7079  ;;  %2184 = vst.msk [vmem:[#allocation5 + $0x28] sm:$0xff] %vm529_vm2, %v8567_v20  ;;  %6532 = vmatmul.mubr.msk.f32.gmra.mxu1 %vm529_vm2, %v8567_v20  ;;  %v8580_v39 = vmul.f32 %v7078_v18, %v8392_v16  ;;  %7095 = vpow2.f32 %v2049_v60  ;;  %v1600_v18 = vld [vmem:[#allocation3 + $0xad] sm:$0xff] }
 0x261   : > { %v1599_v57 = vld [vmem:[#allocation3 + $0xa5] sm:$0xff]  ;;  %v2003_v61 = vsub.f32 0.0, %v8570_v63  ;;  %v1634_v19 = vmul.f32 %v8269_v33, %v1598_v1  ;;  %v2094_v30 = vadd.f32 1.0, %v7080_v7  ;;  %v1932_v59 = vadd.f32 %v1900_v15, %v1832_v46 }
 0x262   : > { %v8584_v41 = vld [vmem:[#allocation3 + $0x100] sm:$0xff]  ;;  %v1733_v32 = vadd.f32 %v1701_v13, %v1633_v22  ;;  %v1702_v62 = vmul.f32 %v8271_v36, %v1666_v49  ;;  %2185 = vst.msk [vmem:[#allocation5 + $0x30] sm:$0xff] %vm529_vm2, %v8580_v39  ;;  %6534 = vmatprep.mubr.msk.f32.mxu1 %vm529_vm2, %v8580_v39  ;;  %v1802_v1 = vmul.f32 %v8277_v51, %v1766_v34  ;;  %v1867_v49 = vld [vmem:[#allocation3 + $0xa8] sm:$0xff] }
 0x263   : > { %v1667_v11 = vld [vmem:[#allocation3 + $0xa6] sm:$0xff]  ;;  %1986 = vst.msk [vmem:[#allocation3] sm:$0xff] %vm529_vm2, %v8584_v41  ;;  %v2051_v16 = vmul.f32 1.442695, %v2003_v61  ;;  %v1902_v7 = vmul.f32 %v8281_v26, %v1866_v54  ;;  %v1635_v13 = vmul.f32 %v8269_v33, %v1599_v57  ;;  %v7082_v46 = vpop.eup %7081  ;;  %7097 = vrcp.f32 %v2094_v30 }
 0x264   : > { %v8597_v15 = vadd.f32 %v8308_v23, %v1932_v59  ;;  %v1833_v22 = vadd.f32 %v1801_v52, %v1733_v32  ;;  %v1734_v60 = vadd.f32 %v1702_v62, %v1634_v19  ;;  %v7084_v12 = vpop.eup %7083  ;;  %v2095_v0 = vadd.f32 1.0, %v7082_v46  ;;  %v1668_v59 = vld [vmem:[#allocation3 + $0xae] sm:$0xff] }
 0x265   : > { %7099 = vpow2.f32 %v2051_v16  ;;  %v1703_v61 = vmul.f32 %v8271_v36, %v1667_v11  ;;  %v1803_v34 = vmul.f32 %v8277_v51, %v1767_v55  ;;  %v8602_v54 = vmul.f32 %v7084_v12, %v8410_v4  ;;  %v1868_v52 = vld [vmem:[#allocation3 + $0xb0] sm:$0xff] }
 0x266   : > { %v2004_v57 = vsub.f32 0.0, %v8597_v15  ;;  %v1933_v30 = vadd.f32 %v1901_v17, %v1833_v22  ;;  %v1834_v3 = vadd.f32 %v1802_v1, %v1734_v60  ;;  %v7086_v19 = vpop.eup %7085  ;;  %7101 = vrcp.f32 %v2095_v0  ;;  %v1601_v22 = vld [vmem:[#allocation3 + $0xb5] sm:$0xff] }
 0x267   : > { %v1735_v32 = vadd.f32 %v1703_v61, %v1635_v13  ;;  %v1903_v62 = vmul.f32 %v8281_v26, %v1867_v49  ;;  %v1636_v16 = vmul.f32 %v8269_v33, %v1600_v18  ;;  %2186 = vst.msk [vmem:[#allocation5 + $0x38] sm:$0xff] %vm529_vm2, %v8602_v54  ;;  %6535 = vmatmul.mubr.msk.f32.gmra.mxu1 %vm529_vm2, %v8602_v54  ;;  %v2096_v12 = vadd.f32 1.0, %v7086_v19 }
 0x268   : > { %v2053_v4 = vmul.f32 1.442695, %v2004_v57  ;;  %v8612_v17 = vadd.f32 %v8308_v23, %v1933_v30  ;;  %v1934_v11 = vadd.f32 %v1902_v7, %v1834_v3  ;;  %v7088_v55 = vpop.eup %7087  ;;  %v1704_v0 = vmul.f32 %v8271_v36, %v1668_v59  ;;  %v1669_v3 = vld [vmem:[#allocation3 + $0xb6] sm:$0xff] }
 0x269   : > { %v1835_v1 = vadd.f32 %v1803_v34, %v1735_v32  ;;  %v1804_v13 = vmul.f32 %v8277_v51, %v1768_v8  ;;  %v1904_v46 = vmul.f32 %v8281_v26, %v1868_v52  ;;  %v7090_v60 = vpop.eup %7089  ;;  %v8618_v49 = vmul.f32 %v7088_v55, %v8424_v29  ;;  %v1769_v30 = vld [vmem:[#allocation3 + $0xb7] sm:$0xff] }
 0x26a   : > { %7103 = vrcp.f32 %v2096_v12  ;;  %v2005_v18 = vsub.f32 0.0, %v8612_v17  ;;  %v8622_v61 = vadd.f32 %v8308_v23, %v1934_v11  ;;  %v8625_v34 = vmul.f32 %v7090_v60, %v8434_v24  ;;  %v1869_v59 = vld [vmem:[#allocation3 + $0xb8] sm:$0xff] }
 0x26b   : > { %v7092_v7 = vpop.eup %7091  ;;  %7105 = vpow2.f32 %v2053_v4  ;;  %v1935_v8 = vadd.f32 %v1903_v62, %v1835_v1  ;;  %v1736_v57 = vadd.f32 %v1704_v0, %v1636_v16  ;;  %2187 = vst.msk [vmem:[#allocation5 + $0x40] sm:$0xff] %vm529_vm2, %v8618_v49  ;;  %6537 = vmatprep.mubr.msk.f32.mxu1 %vm529_vm2, %v8618_v49  ;;  %v1637_v12 = vmul.f32 %v8269_v33, %v1601_v22  ;;  %v1602_v11 = vld [vmem:[#allocation3 + $0xbd] sm:$0xff] }
 0x26c   : > { %v7094_v52 = vpop.eup %7093  ;;  %v2097_v29 = vadd.f32 1.0, %v7092_v7  ;;  %v2055_v19 = vmul.f32 1.442695, %v2005_v18  ;;  %v2006_v32 = vsub.f32 0.0, %v8622_v61  ;;  %2188 = vst.msk [vmem:[#allocation5 + $0x48] sm:$0xff] %vm529_vm2, %v8625_v34  ;;  %6538 = vmatmul.mubr.msk.f32.gmra.mxu1 %vm529_vm2, %v8625_v34  ;;  %v1705_v4 = vmul.f32 %v8271_v36, %v1669_v3  ;;  %v1670_v55 = vld [vmem:[#allocation3 + $0xbe] sm:$0xff] }
 0x26d   : > { %v8638_v24 = vmul.f32 %v7094_v52, %v8446_v44  ;;  %v8641_v62 = vadd.f32 %v8308_v23, %v1935_v8  ;;  %v1836_v16 = vadd.f32 %v1804_v13, %v1736_v57  ;;  %v7096_v1 = vpop.eup %7095  ;;  %v1805_v22 = vmul.f32 %v8277_v51, %v1769_v30  ;;  %v1770_v18 = vld [vmem:[#allocation3 + $0xbf] sm:$0xff] }
 0x26e   : > { %7107 = vrcp.f32 %v2097_v29  ;;  %v2057_v0 = vmul.f32 1.442695, %v2006_v32  ;;  %v1905_v60 = vmul.f32 %v8281_v26, %v1869_v59  ;;  %v2098_v44 = vadd.f32 1.0, %v7096_v1  ;;  %v1870_v7 = vld [vmem:[#allocation3 + $0xc0] sm:$0xff] }
 0x26f   : > { %2189 = vst.msk [vmem:[#allocation5 + $0x50] sm:$0xff] %vm529_vm2, %v8638_v24  ;;  %6540 = vmatprep.mubr.msk.f32.mxu1 %vm529_vm2, %v8638_v24  ;;  %7109 = vpow2.f32 %v2055_v19  ;;  %v2007_v13 = vsub.f32 0.0, %v8641_v62  ;;  %v1936_v3 = vadd.f32 %v1904_v46, %v1836_v16  ;;  %v1737_v8 = vadd.f32 %v1705_v4, %v1637_v12  ;;  %v1603_v59 = vld [vmem:[#allocation3 + $0xc5] sm:$0xff] }
 0x270   : > { %7111 = vpow2.f32 %v2057_v0  ;;  %v1638_v57 = vmul.f32 %v8269_v33, %v1602_v11  ;;  %v1706_v30 = vmul.f32 %v8271_v36, %v1670_v55  ;;  %v7098_v52 = vpop.eup %7097  ;;  %v1806_v1 = vmul.f32 %v8277_v51, %v1770_v18  ;;  %v1671_v19 = vld [vmem:[#allocation3 + $0xc6] sm:$0xff] }
 0x271   : > { %7113 = vrcp.f32 %v2098_v44  ;;  %v2059_v29 = vmul.f32 1.442695, %v2007_v13  ;;  %v8654_v32 = vadd.f32 %v8308_v23, %v1936_v3  ;;  %v8658_v46 = vmul.f32 %v7098_v52, %v8463_v45  ;;  %v1871_v11 = vld [vmem:[#allocation3 + $0xc8] sm:$0xff] }
 0x272   : > { %v7100_v38 = vpop.eup %7099  ;;  %v1837_v12 = vadd.f32 %v1805_v22, %v1737_v8  ;;  %v1738_v16 = vadd.f32 %v1706_v30, %v1638_v57  ;;  %v1906_v4 = vmul.f32 %v8281_v26, %v1870_v7  ;;  %v1639_v44 = vmul.f32 %v8269_v33, %v1603_v59  ;;  %v1604_v13 = vld [vmem:[#allocation3 + $0xcd] sm:$0xff] }
 0x273   : > { %v2099_v55 = vadd.f32 1.0, %v7100_v38  ;;  %7115 = vpow2.f32 %v2059_v29  ;;  %v2008_v0 = vsub.f32 0.0, %v8654_v32  ;;  %v7102_v3 = vpop.eup %7101  ;;  %2190 = vst.msk [vmem:[#allocation5 + $0x58] sm:$0xff] %vm529_vm2, %v8658_v46  ;;  %6541 = vmatmul.mubr.msk.f32.gmra.mxu1 %vm529_vm2, %v8658_v46  ;;  %v1707_v18 = vmul.f32 %v8271_v36, %v1671_v19  ;;  %v1672_v38 = vld [vmem:[#allocation3 + $0xce] sm:$0xff] }
 0x274   : > { %v1937_v45 = vadd.f32 %v1905_v60, %v1837_v12  ;;  %v1838_v22 = vadd.f32 %v1806_v1, %v1738_v16  ;;  %v1807_v7 = vmul.f32 %v8277_v51, %v1771_v35  ;;  %v1772_v8 = vld [vmem:[#allocation3 + $0xcf] sm:$0xff]  ;;  %v8670_v30 = vmul.f32 %v7102_v3, %v8480_v28 }
 0x275   : > { %v1872_v57 = vld [vmem:[#allocation3 + $0xd0] sm:$0xff]  ;;  %7117 = vrcp.f32 %v2099_v55  ;;  %v2061_v59 = vmul.f32 1.442695, %v2008_v0  ;;  %v1907_v52 = vmul.f32 %v8281_v26, %v1871_v11  ;;  %v1739_v60 = vadd.f32 %v1707_v18, %v1639_v44 }
 0x276   : > { %v8674_v29 = vadd.f32 %v8308_v23, %v1937_v45  ;;  %v1938_v56 = vadd.f32 %v1906_v4, %v1838_v22  ;;  %v1640_v1 = vmul.f32 %v8269_v33, %v1604_v13  ;;  %v1605_v19 = vld [vmem:[#allocation3 + $0xd5] sm:$0xff]  ;;  %2191 = vst.msk [vmem:[#allocation5 + $0x60] sm:$0xff] %vm529_vm2, %v8670_v30  ;;  %6543 = vmatprep.mubr.msk.f32.mxu1 %vm529_vm2, %v8670_v30 }
 0x277   : > { %v1673_v12 = vld [vmem:[#allocation3 + $0xd6] sm:$0xff]  ;;  %v7104_v35 = vpop.eup %7103  ;;  %7119 = vpow2.f32 %v2061_v59  ;;  %v1708_v28 = vmul.f32 %v8271_v36, %v1672_v38  ;;  %v1808_v16 = vmul.f32 %v8277_v51, %v1772_v8  ;;  %v1908_v11 = vmul.f32 %v8281_v26, %v1872_v57 }
 0x278   : > { %v1773_v4 = vld [vmem:[#allocation3 + $0xd7] sm:$0xff]  ;;  %v7106_v55 = vpop.eup %7105  ;;  %v8685_v0 = vmul.f32 %v7104_v35, %v8497_v6  ;;  %v2009_v44 = vsub.f32 0.0, %v8674_v29  ;;  %v8689_v13 = vadd.f32 %v8308_v23, %v1938_v56  ;;  %v1839_v3 = vadd.f32 %v1807_v7, %v1739_v60 }
 0x279   : > { %v1873_v45 = vld [vmem:[#allocation3 + $0xd8] sm:$0xff]  ;;  %v2100_v22 = vadd.f32 1.0, %v7106_v55  ;;  %v1740_v18 = vadd.f32 %v1708_v28, %v1640_v1  ;;  %v1641_v38 = vmul.f32 %v8269_v33, %v1605_v19  ;;  %v1709_v8 = vmul.f32 %v8271_v36, %v1673_v12 }
 0x27a   : > { %2192 = vst.msk [vmem:[#allocation5 + $0x68] sm:$0xff] %vm529_vm2, %v8685_v0  ;;  %6544 = vmatmul.mubr.msk.f32.gmra.mxu1 %vm529_vm2, %v8685_v0  ;;  %v2063_v6 = vmul.f32 1.442695, %v2009_v44  ;;  %v2010_v57 = vsub.f32 0.0, %v8689_v13  ;;  %v1939_v59 = vadd.f32 %v1907_v52, %v1839_v3  ;;  %v1809_v23 = vmul.f32 %v8277_v51, %v1773_v4  ;;  %v1606_v56 = vld [vmem:[#allocation3 + $0xdd] sm:$0xff] }
 0x27b   : > { %v7108_v7 = vpop.eup %7107  ;;  %7121 = vrcp.f32 %v2100_v22  ;;  %v1840_v60 = vadd.f32 %v1808_v16, %v1740_v18  ;;  %v1741_v1 = vadd.f32 %v1709_v8, %v1641_v38  ;;  %v1909_v19 = vmul.f32 %v8281_v26, %v1873_v45  ;;  %v1674_v12 = vld [vmem:[#allocation3 + $0xde] sm:$0xff] }
 0x27c   : > { %v7110_v35 = vpop.eup %7109  ;;  %v8701_v28 = vmul.f32 %v7108_v7, %v8527_v58  ;;  %7123 = vpow2.f32 %v2063_v6  ;;  %v2065_v55 = vmul.f32 1.442695, %v2010_v57  ;;  %v8706_v52 = vld [vmem:[%s10346_s5] ss:$0 sm:$0xff]  ;;  %v1642_v45 = vmul.f32 %v8269_v33, %v1606_v56  ;;  %v1874_v57 = vld [vmem:[#allocation3 + $0xe0] sm:$0xff] }
 0x27d   : > { %v8709_v4 = vadd.f32 %v8706_v52, %v1939_v59  ;;  %v7112_v44 = vpop.eup %7111  ;;  %v2101_v16 = vadd.f32 1.0, %v7110_v35  ;;  %v1940_v3 = vadd.f32 %v1908_v11, %v1840_v60  ;;  %v1841_v22 = vadd.f32 %v1809_v23, %v1741_v1  ;;  %v1774_v18 = vld [vmem:[#allocation3 + $0xdf] sm:$0xff] }
 0x27e   : > { %v7114_v38 = vpop.eup %7113  ;;  %2193 = vst.msk [vmem:[#allocation5 + $0x70] sm:$0xff] %vm529_vm2, %v8701_v28  ;;  %6546 = vmatprep.mubr.msk.f32.mxu1 %vm529_vm2, %v8701_v28  ;;  %v2102_v58 = vadd.f32 1.0, %v7112_v44  ;;  %7125 = vpow2.f32 %v2065_v55  ;;  %v1710_v6 = vmul.f32 %v8271_v36, %v1674_v12  ;;  %v1607_v56 = vld [vmem:[#allocation3 + $0xe5] sm:$0xff]  ;;  %v1810_v55 = vmul.f32 %v8277_v51, %v1774_v18 }
 0x27f   : > { %v2011_v8 = vsub.f32 0.0, %v8709_v4  ;;  %v8719_v11 = vmul.f32 %v7114_v38, %v8550_v9  ;;  %7127 = vrcp.f32 %v2101_v16  ;;  %v8722_v59 = vadd.f32 %v8706_v52, %v1940_v3  ;;  %v1675_v7 = vld [vmem:[#allocation3 + $0xe6] sm:$0xff] }
 0x280   : > { %v1941_v23 = vadd.f32 %v1909_v19, %v1841_v22  ;;  %v7116_v60 = vpop.eup %7115  ;;  %7129 = vrcp.f32 %v2102_v58  ;;  %v1742_v35 = vadd.f32 %v1710_v6, %v1642_v45  ;;  %v1910_v19 = vmul.f32 %v8281_v26, %v1874_v57  ;;  %v1775_v16 = vld [vmem:[#allocation3 + $0xe7] sm:$0xff] }
 0x281   : > { %v2067_v1 = vmul.f32 1.442695, %v2011_v8  ;;  %2194 = vst.msk [vmem:[#allocation5 + $0x78] sm:$0xff] %vm529_vm2, %v8719_v11  ;;  %6547 = vmatmul.mubr.msk.f32.gmra.mxu1 %vm529_vm2, %v8719_v11  ;;  %v2103_v9 = vadd.f32 1.0, %v7116_v60  ;;  %v2012_v12 = vsub.f32 0.0, %v8722_v59  ;;  %v1875_v3 = vld [vmem:[#allocation3 + $0xe8] sm:$0xff]  ;;  %v1643_v18 = vmul.f32 %v8269_v33, %v1607_v56 }
 0x282   : > { %v8731_v44 = vadd.f32 %v8706_v52, %v1941_v23  ;;  %v7118_v22 = vpop.eup %7117  ;;  %v1842_v45 = vadd.f32 %v1810_v55, %v1742_v35  ;;  %v1711_v38 = vmul.f32 %v8271_v36, %v1675_v7  ;;  %v1608_v58 = vld [vmem:[#allocation3 + $0xed] sm:$0xff]  ;;  %v1911_v35 = vmul.f32 %v8281_v26, %v1875_v3  ;;  %v1609_v55 = vld [vmem:[#allocation3 + $0xf5] sm:$0xff] }
 0x283   : > { %7131 = vpow2.f32 %v2067_v1  ;;  %v8737_v8 = vmul.f32 %v7118_v22, %v8570_v63  ;;  %v2069_v6 = vmul.f32 1.442695, %v2012_v12  ;;  %v1676_v60 = vld [vmem:[#allocation3 + $0xee] sm:$0xff]  ;;  %v1811_v1 = vmul.f32 %v8277_v51, %v1775_v16  ;;  %v1677_v7 = vld [vmem:[#allocation3 + $0xf6] sm:$0xff] }
 0x284   : > { %7133 = vrcp.f32 %v2103_v9  ;;  %v2013_v23 = vsub.f32 0.0, %v8731_v44  ;;  %v7120_v57 = vpop.eup %7119  ;;  %v1942_v53 = vadd.f32 %v1910_v19, %v1842_v45  ;;  %v1743_v2 = vadd.f32 %v1711_v38, %v1643_v18  ;;  %v1876_v56 = vld [vmem:[#allocation3 + $0xf0] sm:$0xff]  ;;  %v1877_v18 = vld [vmem:[#allocation3 + $0xf8] sm:$0xff] }
 0x285   : > { %10449 = vst [vmem:[#allocation45_spill] sm:$0xff] %v8737_v8  ;;  %2195 = vst.msk [vmem:[#allocation5 + $0x80] sm:$0xff] %vm529_vm2, %v8737_v8  ;;  %6549 = vmatprep.mubr.msk.f32.mxu1 %vm529_vm2, %v8737_v8  ;;  %v2104_v63 = vadd.f32 1.0, %v7120_v57  ;;  %7135 = vpow2.f32 %v2069_v6  ;;  %v1644_v12 = vmul.f32 %v8269_v33, %v1608_v58  ;;  %v1712_v3 = vmul.f32 %v8271_v36, %v1676_v60  ;;  %v1777_v45 = vld [vmem:[#allocation3 + $0xf7] sm:$0xff]  ;;  %v1778_v60 = vld [vmem:[#allocation3 + $0xff] sm:$0xff] }
 0x286   : > { %v2071_v9 = vmul.f32 1.442695, %v2013_v23  ;;  %v8748_v19 = vadd.f32 %v8706_v52, %v1942_v53  ;;  %v1843_v16 = vadd.f32 %v1811_v1, %v1743_v2  ;;  %v1812_v22 = vmul.f32 %v8277_v51, %v1776_v40  ;;  %v1610_v2 = vld [vmem:[#allocation3 + $0xfd] sm:$0xff] }
 0x287   : > { %7137 = vrcp.f32 %v2104_v63  ;;  %v1912_v38 = vmul.f32 %v8281_v26, %v1876_v56  ;;  %v1645_v14 = vmul.f32 %v8269_v33, %v1609_v55  ;;  %v1713_v6 = vmul.f32 %v8271_v36, %v1677_v7  ;;  %v1678_v1 = vld [vmem:[#allocation3 + $0xfe] sm:$0xff] }
 0x288   : > { %v7122_v23 = vpop.eup %7121  ;;  %7139 = vpow2.f32 %v2071_v9  ;;  %v2014_v58 = vsub.f32 0.0, %v8748_v19  ;;  %v1943_v53 = vadd.f32 %v1911_v35, %v1843_v16  ;;  %v1744_v57 = vadd.f32 %v1712_v3, %v1644_v12 }
 0x289   : > { %v7124_v37 = vpop.eup %7123  ;;  %v8757_v40 = vmul.f32 %v7122_v23, %v8597_v15  ;;  %v1745_v63 = vadd.f32 %v1713_v6, %v1645_v14  ;;  %v1813_v56 = vmul.f32 %v8277_v51, %v1777_v45  ;;  %v1913_v55 = vmul.f32 %v8281_v26, %v1877_v18 }
 0x28a   : > { %v2105_v8 = vadd.f32 1.0, %v7124_v37  ;;  %v2073_v7 = vmul.f32 1.442695, %v2014_v58  ;;  %v8762_v9 = vadd.f32 %v8706_v52, %v1943_v53  ;;  %v1844_v47 = vadd.f32 %v1812_v22, %v1744_v57 }
 0x28b   : > { %10450 = vst [vmem:[#allocation46_spill] sm:$0xff] %v8757_v40  ;;  %v7126_v35 = vpop.eup %7125  ;;  %2196 = vst.msk [vmem:[#allocation5 + $0x88] sm:$0xff] %vm529_vm2, %v8757_v40  ;;  %6550 = vmatmul.mubr.msk.f32.gmra.mxu1 %vm529_vm2, %v8757_v40  ;;  %v1845_v15 = vadd.f32 %v1813_v56, %v1745_v63  ;;  %v1646_v14 = vmul.f32 %v8269_v33, %v1610_v2  ;;  %v1714_v12 = vmul.f32 %v8271_v36, %v1678_v1  ;;  %v7595_v2 = vmov 0  }
 0x28c   : > { %v1814_v16 = vmul.f32 %v8277_v51, %v1778_v60  ;;  %v7128_v37 = vpop.eup %7127  ;;  %7141 = vrcp.f32 %v2105_v8  ;;  %v2106_v3 = vadd.f32 1.0, %v7126_v35  ;;  %v2015_v45 = vsub.f32 0.0, %v8762_v9  ;;  %6977 = vset.pattern.permute.xlu1 %v7595_v2  ;;  %6978 = vset.pattern.permute.xlu0 %v7595_v2 }
 0x28d   : > { %v1944_v22 = vadd.f32 %v1912_v38, %v1844_v47  ;;  %v7130_v18 = vpop.eup %7129  ;;  %v8773_v6 = vmul.f32 %v7128_v37, %v8612_v17  ;;  %7143 = vpow2.f32 %v2073_v7  ;;  %v1945_v23 = vadd.f32 %v1913_v55, %v1845_v15 }
 0x28e   : > { %v1746_v58 = vadd.f32 %v1714_v12, %v1646_v14  ;;  %v8776_v53 = vmul.f32 %v7130_v18, %v8622_v61  ;;  %7145 = vrcp.f32 %v2106_v3  ;;  %v2075_v33 = vmul.f32 1.442695, %v2015_v45 }
 0x28f   : > { %10451 = vst [vmem:[#allocation47_spill] sm:$0xff] %v8773_v6  ;;  %v8779_v36 = vadd.f32 %v8706_v52, %v1944_v22  ;;  %2197 = vst.msk [vmem:[#allocation5 + $0x90] sm:$0xff] %vm529_vm2, %v8773_v6  ;;  %6552 = vmatprep.mubr.msk.f32.mxu1 %vm529_vm2, %v8773_v6  ;;  %v8786_v47 = vadd.f32 %v8706_v52, %v1945_v23  ;;  %v1914_v61 = vmul.f32 %v8281_v26, %v8584_v41 }
 0x290   : > { %10452 = vst [vmem:[#allocation48_spill] sm:$0xff] %v8776_v53  ;;  %v7132_v51 = vpop.eup %7131  ;;  %v1846_v17 = vadd.f32 %v1814_v16, %v1746_v58  ;;  %2198 = vst.msk [vmem:[#allocation5 + $0x98] sm:$0xff] %vm529_vm2, %v8776_v53  ;;  %6553 = vmatmul.mubr.msk.f32.gmra.mxu1 %vm529_vm2, %v8776_v53  ;;  %7147 = vpow2.f32 %v2075_v33 }
 0x291   : > { %v7134_v8 = vpop.eup %7133  ;;  %v2107_v38 = vadd.f32 1.0, %v7132_v51  ;;  %v2016_v57 = vsub.f32 0.0, %v8779_v36  ;;  %v2017_v60 = vsub.f32 0.0, %v8786_v47 }
 0x292   : > { %v8796_v1 = vmul.f32 %v7134_v8, %v8641_v62  ;;  %v1946_v63 = vadd.f32 %v1914_v61, %v1846_v17  ;;  %v7136_v26 = vpop.eup %7135 }
 0x293   : > { %7149 = vrcp.f32 %v2107_v38  ;;  %v2077_v41 = vmul.f32 1.442695, %v2016_v57  ;;  %v2108_v56 = vadd.f32 1.0, %v7136_v26  ;;  %v2079_v55 = vmul.f32 1.442695, %v2017_v60 }
 0x294   : > { %10453 = vst [vmem:[#allocation49_spill] sm:$0xff] %v8796_v1  ;;  %2199 = vst.msk [vmem:[#allocation5 + $0xa0] sm:$0xff] %vm529_vm2, %v8796_v1  ;;  %6555 = vmatprep.mubr.msk.f32.mxu1 %vm529_vm2, %v8796_v1  ;;  %v8804_v7 = vadd.f32 %v8706_v52, %v1946_v63  ;;  %v7138_v62 = vpop.eup %7137 }
 0x295   : > { %7151 = vpow2.f32 %v2077_v41  ;;  %v7140_v35 = vpop.eup %7139  ;;  %v8807_v15 = vmul.f32 %v7138_v62, %v8654_v32 }
 0x296   : > { %7153 = vrcp.f32 %v2108_v56  ;;  %v2018_v14 = vsub.f32 0.0, %v8804_v7  ;;  %v2109_v12 = vadd.f32 1.0, %v7140_v35 }
 0x297   : > { %10454 = vst [vmem:[#allocation50_spill] sm:$0xff] %v8807_v15  ;;  %7155 = vpow2.f32 %v2079_v55  ;;  %2200 = vst.msk [vmem:[#allocation5 + $0xa8] sm:$0xff] %vm529_vm2, %v8807_v15  ;;  %6556 = vmatmul.mubr.msk.f32.gmra.mxu1 %vm529_vm2, %v8807_v15 }
 0x298   : > { %v2081_v16 = vmul.f32 1.442695, %v2018_v14  ;;  %7157 = vrcp.f32 %v2109_v12 }
 0x299   : > { %v7142_v52 = vpop.eup %7141 }
 0x29a   : > { %7159 = vpow2.f32 %v2081_v16  ;;  %v7144_v37 = vpop.eup %7143  ;;  %v8815_v3 = vmul.f32 %v7142_v52, %v8674_v29 }
 0x29b   : > { %v7146_v32 = vpop.eup %7145  ;;  %v2110_v45 = vadd.f32 1.0, %v7144_v37 }
 0x29c   : > { %10455 = vst [vmem:[#allocation51_spill] sm:$0xff] %v8815_v3  ;;  %2201 = vst.msk [vmem:[#allocation5 + $0xb0] sm:$0xff] %vm529_vm2, %v8815_v3  ;;  %6558 = vmatprep.mubr.msk.f32.mxu1 %vm529_vm2, %v8815_v3  ;;  %v8822_v22 = vmul.f32 %v7146_v32, %v8689_v13 }
 0x29d   : > { %v7148_v18 = vpop.eup %7147  ;;  %7161 = vrcp.f32 %v2110_v45 }
 0x29e   : > { %10456 = vst [vmem:[#allocation52_spill] sm:$0xff] %v8822_v22  ;;  %2202 = vst.msk [vmem:[#allocation5 + $0xb8] sm:$0xff] %vm529_vm2, %v8822_v22  ;;  %6559 = vmatmul.mubr.msk.f32.gmra.mxu1 %vm529_vm2, %v8822_v22  ;;  %v2111_v29 = vadd.f32 1.0, %v7148_v18 }
 0x2a0   : > { %v7150_v23 = vpop.eup %7149  ;;  %7163 = vrcp.f32 %v2111_v29 }
 0x2a1   : > { %v8829_v58 = vmul.f32 %v7150_v23, %v8709_v4 }
 0x2a2   : > { %v7152_v33 = vpop.eup %7151 }
 0x2a3   : > { %10457 = vst [vmem:[#allocation53_spill] sm:$0xff] %v8829_v58  ;;  %v7154_v51 = vpop.eup %7153  ;;  %2203 = vst.msk [vmem:[#allocation5 + $0xc0] sm:$0xff] %vm529_vm2, %v8829_v58  ;;  %6561 = vmatprep.mubr.msk.f32.mxu1 %vm529_vm2, %v8829_v58  ;;  %v2112_v13 = vadd.f32 1.0, %v7152_v33  ;;  %v3059_v33 = vld [vmem:[%s10353_s12] sm:$0xff] }
 0x2a4   : > { %v7156_v17 = vpop.eup %7155  ;;  %v8836_v61 = vmul.f32 %v7154_v51, %v8722_v59  ;;  %6573 = vmatprep.subr.mxu0 %v3059_v33  ;;  %6623 = vmatprep.subr.mxu1 %v3059_v33 }
 0x2a5   : > { %7165 = vrcp.f32 %v2112_v13  ;;  %v2113_v8 = vadd.f32 1.0, %v7156_v17  ;;  %v7158_v38 = vpop.eup %7157  ;;  %6574 = vmatpush3.msra.mxu0 %v3059_v33  ;;  %6624 = vmatpush3.msra.mxu1 %v3059_v33 }
 0x2a6   : > { %10458 = vst [vmem:[#allocation54_spill] sm:$0xff] %v8836_v61  ;;  %2204 = vst.msk [vmem:[#allocation5 + $0xc8] sm:$0xff] %vm529_vm2, %v8836_v61  ;;  %6562 = vmatmul.mubr.msk.f32.gmra.mxu1 %vm529_vm2, %v8836_v61  ;;  %v8843_v57 = vmul.f32 %v7158_v38, %v8731_v44 }
 0x2a7   : > { %v7160_v4 = vpop.eup %7159  ;;  %7167 = vrcp.f32 %v2113_v8 }
 0x2a8   : > { %10459 = vst [vmem:[#allocation55_spill] sm:$0xff] %v8843_v57  ;;  %v2114_v2 = vadd.f32 1.0, %v7160_v4  ;;  %2205 = vst.msk [vmem:[#allocation5 + $0xd0] sm:$0xff] %vm529_vm2, %v8843_v57  ;;  %6564 = vmatprep.mubr.msk.f32.mxu1 %vm529_vm2, %v8843_v57 }
 0x2aa   : > { %7169 = vrcp.f32 %v2114_v2  ;;  %v7162_v59 = vpop.eup %7161 }
 0x2ab   : > { %v8850_v60 = vmul.f32 %v7162_v59, %v8748_v19 }
 0x2ad   : > { %10460 = vst [vmem:[#allocation56_spill] sm:$0xff] %v8850_v60  ;;  %v7164_v63 = vpop.eup %7163  ;;  %2206 = vst.msk [vmem:[#allocation5 + $0xd8] sm:$0xff] %vm529_vm2, %v8850_v60  ;;  %6565 = vmatmul.mubr.msk.f32.gmra.mxu1 %vm529_vm2, %v8850_v60 }
 0x2ae   : > { %v8857_v44 = vmul.f32 %v7164_v63, %v8762_v9 }
 0x2b0   : > { %10461 = vst [vmem:[#allocation57_spill] sm:$0xff] %v8857_v44  ;;  %2207 = vst.msk [vmem:[#allocation5 + $0xe0] sm:$0xff] %vm529_vm2, %v8857_v44  ;;  %6567 = vmatprep.mubr.msk.f32.mxu1 %vm529_vm2, %v8857_v44 }
 0x2b2   : > { %v7166_v26 = vpop.eup %7165 }
 0x2b3   : > { %v8864_v19 = vmul.f32 %v7166_v26, %v8779_v36 }
 0x2b4   : > { %v7168_v41 = vpop.eup %7167 }
 0x2b5   : > { %10462 = vst [vmem:[#allocation58_spill] sm:$0xff] %v8864_v19  ;;  %2208 = vst.msk [vmem:[#allocation5 + $0xe8] sm:$0xff] %vm529_vm2, %v8864_v19  ;;  %6568 = vmatmul.mubr.msk.f32.gmra.mxu1 %vm529_vm2, %v8864_v19  ;;  %v8871_v9 = vmul.f32 %v7168_v41, %v8786_v47 }
 0x2b7   : > { %10463 = vst [vmem:[#allocation59_spill] sm:$0xff] %v8871_v9  ;;  %v7170_v56 = vpop.eup %7169  ;;  %2209 = vst.msk [vmem:[#allocation5 + $0xf0] sm:$0xff] %vm529_vm2, %v8871_v9  ;;  %6570 = vmatprep.mubr.msk.f32.mxu1 %vm529_vm2, %v8871_v9 }
 0x2b8   : > { %v8878_v36 = vmul.f32 %v7170_v56, %v8804_v7 }
 0x2ba   : > { %10464 = vst [vmem:[#allocation60_spill] sm:$0xff] %v8878_v36  ;;  %2210 = vst.msk [vmem:[#allocation5 + $0xf8] sm:$0xff] %vm529_vm2, %v8878_v36  ;;  %6571 = vmatmul.mubr.msk.f32.gmra.mxu1 %vm529_vm2, %v8878_v36 }
 0x316   : > { %v6527_v55 = vpop.f32.mrf.mxu1 }
 0x317   : > { %3873 = vrot.lane.b32.xlu0 %v6527_v55, %s7596_s24  ;;  %2541 = vperm.xlu1 %6977, %v6527_v55  }
 0x318   : > { %v2374_v47 = vpop.f32.mrf.mxu1 }
 0x31a   : > { %v8885_v62 = vpop.f32.mrf.mxu1 }
 0x31b   : > { %3871 = vrot.lane.b32.xlu1 %v2374_v47, %s7596_s24  ;;  %2536 = vperm.xlu0 %6978, %v2374_v47  }
 0x31c   : > { %v8888_v35 = vpop.f32.mrf.mxu1 }
 0x31f   : > { %4289 = vrot.lane.b32.xlu1 %v2374_v47, %s7597_s25  ;;  %4291 = vrot.lane.b32.xlu0 %v6527_v55, %s7597_s25 }
 0x320   : > { %v8892_v7 = vpop.f32.mrf.mxu1 }
 0x322   : > { %v8894_v14 = vpop.f32.mrf.mxu1 }
 0x323   : > { %3877 = vrot.lane.b32.xlu0 %v8885_v62, %s7596_s24  ;;  %2551 = vperm.xlu1 %6977, %v8885_v62  }
 0x327   : > { %v8899_v12 = vpop.f32.mrf.mxu1  ;;  %2546 = vperm.xlu1 %6977, %v8888_v35  }
 0x329   : > { %v8902_v16 = vpop.f32.mrf.mxu1 }
 0x32b   : > { %3875 = vrot.lane.b32.xlu1 %v8888_v35, %s7596_s24 }
 0x32c   : > { %v8906_v52 = vpop.f32.mrf.mxu1 }
 0x32d   : > { %2581 = vperm.xlu0 %6978, %v8906_v52  }
 0x32e   : > { %v8909_v37 = vpop.f32.mrf.mxu1 }
 0x32f   : > { %2561 = vperm.xlu1 %6977, %v8892_v7  }
 0x333   : > { %v8912_v32 = vpop.f32.mrf.mxu1  ;;  %2556 = vperm.xlu1 %6977, %v8894_v14  }
 0x334   : > { %2591 = vperm.xlu0 %6978, %v8912_v32  }
 0x335   : > { %v8916_v45 = vpop.f32.mrf.mxu1 }
 0x337   : > { %2571 = vperm.xlu1 %6977, %v8899_v12  }
 0x33a   : > { %v8919_v18 = vpop.f32.mrf.mxu1 }
 0x33b   : > { %2601 = vperm.xlu0 %6978, %v8919_v18   ;;  %2566 = vperm.xlu1 %6977, %v8902_v16  }
 0x33c   : > { %v8923_v29 = vpop.f32.mrf.mxu1 }
 0x33f   : > { %2576 = vperm.xlu1 %6977, %v8909_v37  }
 0x341   : > { %v8926_v23 = vpop.f32.mrf.mxu1 }
 0x342   : > { %2611 = vperm.xlu0 %6978, %v8926_v23  }
 0x343   : > { %2586 = vperm.xlu1 %6977, %v8916_v45   ;;  %v8933_v51 = vpop.f32.mrf.mxu1 }
 0x347   : > { %2596 = vperm.xlu1 %6977, %v8923_v29  }
 0x34b   : > { %v8936_v13 = vpop.f32.mrf.mxu1  ;;  %2606 = vperm.xlu1 %6977, %v8933_v51  }
 0x34c   : > { %2621 = vperm.xlu0 %6978, %v8936_v13  }
 0x34d   : > { %v8940_v17 = vpop.f32.mrf.mxu1 }
 0x34f   : > { %2616 = vperm.xlu1 %6977, %v8940_v17  }
 0x350   : > { %v8942_v8 = vpop.f32.mrf.mxu1 }
 0x351   : > { %2631 = vperm.xlu0 %6978, %v8942_v8  }
 0x352   : > { %v8946_v38 = vpop.f32.mrf.mxu1 }
 0x353   : > { %2626 = vperm.xlu1 %6977, %v8946_v38  }
 0x357   : > { %v8949_v4 = vpop.f32.mrf.mxu1 }
 0x358   : > { %2641 = vperm.xlu0 %6978, %v8949_v4  }
 0x359   : > { %v8952_v2 = vpop.f32.mrf.mxu1 }
 0x35a   : > { %2636 = vperm.xlu1 %6977, %v8952_v2  }
 0x35e   : > { %v8955_v59 = vpop.f32.mrf.mxu1 }
 0x35f   : > { %2651 = vperm.xlu0 %6978, %v8955_v59  }
 0x360   : > { %v8958_v63 = vpop.f32.mrf.mxu1 }
 0x361   : > { %2646 = vperm.xlu1 %6977, %v8958_v63  }
 0x366   : > { %v8961_v26 = vpop.f32.mrf.mxu1 }
 0x367   : > { %2661 = vperm.xlu0 %6978, %v8961_v26  }
 0x368   : > { %v8964_v41 = vpop.f32.mrf.mxu1 }
 0x369   : > { %2656 = vperm.xlu1 %6977, %v8964_v41  }
 0x36d   : > { %v8967_v56 = vpop.f32.mrf.mxu1 }
 0x36e   : > { %2671 = vperm.xlu0 %6978, %v8967_v56  }
 0x36f   : > { %v8970_v55 = vpop.f32.mrf.mxu1 }
 0x370   : > { %2666 = vperm.xlu1 %6977, %v8970_v55  }
 0x375   : > { %v8973_v47 = vpop.f32.mrf.mxu1 }
 0x376   : > { %2681 = vperm.xlu0 %6978, %v8973_v47  }
 0x377   : > { %v8976_v33 = vpop.f32.mrf.mxu1 }
 0x378   : > { %2676 = vperm.xlu1 %6977, %v8976_v33  }
 0x37a   : > { %v8979_v36 = vpop.f32.mrf.mxu1 }
 0x37b   : > { %2691 = vperm.xlu0 %6978, %v8979_v36  }
 0x37c   : > { %v8982_v9 = vpop.f32.mrf.mxu1 }
 0x37d   : > { %2686 = vperm.xlu1 %6977, %v8982_v9  }
 0x37f   : > { %4295 = vrot.lane.b32.xlu0 %v8885_v62, %s7597_s25  ;;  %v9008_v62 = vld [vmem:[%s10348_s7] ss:$0 sm:$0xff] }
 0x381   : > { %4293 = vrot.lane.b32.xlu1 %v8888_v35, %s7597_s25 }
 0x383   : > { %3881 = vrot.lane.b32.xlu0 %v8892_v7, %s7596_s24 }
 0x385   : > { %3879 = vrot.lane.b32.xlu1 %v8894_v14, %s7596_s24 }
 0x387   : > { %4299 = vrot.lane.b32.xlu0 %v8892_v7, %s7597_s25  ;;  %v9017_v7 = vld [vmem:[%s10349_s8] ss:$0 sm:$0xff] }
 0x389   : > { %4297 = vrot.lane.b32.xlu1 %v8894_v14, %s7597_s25  ;;  %v9012_v35 = vpop.permute.xlu0 %3873 }
 0x38a   : > { %10465 = vst [vmem:[#allocation61_spill] sm:$0xff] %v9012_v35 }
 0x38b   : > { %3885 = vrot.lane.b32.xlu0 %v8899_v12, %s7596_s24 }
 0x38d   : > { %3883 = vrot.lane.b32.xlu1 %v8902_v16, %s7596_s24 }
 0x38f   : > { %4303 = vrot.lane.b32.xlu0 %v8899_v12, %s7597_s25 }
 0x391   : > { %4301 = vrot.lane.b32.xlu1 %v8902_v16, %s7597_s25 }
 0x392   : > { %v2542_v14 = vpop.permute.xlu1 %2541 }
 0x393   : > { %3889 = vrot.lane.b32.xlu0 %v8906_v52, %s7596_s24  ;;  %v2701_v12 = vmul.f32 %v9008_v62, %v2542_v14 }
 0x395   : > { %3887 = vrot.lane.b32.xlu1 %v8909_v37, %s7596_s24  ;;  %v9025_v16 = vadd.f32 %v9017_v7, %v2701_v12 }
 0x396   : > { %v9027_v19 = vpop.permute.xlu1 %3871  ;;  %v2537_v35 = vpop.permute.xlu0 %2536 }
 0x397   : > { %4307 = vrot.lane.b32.xlu0 %v8906_v52, %s7597_s25  ;;  %10466 = vst [vmem:[#allocation62_spill] sm:$0xff] %v9027_v19  ;;  %v2804_v44 = vand.u32 2147483647, %v9025_v16  ;;  %v2700_v60 = vmul.f32 %v9008_v62, %v2537_v35 }
 0x399   : > { %4305 = vrot.lane.b32.xlu1 %v8909_v37, %s7597_s25  ;;  %v2836_v14 = vsub.f32 0.0, %v2804_v44  ;;  %v9036_v57 = vadd.f32 %v9017_v7, %v2700_v60 }
 0x39a   : > { %v9038_v52 = vpop.permute.xlu1 %4289  ;;  %v9043_v37 = vpop.permute.xlu0 %4291 }
 0x39b   : > { %3893 = vrot.lane.b32.xlu0 %v8912_v32, %s7596_s24  ;;  %10467 = vst [vmem:[#allocation63_spill] sm:$0xff] %v9038_v52  ;;  %v2869_v12 = vmul.f32 1.442695, %v2836_v14  ;;  %v2803_v19 = vand.u32 2147483647, %v9036_v57  ;;  %10468 = vst [vmem:[#allocation64_spill] sm:$0xff] %v9043_v37 }
 0x39c   : > { %v9053_v14 = vld [vmem:[%s10354_s13 + $0x8] sm:$0xff] }
 0x39d   : > { %3891 = vrot.lane.b32.xlu1 %v8916_v45, %s7596_s24  ;;  %7171 = vpow2.f32 %v2869_v12  ;;  %v2835_v35 = vsub.f32 0.0, %v2803_v19  ;;  %6673 = vmatprep.subr.mxu0 %v9053_v14 }
 0x39e   : > { %v2552_v61 = vpop.permute.xlu1 %2551  ;;  %6725 = vmatprep.subr.mxu1 %v9053_v14 }
 0x39f   : > { %4311 = vrot.lane.b32.xlu0 %v8912_v32, %s7597_s25  ;;  %v2867_v60 = vmul.f32 1.442695, %v2835_v35  ;;  %v2703_v44 = vmul.f32 %v9008_v62, %v2552_v61  ;;  %v9062_v32 = vpop.permute.xlu0 %3877 }
 0x3a0   : > { %10469 = vst [vmem:[#allocation65_spill] sm:$0xff] %v9062_v32 }
 0x3a1   : > { %4309 = vrot.lane.b32.xlu1 %v8916_v45, %s7597_s25  ;;  %7173 = vpow2.f32 %v2867_v60  ;;  %v9060_v19 = vadd.f32 %v9017_v7, %v2703_v44 }
 0x3a2   : > { %v2547_v45 = vpop.permute.xlu1 %2546 }
 0x3a3   : > { %3897 = vrot.lane.b32.xlu0 %v8919_v18, %s7596_s24  ;;  %v2806_v61 = vand.u32 2147483647, %v9060_v19  ;;  %v2702_v12 = vmul.f32 %v9008_v62, %v2547_v45 }
 0x3a5   : > { %3895 = vrot.lane.b32.xlu1 %v8923_v29, %s7596_s24  ;;  %v2838_v35 = vsub.f32 0.0, %v2806_v61  ;;  %v9071_v37 = vadd.f32 %v9017_v7, %v2702_v12 }
 0x3a6   : > { %v9073_v60 = vpop.permute.xlu1 %3875 }
 0x3a7   : > { %4315 = vrot.lane.b32.xlu0 %v8919_v18, %s7597_s25  ;;  %10470 = vst [vmem:[#allocation66_spill] sm:$0xff] %v9073_v60  ;;  %v2873_v44 = vmul.f32 1.442695, %v2838_v35  ;;  %v2805_v32 = vand.u32 2147483647, %v9071_v37 }
 0x3a8   : > { %v2582_v52 = vpop.permute.xlu0 %2581 }
 0x3a9   : > { %4313 = vrot.lane.b32.xlu1 %v8923_v29, %s7597_s25  ;;  %7175 = vpow2.f32 %v2873_v44  ;;  %v2837_v45 = vsub.f32 0.0, %v2805_v32  ;;  %v2709_v18 = vmul.f32 %v9008_v62, %v2582_v52 }
 0x3aa   : > { %v7172_v61 = vpop.eup %7171  ;;  %v2562_v58 = vpop.permute.xlu1 %2561 }
 0x3ab   : > { %3901 = vrot.lane.b32.xlu0 %v8926_v23, %s7596_s24  ;;  %v2932_v12 = vadd.f32 1.0, %v7172_v61  ;;  %v2871_v60 = vmul.f32 1.442695, %v2837_v45  ;;  %v9084_v29 = vadd.f32 %v9017_v7, %v2709_v18  ;;  %v2705_v35 = vmul.f32 %v9008_v62, %v2562_v58 }
 0x3ad   : > { %3899 = vrot.lane.b32.xlu1 %v8933_v51, %s7596_s24  ;;  %7177 = vlog2.f32 %v2932_v12  ;;  %v2812_v32 = vand.u32 2147483647, %v9084_v29  ;;  %v9091_v52 = vadd.f32 %v9017_v7, %v2705_v35 }
 0x3ae   : > { %v7174_v44 = vpop.eup %7173  ;;  %7179 = vpow2.f32 %v2871_v60  ;;  %v2557_v61 = vpop.permute.xlu1 %2556 }
 0x3af   : > { %4319 = vrot.lane.b32.xlu0 %v8926_v23, %s7597_s25  ;;  %v2931_v22 = vadd.f32 1.0, %v7174_v44  ;;  %v2844_v45 = vsub.f32 0.0, %v2812_v32  ;;  %v2592_v18 = vpop.permute.xlu0 %2591  ;;  %v2808_v58 = vand.u32 2147483647, %v9091_v52  ;;  %v2704_v23 = vmul.f32 %v9008_v62, %v2557_v61 }
 0x3b0   : > { %v2711_v3 = vmul.f32 %v9008_v62, %v2592_v18 }
 0x3b1   : > { %4317 = vrot.lane.b32.xlu1 %v8933_v51, %s7597_s25  ;;  %7181 = vlog2.f32 %v2931_v22  ;;  %v2885_v12 = vmul.f32 1.442695, %v2844_v45  ;;  %v2840_v35 = vsub.f32 0.0, %v2808_v58  ;;  %v9104_v44 = vadd.f32 %v9017_v7, %v2704_v23 }
 0x3b2   : > { %v9101_v60 = vadd.f32 %v9017_v7, %v2711_v3  ;;  %v2572_v51 = vpop.permute.xlu1 %2571 }
 0x3b3   : > { %3905 = vrot.lane.b32.xlu0 %v8936_v13, %s7596_s24  ;;  %v2877_v32 = vmul.f32 1.442695, %v2840_v35  ;;  %v2707_v18 = vmul.f32 %v9008_v62, %v2572_v51  ;;  %7183 = vpow2.f32 %v2885_v12  ;;  %v2807_v22 = vand.u32 2147483647, %v9104_v44 }
 0x3b4   : > { %v2814_v61 = vand.u32 2147483647, %v9101_v60 }
 0x3b5   : > { %3903 = vrot.lane.b32.xlu1 %v8940_v17, %s7596_s24  ;;  %7185 = vpow2.f32 %v2877_v32  ;;  %v9114_v45 = vadd.f32 %v9017_v7, %v2707_v18  ;;  %v2839_v35 = vsub.f32 0.0, %v2807_v22 }
 0x3b6   : > { %v2602_v3 = vpop.permute.xlu0 %2601  ;;  %v7176_v58 = vpop.eup %7175  ;;  %v2846_v23 = vsub.f32 0.0, %v2814_v61 }
 0x3b7   : > { %4323 = vrot.lane.b32.xlu0 %v8936_v13, %s7597_s25  ;;  %v2713_v15 = vmul.f32 %v9008_v62, %v2602_v3  ;;  %v2567_v1 = vpop.permute.xlu1 %2566  ;;  %v2934_v51 = vadd.f32 1.0, %v7176_v58  ;;  %v2810_v12 = vand.u32 2147483647, %v9114_v45  ;;  %v2875_v18 = vmul.f32 1.442695, %v2839_v35 }
 0x3b8   : > { %v2706_v53 = vmul.f32 %v9008_v62, %v2567_v1  ;;  %v2889_v13 = vmul.f32 1.442695, %v2846_v23 }
 0x3b9   : > { %4321 = vrot.lane.b32.xlu1 %v8940_v17, %s7597_s25  ;;  %v9122_v32 = vadd.f32 %v9017_v7, %v2713_v15  ;;  %7187 = vlog2.f32 %v2934_v51  ;;  %v2842_v61 = vsub.f32 0.0, %v2810_v12 }
 0x3ba   : > { %v9127_v22 = vadd.f32 %v9017_v7, %v2706_v53  ;;  %v7178_v3 = vpop.eup %7177  ;;  %7189 = vpow2.f32 %v2889_v13 }
 0x3bb   : > { %3909 = vrot.lane.b32.xlu0 %v8942_v8, %s7596_s24  ;;  %v2816_v17 = vand.u32 2147483647, %v9122_v32  ;;  %v2577_v58 = vpop.permute.xlu1 %2576  ;;  %v7180_v6 = vpop.eup %7179  ;;  %7191 = vpow2.f32 %v2875_v18  ;;  %v2881_v1 = vmul.f32 1.442695, %v2842_v61  ;;  %v2966_v53 = vmul.f32 0.6931472, %v7178_v3 }
 0x3bc   : > { %v2933_v15 = vadd.f32 1.0, %v7180_v6  ;;  %v2809_v51 = vand.u32 2147483647, %v9127_v22  ;;  %v2708_v12 = vmul.f32 %v9008_v62, %v2577_v58  ;;  %v2772_v61 = vmax.f32 %v9025_v16, 0.0 }
 0x3bd   : > { %3907 = vrot.lane.b32.xlu1 %v8946_v38, %s7596_s24  ;;  %v2848_v23 = vsub.f32 0.0, %v2816_v17  ;;  %v2612_v35 = vpop.permute.xlu0 %2611  ;;  %7193 = vpow2.f32 %v2881_v1  ;;  %v2771_v58 = vmax.f32 %v9036_v57, 0.0 }
 0x3be   : > { %v2715_v13 = vmul.f32 %v9008_v62, %v2612_v35  ;;  %v7182_v40 = vpop.eup %7181  ;;  %7195 = vlog2.f32 %v2933_v15  ;;  %v2841_v43 = vsub.f32 0.0, %v2809_v51  ;;  %v9138_v18 = vadd.f32 %v9017_v7, %v2708_v12 }
 0x3bf   : > { %4327 = vrot.lane.b32.xlu0 %v8942_v8, %s7597_s25  ;;  %v2893_v50 = vmul.f32 1.442695, %v2848_v23  ;;  %v2587_v6 = vpop.permute.xlu1 %2586  ;;  %v2964_v3 = vmul.f32 0.6931472, %v7182_v40  ;;  %v3028_v35 = vadd.f32 %v2966_v53, %v2772_v61 }
 0x3c0   : > { %v9142_v17 = vadd.f32 %v9017_v7, %v2715_v13  ;;  %v2710_v8 = vmul.f32 %v9008_v62, %v2587_v6  ;;  %v2879_v1 = vmul.f32 1.442695, %v2841_v43  ;;  %v2811_v15 = vand.u32 2147483647, %v9138_v18  ;;  %v7184_v23 = vpop.eup %7183 }
 0x3c1   : > { %4325 = vrot.lane.b32.xlu1 %v8946_v38, %s7597_s25  ;;  %7197 = vpow2.f32 %v2893_v50  ;;  %v3027_v13 = vadd.f32 %v2964_v3, %v2771_v58  ;;  %v2940_v3 = vadd.f32 1.0, %v7184_v23 }
 0x3c2   : > { %v2818_v16 = vand.u32 2147483647, %v9142_v17  ;;  %v9153_v51 = vadd.f32 %v9017_v7, %v2710_v8  ;;  %v7186_v38 = vpop.eup %7185  ;;  %7199 = vpow2.f32 %v2879_v1  ;;  %v2843_v12 = vsub.f32 0.0, %v2811_v15  ;;  %v3060_v1 = vld [vmem:[%s10354_s13] sm:$0xff] }
 0x3c3   : > { %3913 = vrot.lane.b32.xlu0 %v8949_v4, %s7596_s24  ;;  %v2597_v40 = vpop.permute.xlu1 %2596  ;;  %v2936_v57 = vadd.f32 1.0, %v7186_v38  ;;  %6575 = vmatprep.mubr.msk.f32.mxu0 %vm529_vm2, %v3027_v13  ;;  %v3518_v61 = vmul.f32 %v3027_v13, %v8494_v25  ;;  %v3519_v8 = vmul.f32 %v3028_v35, %v8502_v27 }
 0x3c4   : > { %v2850_v50 = vsub.f32 0.0, %v2818_v16  ;;  %v2883_v43 = vmul.f32 1.442695, %v2843_v12  ;;  %v2813_v53 = vand.u32 2147483647, %v9153_v51  ;;  %v2712_v6 = vmul.f32 %v9008_v62, %v2597_v40  ;;  %6576 = vmatmul.mubr.msk.f32.vlgmr.msra.gmra.mxu0 %vm529_vm2, %v3028_v35 }
 0x3c5   : > { %3911 = vrot.lane.b32.xlu1 %v8952_v2, %s7596_s24  ;;  %7201 = vlog2.f32 %v2936_v57  ;;  %6625 = vmatprep.mubr.msk.f32.mxu1 %vm529_vm2, %v3518_v61  ;;  %v2773_v61 = vmax.f32 %v9071_v37, 0.0 }
 0x3c6   : > { %v2897_v58 = vmul.f32 1.442695, %v2850_v50  ;;  %v7188_v15 = vpop.eup %7187  ;;  %7203 = vpow2.f32 %v2883_v43  ;;  %v2845_v38 = vsub.f32 0.0, %v2813_v53  ;;  %v9169_v25 = vadd.f32 %v9017_v7, %v2712_v6  ;;  %6674 = vmatpush3.msra.mxu0 %v9053_v14  ;;  %6626 = vmatmul.mubr.msk.f32.vlgmr.msra.gmra.mxu1 %vm529_vm2, %v3519_v8 }
 0x3c7   : > { %4331 = vrot.lane.b32.xlu0 %v8949_v4, %s7597_s25  ;;  %v2622_v16 = vpop.permute.xlu0 %2621  ;;  %v2607_v27 = vpop.permute.xlu1 %2606  ;;  %6726 = vmatpush3.msra.mxu1 %v9053_v14  ;;  %v2774_v6 = vmax.f32 %v9060_v19, 0.0 }
 0x3c8   : > { %v7190_v4 = vpop.eup %7189  ;;  %7205 = vpow2.f32 %v2897_v58  ;;  %v2717_v23 = vmul.f32 %v9008_v62, %v2622_v16  ;;  %v2714_v35 = vmul.f32 %v9008_v62, %v2607_v27  ;;  %v2887_v13 = vmul.f32 1.442695, %v2845_v38  ;;  %6675 = vmatprep.subr.mxu0 %v3060_v1  ;;  %6727 = vmatprep.subr.mxu1 %v3060_v1 }
 0x3c9   : > { %4329 = vrot.lane.b32.xlu1 %v8952_v2, %s7597_s25  ;;  %v7192_v12 = vpop.eup %7191  ;;  %v2942_v40 = vadd.f32 1.0, %v7190_v4  ;;  %v2815_v57 = vand.u32 2147483647, %v9169_v25  ;;  %7207 = vlog2.f32 %v2940_v3  ;;  %6676 = vmatpush3.msra.mxu0 %v3060_v1  ;;  %v2780_v58 = vmax.f32 %v9084_v29, 0.0 }
 0x3ca   : > { %v2935_v50 = vadd.f32 1.0, %v7192_v12  ;;  %v9183_v43 = vadd.f32 %v9017_v7, %v2717_v23  ;;  %v9186_v2 = vadd.f32 %v9017_v7, %v2714_v35  ;;  %v7194_v53 = vpop.eup %7193  ;;  %6728 = vmatpush3.msra.mxu1 %v3060_v1  ;;  %v2970_v4 = vmul.f32 0.6931472, %v7188_v15 }
 0x3cb   : > { %3917 = vrot.lane.b32.xlu0 %v8955_v59, %s7596_s24  ;;  %7209 = vlog2.f32 %v2942_v40  ;;  %v2847_v14 = vsub.f32 0.0, %v2815_v57  ;;  %v2617_v8 = vpop.permute.xlu1 %2616  ;;  %v7196_v3 = vpop.eup %7195  ;;  %v2938_v16 = vadd.f32 1.0, %v7194_v53 }
 0x3cc   : > { %7211 = vlog2.f32 %v2935_v50  ;;  %v2820_v38 = vand.u32 2147483647, %v9183_v43  ;;  %v2632_v27 = vpop.permute.xlu0 %2631  ;;  %v2817_v12 = vand.u32 2147483647, %v9186_v2  ;;  %v2716_v40 = vmul.f32 %v9008_v62, %v2617_v8 }
 0x3cd   : > { %3915 = vrot.lane.b32.xlu1 %v8958_v63, %s7596_s24  ;;  %v2719_v19 = vmul.f32 %v9008_v62, %v2632_v27  ;;  %7213 = vpow2.f32 %v2887_v13  ;;  %v2891_v37 = vmul.f32 1.442695, %v2847_v14  ;;  %v2968_v53 = vmul.f32 0.6931472, %v7196_v3 }
 0x3ce   : > { %v7198_v23 = vpop.eup %7197  ;;  %7215 = vlog2.f32 %v2938_v16  ;;  %v2852_v35 = vsub.f32 0.0, %v2820_v38  ;;  %v2849_v15 = vsub.f32 0.0, %v2817_v12  ;;  %v3030_v27 = vadd.f32 %v2970_v4, %v2774_v6 }
 0x3cf   : > { %4335 = vrot.lane.b32.xlu0 %v8955_v59, %s7597_s25  ;;  %v2944_v57 = vadd.f32 1.0, %v7198_v23  ;;  %v9200_v50 = vadd.f32 %v9017_v7, %v2719_v19  ;;  %7217 = vpow2.f32 %v2891_v37  ;;  %v2627_v1 = vpop.permute.xlu1 %2626  ;;  %v7200_v13 = vpop.eup %7199  ;;  %v9205_v59 = vadd.f32 %v9017_v7, %v2716_v40 }
 0x3d0   : > { %v2901_v14 = vmul.f32 1.442695, %v2852_v35  ;;  %v2718_v16 = vmul.f32 %v9008_v62, %v2627_v1  ;;  %v2937_v8 = vadd.f32 1.0, %v7200_v13  ;;  %v2776_v19 = vmax.f32 %v9091_v52, 0.0 }
 0x3d1   : > { %4333 = vrot.lane.b32.xlu1 %v8958_v63, %s7597_s25  ;;  %7219 = vlog2.f32 %v2944_v57  ;;  %v2822_v38 = vand.u32 2147483647, %v9200_v50  ;;  %v2895_v3 = vmul.f32 1.442695, %v2849_v15  ;;  %v2819_v63 = vand.u32 2147483647, %v9205_v59 }
 0x3d2   : > { %7221 = vpow2.f32 %v2901_v14  ;;  %v7202_v37 = vpop.eup %7201  ;;  %v9214_v12 = vadd.f32 %v9017_v7, %v2718_v16  ;;  %v3029_v40 = vadd.f32 %v2968_v53, %v2773_v61  ;;  %v3521_v61 = vmul.f32 %v3030_v27, %v8532_v21 }
 0x3d3   : > { %3921 = vrot.lane.b32.xlu0 %v8961_v26, %s7596_s24  ;;  %7223 = vlog2.f32 %v2937_v8  ;;  %v2854_v23 = vsub.f32 0.0, %v2822_v38  ;;  %v2642_v35 = vpop.permute.xlu0 %2641  ;;  %v7204_v57 = vpop.eup %7203  ;;  %v2851_v4 = vsub.f32 0.0, %v2819_v63  ;;  %v2775_v21 = vmax.f32 %v9104_v44, 0.0 }
 0x3d4   : > { %v2721_v52 = vmul.f32 %v9008_v62, %v2642_v35  ;;  %7225 = vpow2.f32 %v2895_v3  ;;  %v2939_v14 = vadd.f32 1.0, %v7204_v57  ;;  %v2821_v15 = vand.u32 2147483647, %v9214_v12  ;;  %6578 = vmatprep.mubr.msk.f32.mxu0 %vm529_vm2, %v3029_v40 }
 0x3d5   : > { %3919 = vrot.lane.b32.xlu1 %v8964_v41, %s7596_s24  ;;  %v7206_v1 = vpop.eup %7205  ;;  %v2905_v13 = vmul.f32 1.442695, %v2854_v23  ;;  %v2637_v16 = vpop.permute.xlu1 %2636  ;;  %v2899_v38 = vmul.f32 1.442695, %v2851_v4  ;;  %6579 = vmatmul.mubr.msk.f32.gmra.mxu0 %vm529_vm2, %v3030_v27  ;;  %v3520_v3 = vmul.f32 %v3029_v40, %v8524_v10  ;;  %v2974_v57 = vmul.f32 0.6931472, %v7202_v37 }
 0x3d6   : > { %v2946_v53 = vadd.f32 1.0, %v7206_v1  ;;  %v9226_v8 = vadd.f32 %v9017_v7, %v2721_v52  ;;  %v7208_v63 = vpop.eup %7207  ;;  %v2853_v23 = vsub.f32 0.0, %v2821_v15  ;;  %v2720_v35 = vmul.f32 %v9008_v62, %v2637_v16 }
 0x3d7   : > { %4339 = vrot.lane.b32.xlu0 %v8961_v26, %s7597_s25  ;;  %7227 = vpow2.f32 %v2905_v13  ;;  %v2778_v26 = vmax.f32 %v9114_v45, 0.0  ;;  %6628 = vmatprep.mubr.msk.f32.mxu1 %vm529_vm2, %v3520_v3  ;;  %v2777_v4 = vmax.f32 %v9127_v22, 0.0  ;;  %v2982_v22 = vmul.f32 0.6931472, %v7208_v63 }
 0x3d8   : > { %v9231_v6 = vpop.eup %7209  ;;  %7229 = vlog2.f32 %v2946_v53  ;;  %v2824_v52 = vand.u32 2147483647, %v9226_v8  ;;  %v2903_v40 = vmul.f32 1.442695, %v2853_v23  ;;  %v9241_v37 = vadd.f32 %v9017_v7, %v2720_v35  ;;  %6629 = vmatmul.mubr.msk.f32.gmra.mxu1 %vm529_vm2, %v3521_v61 }
 0x3d9   : > { %4337 = vrot.lane.b32.xlu1 %v8964_v41, %s7597_s25  ;;  %v7212_v10 = vpop.eup %7211  ;;  %7231 = vlog2.f32 %v2939_v14  ;;  %v3032_v53 = vadd.f32 %v2974_v57, %v2776_v19 }
 0x3da   : > { %v7214_v44 = vpop.eup %7213  ;;  %v2856_v1 = vsub.f32 0.0, %v2824_v52  ;;  %v2652_v41 = vpop.permute.xlu0 %2651  ;;  %7233 = vpow2.f32 %v2899_v38  ;;  %v2972_v13 = vmul.f32 0.6931472, %v7212_v10  ;;  %v2823_v61 = vand.u32 2147483647, %v9241_v37 }
 0x3db   : > { %3925 = vrot.lane.b32.xlu0 %v8967_v56, %s7596_s24  ;;  %v7216_v15 = vpop.eup %7215  ;;  %v2941_v16 = vadd.f32 1.0, %v7214_v44  ;;  %v2723_v14 = vmul.f32 %v9008_v62, %v2652_v41  ;;  %7235 = vpow2.f32 %v2903_v40  ;;  %v3523_v41 = vmul.f32 %v3032_v53, %v8567_v20 }
 0x3dc   : > { %v7218_v3 = vpop.eup %7217  ;;  %v2909_v23 = vmul.f32 1.442695, %v2856_v1  ;;  %v2647_v35 = vpop.permute.xlu1 %2646  ;;  %v3031_v27 = vadd.f32 %v2972_v13, %v2775_v21  ;;  %v2855_v19 = vsub.f32 0.0, %v2823_v61  ;;  %v2978_v21 = vmul.f32 0.6931472, %v7216_v15 }
 0x3dd   : > { %3923 = vrot.lane.b32.xlu1 %v8970_v55, %s7596_s24  ;;  %7237 = vlog2.f32 %v2941_v16  ;;  %v9252_v38 = vadd.f32 %v9017_v7, %v2723_v14  ;;  %v2943_v52 = vadd.f32 1.0, %v7218_v3  ;;  %v2722_v10 = vmul.f32 %v9008_v62, %v2647_v35 }
 0x3de   : > { %v9255_v44 = vpop.eup %7219  ;;  %7239 = vpow2.f32 %v2909_v23  ;;  %6581 = vmatprep.mubr.msk.f32.mxu0 %vm529_vm2, %v3031_v27  ;;  %v3522_v57 = vmul.f32 %v3031_v27, %v8556_v31  ;;  %v2779_v14 = vmax.f32 %v9138_v18, 0.0  ;;  %v2907_v31 = vmul.f32 1.442695, %v2855_v19 }
 0x3df   : > { %4343 = vrot.lane.b32.xlu0 %v8967_v56, %s7597_s25  ;;  %v7222_v63 = vpop.eup %7221  ;;  %v2826_v40 = vand.u32 2147483647, %v9252_v38  ;;  %7241 = vlog2.f32 %v2943_v52  ;;  %v9263_v1 = vadd.f32 %v9017_v7, %v2722_v10  ;;  %6582 = vmatmul.mubr.msk.f32.gmra.mxu0 %vm529_vm2, %v3032_v53  ;;  %v2786_v56 = vmax.f32 %v9142_v17, 0.0 }
 0x3e0   : > { %v7224_v13 = vpop.eup %7223  ;;  %v2948_v16 = vadd.f32 1.0, %v7222_v63  ;;  %6631 = vmatprep.mubr.msk.f32.mxu1 %vm529_vm2, %v3522_v57  ;;  %v9276_v53 = vadd.f32 %v2982_v22, %v2780_v58  ;;  %v3034_v61 = vadd.f32 %v2978_v21, %v2778_v26  ;;  %v2986_v22 = vmul.f32 0.6931472, %v9231_v6 }
 0x3e1   : > { %4341 = vrot.lane.b32.xlu1 %v8970_v55, %s7597_s25  ;;  %v7226_v27 = vpop.eup %7225  ;;  %v2858_v15 = vsub.f32 0.0, %v2826_v40  ;;  %v2825_v23 = vand.u32 2147483647, %v9263_v1  ;;  %6632 = vmatmul.mubr.msk.f32.gmra.mxu1 %vm529_vm2, %v3523_v41  ;;  %v2976_v20 = vmul.f32 0.6931472, %v7224_v13  ;;  %v2781_v40 = vmax.f32 %v9153_v51, 0.0 }
 0x3e2   : > { %v2662_v3 = vpop.permute.xlu0 %2661  ;;  %7243 = vlog2.f32 %v2948_v16  ;;  %v2945_v18 = vadd.f32 1.0, %v7226_v27  ;;  %v3525_v6 = vmul.f32 %v3034_v61, %v8602_v54  ;;  %v10471_v54 = vmax.f32 %v9101_v60, 0.0 }
 0x3e3   : > { %3929 = vrot.lane.b32.xlu0 %v8973_v47, %s7596_s24  ;;  %v2725_v55 = vmul.f32 %v9008_v62, %v2662_v3  ;;  %v2913_v35 = vmul.f32 1.442695, %v2858_v15  ;;  %7245 = vpow2.f32 %v2907_v31  ;;  %v2857_v52 = vsub.f32 0.0, %v2825_v23 }
 0x3e4   : > { %v2657_v10 = vpop.permute.xlu1 %2656  ;;  %v3033_v19 = vadd.f32 %v2976_v20, %v2777_v4  ;;  %v7228_v57 = vpop.eup %7227  ;;  %7247 = vlog2.f32 %v2945_v18  ;;  %v2788_v31 = vmax.f32 %v9183_v43, 0.0  ;;  %v3038_v23 = vadd.f32 %v2986_v22, %v10471_v54 }
 0x3e5   : > { %v9284_v29 = vadd.f32 %v9017_v7, %v2725_v55  ;;  %3927 = vrot.lane.b32.xlu1 %v8976_v33, %s7596_s24  ;;  %v2724_v58 = vmul.f32 %v9008_v62, %v2657_v10  ;;  %v7230_v63 = vpop.eup %7229  ;;  %v2950_v45 = vadd.f32 1.0, %v7228_v57  ;;  %7249 = vpow2.f32 %v2913_v35 }
 0x3e6   : > { %v2911_v26 = vmul.f32 1.442695, %v2857_v52  ;;  %6584 = vmatprep.mubr.msk.f32.mxu0 %vm529_vm2, %v3033_v19  ;;  %v3524_v4 = vmul.f32 %v3033_v19, %v8580_v39  ;;  %v7232_v21 = vpop.eup %7231  ;;  %v2783_v39 = vmax.f32 %v9169_v25, 0.0 }
 0x3e7   : > { %4347 = vrot.lane.b32.xlu0 %v8973_v47, %s7597_s25  ;;  %v2828_v41 = vand.u32 2147483647, %v9284_v29  ;;  %v9297_v13 = vadd.f32 %v9017_v7, %v2724_v58  ;;  %6585 = vmatmul.mubr.msk.f32.gmra.mxu0 %vm529_vm2, %v3034_v61  ;;  %v7234_v16 = vpop.eup %7233  ;;  %v2980_v51 = vmul.f32 0.6931472, %v7232_v21  ;;  %v3527_v47 = vmul.f32 %v9276_v53, %v8625_v34 }
 0x3e8   : > { %6634 = vmatprep.mubr.msk.f32.mxu1 %vm529_vm2, %v3524_v4  ;;  %v7236_v27 = vpop.eup %7235  ;;  %v2947_v3 = vadd.f32 1.0, %v7234_v16  ;;  %7251 = vpow2.f32 %v2911_v26 }
 0x3e9   : > { %v2860_v15 = vsub.f32 0.0, %v2828_v41  ;;  %4345 = vrot.lane.b32.xlu1 %v8976_v33, %s7597_s25  ;;  %6635 = vmatmul.mubr.msk.f32.gmra.mxu1 %vm529_vm2, %v3525_v6  ;;  %7253 = vlog2.f32 %v2950_v45  ;;  %v2672_v25 = vpop.permute.xlu0 %2671  ;;  %v2949_v20 = vadd.f32 1.0, %v7236_v27  ;;  %v2827_v55 = vand.u32 2147483647, %v9297_v13 }
 0x3ea   : > { %v3035_v18 = vadd.f32 %v2980_v51, %v2779_v14  ;;  %v7238_v61 = vpop.eup %7237  ;;  %v2727_v35 = vmul.f32 %v9008_v62, %v2672_v25  ;;  %7255 = vlog2.f32 %v2947_v3  ;;  %v2990_v33 = vmul.f32 0.6931472, %v9255_v44 }
 0x3eb   : > { %v2917_v34 = vmul.f32 1.442695, %v2860_v15  ;;  %3933 = vrot.lane.b32.xlu0 %v8979_v36, %s7596_s24  ;;  %v7240_v52 = vpop.eup %7239  ;;  %7257 = vlog2.f32 %v2949_v20  ;;  %v2859_v60 = vsub.f32 0.0, %v2827_v55  ;;  %v2667_v10 = vpop.permute.xlu1 %2666  ;;  %v2984_v57 = vmul.f32 0.6931472, %v7238_v61 }
 0x3ec   : > { %6587 = vmatprep.mubr.msk.f32.mxu0 %vm529_vm2, %v3035_v18  ;;  %v3526_v19 = vmul.f32 %v3035_v18, %v8618_v49  ;;  %v7242_v14 = vpop.eup %7241  ;;  %v2952_v58 = vadd.f32 1.0, %v7240_v52  ;;  %v9319_v22 = vadd.f32 %v9017_v7, %v2727_v35  ;;  %v2726_v44 = vmul.f32 %v9008_v62, %v2667_v10 }
 0x3ed   : > { %7259 = vpow2.f32 %v2917_v34  ;;  %3931 = vrot.lane.b32.xlu1 %v8982_v9, %s7596_s24  ;;  %6588 = vmatmul.mubr.msk.f32.gmra.mxu0 %vm529_vm2, %v9276_v53  ;;  %v2785_v45 = vmax.f32 %v9186_v2, 0.0  ;;  %v2915_v26 = vmul.f32 1.442695, %v2859_v60  ;;  %v3037_v49 = vadd.f32 %v2984_v57, %v2781_v40  ;;  %s7598_s24 = smov 120  }
 0x3ee   : > { %6637 = vmatprep.mubr.msk.f32.mxu1 %vm529_vm2, %v3526_v19  ;;  %v2988_v4 = vmul.f32 0.6931472, %v7242_v14  ;;  %7261 = vlog2.f32 %v2952_v58  ;;  %v2830_v21 = vand.u32 2147483647, %v9319_v22  ;;  %v9332_v41 = vadd.f32 %v9017_v7, %v2726_v44 }
 0x3ef   : > { %4351 = vrot.lane.b32.xlu0 %v8979_v36, %s7597_s25  ;;  %6638 = vmatmul.mubr.msk.f32.gmra.mxu1 %vm529_vm2, %v3527_v47  ;;  %v2994_v6 = vmul.f32 0.6931472, %v7230_v63  ;;  %v7244_v53 = vpop.eup %7243  ;;  %v2790_v2 = vmax.f32 %v9200_v50, 0.0  ;;  %7263 = vpow2.f32 %v2915_v26  ;;  %v3528_v40 = vmul.f32 %v3037_v49, %v8638_v24 }
 0x3f0   : > { %6590 = vmatprep.mubr.msk.f32.mxu0 %vm529_vm2, %v3037_v49  ;;  %v3039_v16 = vadd.f32 %v2988_v4, %v2783_v39  ;;  %v7246_v51 = vpop.eup %7245  ;;  %v2862_v27 = vsub.f32 0.0, %v2830_v21  ;;  %v2829_v36 = vand.u32 2147483647, %v9332_v41  ;;  %v3529_v63 = vmul.f32 %v3038_v23, %v8658_v46 }
 0x3f1   : > { %v2682_v15 = vpop.permute.xlu0 %2681  ;;  %4349 = vrot.lane.b32.xlu1 %v8982_v9, %s7597_s25  ;;  %6591 = vmatmul.mubr.msk.f32.gmra.mxu0 %vm529_vm2, %v3038_v23  ;;  %v10472_v47 = vmax.f32 %v9122_v32, 0.0  ;;  %v7248_v54 = vpop.eup %7247  ;;  %v2951_v24 = vadd.f32 1.0, %v7246_v51  ;;  %v2998_v20 = vmul.f32 0.6931472, %v7244_v53  ;;  %v3042_v18 = vadd.f32 %v2994_v6, %v2786_v56 }
 0x3f2   : > { %v2729_v25 = vmul.f32 %v9008_v62, %v2682_v15  ;;  %6640 = vmatprep.mubr.msk.f32.mxu1 %vm529_vm2, %v3528_v40  ;;  %6593 = vmatprep.mubr.msk.f32.mxu0 %vm529_vm2, %v3039_v16  ;;  %v3530_v39 = vmul.f32 %v3039_v16, %v8670_v30  ;;  %v7250_v55 = vpop.eup %7249  ;;  %v2921_v9 = vmul.f32 1.442695, %v2862_v27  ;;  %v2861_v46 = vsub.f32 0.0, %v2829_v36 }
 0x3f3   : > { %v3040_v3 = vadd.f32 %v2990_v33, %v10472_v47  ;;  %1419 = vrot.lane.b32.xlu0 %v8250_v48, %s7598_s24  ;;  %v2677_v32 = vpop.permute.xlu1 %2676  ;;  %6641 = vmatmul.mubr.msk.f32.gmra.mxu1 %vm529_vm2, %v3529_v63  ;;  %v2992_v23 = vmul.f32 0.6931472, %v7248_v54  ;;  %v2954_v61 = vadd.f32 1.0, %v7250_v55  ;;  %7265 = vlog2.f32 %v2951_v24 }
 0x3f4   : > { %v9355_v34 = vadd.f32 %v9017_v7, %v2729_v25  ;;  %v2728_v30 = vmul.f32 %v9008_v62, %v2677_v32  ;;  %6643 = vmatprep.mubr.msk.f32.mxu1 %vm529_vm2, %v3530_v39  ;;  %7267 = vpow2.f32 %v2921_v9  ;;  %v2919_v35 = vmul.f32 1.442695, %v2861_v46  ;;  %v10475_v39 = vld [vmem:[#allocation18_spill] sm:$0xff]  ;;  %v10477_v46 = vld [vmem:[#allocation45_spill] sm:$0xff] }
 0x3f5   : > { %1417 = vrot.lane.b32.xlu1 %v8254_v5, %s7598_s24  ;;  %6594 = vmatmul.mubr.msk.f32.gmra.mxu0 %vm529_vm2, %v3040_v3  ;;  %v3531_v48 = vmul.f32 %v3040_v3, %v8685_v0  ;;  %v3041_v17 = vadd.f32 %v2992_v23, %v2785_v45  ;;  %v7252_v56 = vpop.eup %7251  ;;  %7269 = vlog2.f32 %v2954_v61  ;;  %v2787_v33 = vmax.f32 %v9205_v59, 0.0  ;;  %v10478_v23 = vld [vmem:[#allocation47_spill] sm:$0xff] }
 0x3f6   : > { %v2832_v52 = vand.u32 2147483647, %v9355_v34  ;;  %v2692_v60 = vpop.permute.xlu0 %2691  ;;  %v9366_v10 = vadd.f32 %v9017_v7, %v2728_v30  ;;  %v7254_v19 = vpop.eup %7253  ;;  %v2953_v5 = vadd.f32 1.0, %v7252_v56  ;;  %7271 = vpow2.f32 %v2919_v35  ;;  %v10479_v30 = vld [vmem:[#allocation19_spill] sm:$0xff] }
 0x3f7   : > { %v2731_v57 = vmul.f32 %v9008_v62, %v2692_v60  ;;  %1423 = vrot.lane.b32.xlu0 %v8258_v42, %s7598_s24  ;;  %6644 = vmatmul.mubr.msk.f32.gmra.mxu1 %vm529_vm2, %v3531_v48  ;;  %v3532_v0 = vmul.f32 %v3041_v17, %v8701_v28  ;;  %v7256_v14 = vpop.eup %7255  ;;  %v3533_v45 = vmul.f32 %v3042_v18, %v8719_v11  ;;  %v10473_v28 = vld [vmem:[#allocation16_spill] sm:$0xff]  ;;  %v2789_v11 = vmax.f32 %v9214_v12, 0.0 }
 0x3f8   : > { %v2864_v59 = vsub.f32 0.0, %v2832_v52  ;;  %v2831_v58 = vand.u32 2147483647, %v9366_v10  ;;  %v2687_v44 = vpop.permute.xlu1 %2686  ;;  %6596 = vmatprep.mubr.msk.f32.mxu0 %vm529_vm2, %v3041_v17  ;;  %v3044_v26 = vadd.f32 %v2998_v20, %v2788_v31  ;;  %v7258_v49 = vpop.eup %7257  ;;  %7273 = vlog2.f32 %v2953_v5 }
 0x3f9   : > { %v9379_v42 = vadd.f32 %v9017_v7, %v2731_v57  ;;  %v2730_v4 = vmul.f32 %v9008_v62, %v2687_v44  ;;  %1421 = vrot.lane.b32.xlu1 %v10473_v28, %s7598_s24  ;;  %6597 = vmatmul.mubr.msk.f32.gmra.mxu0 %vm529_vm2, %v3042_v18  ;;  %v2996_v21 = vmul.f32 0.6931472, %v7256_v14  ;;  %v3000_v31 = vmul.f32 0.6931472, %v7258_v49  ;;  %v10474_v62 = vld [vmem:[#allocation17_spill] sm:$0xff]  ;;  %v10483_v28 = vld [vmem:[#allocation22_spill] sm:$0xff] }
 0x3fa   : > { %v7260_v6 = vpop.eup %7259  ;;  %v2925_v53 = vmul.f32 1.442695, %v2864_v59  ;;  %v9386_v40 = vpop.permute.xlu0 %4295  ;;  %v2863_v43 = vsub.f32 0.0, %v2831_v58  ;;  %6646 = vmatprep.mubr.msk.f32.mxu1 %vm529_vm2, %v3532_v0  ;;  %v3002_v15 = vmul.f32 0.6931472, %v7254_v19  ;;  %v2792_v52 = vmax.f32 %v9226_v8, 0.0 }
 0x3fb   : > { %v2956_v16 = vadd.f32 1.0, %v7260_v6  ;;  %v2834_v51 = vand.u32 2147483647, %v9379_v42  ;;  %1427 = vrot.lane.b32.xlu0 %v10474_v62, %s7598_s24  ;;  %v9393_v27 = vadd.f32 %v9017_v7, %v2730_v4  ;;  %6647 = vmatmul.mubr.msk.f32.gmra.mxu1 %vm529_vm2, %v3533_v45  ;;  %v7262_v36 = vpop.eup %7261  ;;  %v3043_v47 = vadd.f32 %v2996_v21, %v2787_v33  ;;  %v10476_v7 = vld [vmem:[#allocation46_spill] sm:$0xff]  ;;  %v10480_v19 = vld [vmem:[#allocation20_spill] sm:$0xff]  ;;  %v10481_v59 = vld [vmem:[#allocation21_spill] sm:$0xff] }
 0x3fc   : > { %7275 = vpow2.f32 %v2925_v53  ;;  %v2923_v12 = vmul.f32 1.442695, %v2863_v43  ;;  %v9396_v63 = vpop.permute.xlu1 %4293  ;;  %v3045_v3 = vadd.f32 %v3000_v31, %v2789_v11  ;;  %v7264_v54 = vpop.eup %7263  ;;  %v3535_v20 = vmul.f32 %v3044_v26, %v10476_v7  ;;  %v10482_v8 = vld [vmem:[#allocation48_spill] sm:$0xff]  ;;  %v10484_v11 = vld [vmem:[#allocation49_spill] sm:$0xff] }
 0x3fd   : > { %7277 = vlog2.f32 %v2956_v16  ;;  %v2866_v25 = vsub.f32 0.0, %v2834_v51  ;;  %v2833_v24 = vand.u32 2147483647, %v9393_v27  ;;  %1425 = vrot.lane.b32.xlu1 %v10475_v39, %s7598_s24  ;;  %v2955_v9 = vadd.f32 1.0, %v7264_v54  ;;  %6599 = vmatprep.mubr.msk.f32.mxu0 %vm529_vm2, %v3043_v47  ;;  %v10485_v16 = vld [vmem:[#allocation23_spill] sm:$0xff]  ;;  %v10486_v51 = vld [vmem:[#allocation50_spill] sm:$0xff] }
 0x3fe   : > { %v9402_v55 = vpop.permute.xlu0 %3881  ;;  %7279 = vpow2.f32 %v2923_v12  ;;  %v3534_v32 = vmul.f32 %v3043_v47, %v10477_v46  ;;  %v3536_v18 = vmul.f32 %v3045_v3, %v10478_v23  ;;  %6600 = vmatmul.mubr.msk.f32.gmra.mxu0 %vm529_vm2, %v3044_v26  ;;  %v3046_v48 = vadd.f32 %v3002_v15, %v2790_v2  ;;  %v10487_v47 = vld [vmem:[#allocation24_spill] sm:$0xff]  ;;  %v10488_v7 = vld [vmem:[#allocation25_spill] sm:$0xff] }
 0x3ff   : > { %v2929_v61 = vmul.f32 1.442695, %v2866_v25  ;;  %1431 = vrot.lane.b32.xlu0 %v10479_v30, %s7598_s24  ;;  %v2865_v35 = vsub.f32 0.0, %v2833_v24  ;;  %v3006_v17 = vmul.f32 0.6931472, %v7262_v36  ;;  %7281 = vlog2.f32 %v2955_v9  ;;  %6602 = vmatprep.mubr.msk.f32.mxu0 %vm529_vm2, %v3045_v3  ;;  %v10490_v23 = vld [vmem:[#allocation52_spill] sm:$0xff] }
 0x400   : > { %v9412_v56 = vpop.permute.xlu1 %3879  ;;  %6649 = vmatprep.mubr.msk.f32.mxu1 %vm529_vm2, %v3534_v32  ;;  %v7266_v33 = vpop.eup %7265  ;;  %v2791_v2 = vmax.f32 %v9241_v37, 0.0  ;;  %v3537_v58 = vmul.f32 %v3046_v48, %v10482_v8  ;;  %v2794_v6 = vmax.f32 %v9252_v38, 0.0  ;;  %v2793_v31 = vmax.f32 %v9263_v1, 0.0  ;;  %v10494_v8 = vld [vmem:[#allocation53_spill] sm:$0xff] }
 0x401   : > { %7283 = vpow2.f32 %v2929_v61  ;;  %v2927_v60 = vmul.f32 1.442695, %v2865_v35  ;;  %1429 = vrot.lane.b32.xlu1 %v10480_v19, %s7598_s24  ;;  %6650 = vmatmul.mubr.msk.f32.gmra.mxu1 %vm529_vm2, %v3535_v20  ;;  %v7268_v50 = vpop.eup %7267  ;;  %v3004_v5 = vmul.f32 0.6931472, %v7266_v33  ;;  %v3048_v44 = vadd.f32 %v3006_v17, %v2792_v52  ;;  %v10489_v20 = vld [vmem:[#allocation51_spill] sm:$0xff]  ;;  %v10491_v35 = vld [vmem:[#allocation26_spill] sm:$0xff] }
 0x402   : > { %v9421_v57 = vpop.permute.xlu0 %4299  ;;  %6652 = vmatprep.mubr.msk.f32.mxu1 %vm529_vm2, %v3536_v18  ;;  %v7270_v0 = vpop.eup %7269  ;;  %v2958_v14 = vadd.f32 1.0, %v7268_v50  ;;  %6603 = vmatmul.mubr.msk.f32.gmra.mxu0 %vm529_vm2, %v3046_v48  ;;  %v2796_v30 = vmax.f32 %v9284_v29, 0.0  ;;  %v2795_v17 = vmax.f32 %v9297_v13, 0.0  ;;  %v10492_v50 = vld [vmem:[#allocation27_spill] sm:$0xff] }
 0x403   : > { %1435 = vrot.lane.b32.xlu0 %v10481_v59, %s7598_s24  ;;  %7285 = vpow2.f32 %v2927_v60  ;;  %v7272_v45 = vpop.eup %7271  ;;  %v3047_v37 = vadd.f32 %v3004_v5, %v2791_v2  ;;  %v3010_v49 = vmul.f32 0.6931472, %v7270_v0  ;;  %v3539_v62 = vmul.f32 %v3048_v44, %v10486_v51 }
 0x404   : > { %v9428_v26 = vpop.permute.xlu1 %4297  ;;  %7287 = vlog2.f32 %v2958_v14  ;;  %v2957_v4 = vadd.f32 1.0, %v7272_v45  ;;  %v10493_v14 = vld [vmem:[#allocation28_spill] sm:$0xff]  ;;  %v10495_v45 = vld [vmem:[#allocation29_spill] sm:$0xff] }
 0x405   : > { %1433 = vrot.lane.b32.xlu1 %v10483_v28, %s7598_s24  ;;  %6653 = vmatmul.mubr.msk.f32.gmra.mxu1 %vm529_vm2, %v3537_v58  ;;  %v7274_v21 = vpop.eup %7273  ;;  %v3538_v43 = vmul.f32 %v3047_v37, %v10484_v11  ;;  %v3050_v38 = vadd.f32 %v3010_v49, %v2794_v6  ;;  %v2798_v28 = vmax.f32 %v9319_v22, 0.0  ;;  %v2797_v6 = vmax.f32 %v9332_v41, 0.0  ;;  %v10500_v41 = vld [vmem:[#allocation55_spill] sm:$0xff] }
 0x406   : > { %v9434_v53 = vpop.permute.xlu0 %3885  ;;  %6605 = vmatprep.mubr.msk.f32.mxu0 %vm529_vm2, %v3047_v37  ;;  %7289 = vlog2.f32 %v2957_v4  ;;  %v3008_v15 = vmul.f32 0.6931472, %v7274_v21  ;;  %v10496_v37 = vld [vmem:[#allocation54_spill] sm:$0xff] }
 0x407   : > { %1439 = vrot.lane.b32.xlu0 %v10485_v16, %s7598_s24  ;;  %6606 = vmatmul.mubr.msk.f32.gmra.mxu0 %vm529_vm2, %v3048_v44  ;;  %v3541_v18 = vmul.f32 %v3050_v38, %v10490_v23 }
 0x408   : > { %v9443_v36 = vpop.permute.xlu1 %3883  ;;  %6655 = vmatprep.mubr.msk.f32.mxu1 %vm529_vm2, %v3538_v43  ;;  %v3049_v1 = vadd.f32 %v3008_v15, %v2793_v31  ;;  %v10497_v43 = vld [vmem:[#allocation30_spill] sm:$0xff] }
 0x409   : > { %v7276_v12 = vpop.eup %7275  ;;  %1437 = vrot.lane.b32.xlu1 %v10487_v47, %s7598_s24  ;;  %6656 = vmatmul.mubr.msk.f32.gmra.mxu1 %vm529_vm2, %v3539_v62  ;;  %v10498_v62 = vld [vmem:[#allocation31_spill] sm:$0xff] }
 0x40a   : > { %v7278_v3 = vpop.eup %7277  ;;  %v2960_v54 = vadd.f32 1.0, %v7276_v12  ;;  %v9449_v25 = vpop.permute.xlu0 %4303  ;;  %6608 = vmatprep.mubr.msk.f32.mxu0 %vm529_vm2, %v3049_v1  ;;  %v3540_v9 = vmul.f32 %v3049_v1, %v10489_v20  ;;  %v2799_v20 = vmax.f32 %v9366_v10, 0.0  ;;  %v2802_v10 = vmax.f32 %v9379_v42, 0.0 }
 0x40b   : > { %v7280_v24 = vpop.eup %7279  ;;  %v3014_v39 = vmul.f32 0.6931472, %v7278_v3  ;;  %1443 = vrot.lane.b32.xlu0 %v10488_v7, %s7598_s24  ;;  %6609 = vmatmul.mubr.msk.f32.gmra.mxu0 %vm529_vm2, %v3050_v38  ;;  %v10499_v38 = vld [vmem:[#allocation32_spill] sm:$0xff]  ;;  %v10502_v7 = vld [vmem:[#allocation33_spill] sm:$0xff] }
 0x40c   : > { %7291 = vlog2.f32 %v2960_v54  ;;  %v2959_v46 = vadd.f32 1.0, %v7280_v24  ;;  %v9455_v32 = vpop.permute.xlu1 %4301  ;;  %v7282_v61 = vpop.eup %7281  ;;  %6658 = vmatprep.mubr.msk.f32.mxu1 %vm529_vm2, %v3540_v9  ;;  %v10501_v3 = vld [vmem:[#allocation56_spill] sm:$0xff] }
 0x40d   : > { %1441 = vrot.lane.b32.xlu1 %v10491_v35, %s7598_s24  ;;  %v3012_v33 = vmul.f32 0.6931472, %v7282_v61  ;;  %6659 = vmatmul.mubr.msk.f32.gmra.mxu1 %vm529_vm2, %v3541_v18  ;;  %v3052_v60 = vadd.f32 %v3014_v39, %v2796_v30  ;;  %v2800_v39 = vmax.f32 %v9355_v34, 0.0  ;;  %v10503_v18 = vld [vmem:[#allocation34_spill] sm:$0xff] }
 0x40e   : > { %v7284_v48 = vpop.eup %7283  ;;  %7293 = vlog2.f32 %v2959_v46  ;;  %v9464_v52 = vpop.permute.xlu0 %3889 }
 0x40f   : > { %v2962_v19 = vadd.f32 1.0, %v7284_v48  ;;  %1447 = vrot.lane.b32.xlu0 %v10492_v50, %s7598_s24  ;;  %v3051_v2 = vadd.f32 %v3012_v33, %v2795_v17  ;;  %v3543_v49 = vmul.f32 %v3052_v60, %v10496_v37  ;;  %v10504_v48 = vld [vmem:[#allocation35_spill] sm:$0xff]  ;;  %v2801_v50 = vmax.f32 %v9393_v27, 0.0 }
 0x410   : > { %v7286_v29 = vpop.eup %7285  ;;  %v9469_v5 = vpop.permute.xlu1 %3887 }
 0x411   : > { %7295 = vlog2.f32 %v2962_v19  ;;  %v2961_v0 = vadd.f32 1.0, %v7286_v29  ;;  %1445 = vrot.lane.b32.xlu1 %v10493_v14, %s7598_s24  ;;  %v7288_v13 = vpop.eup %7287  ;;  %6611 = vmatprep.mubr.msk.f32.mxu0 %vm529_vm2, %v3051_v2  ;;  %v3542_v58 = vmul.f32 %v3051_v2, %v10494_v8  ;;  %v10506_v2 = vld [vmem:[#allocation36_spill] sm:$0xff] }
 0x412   : > { %v9473_v59 = vpop.permute.xlu0 %4307  ;;  %v3018_v44 = vmul.f32 0.6931472, %v7288_v13  ;;  %6612 = vmatmul.mubr.msk.f32.gmra.mxu0 %vm529_vm2, %v3052_v60  ;;  %v10505_v60 = vld [vmem:[#allocation57_spill] sm:$0xff] }
 0x413   : > { %7297 = vlog2.f32 %v2961_v0  ;;  %1451 = vrot.lane.b32.xlu0 %v10495_v45, %s7598_s24  ;;  %v7290_v4 = vpop.eup %7289  ;;  %6661 = vmatprep.mubr.msk.f32.mxu1 %vm529_vm2, %v3542_v58  ;;  %v10507_v0 = vld [vmem:[#allocation58_spill] sm:$0xff]  ;;  %v10508_v58 = vld [vmem:[#allocation37_spill] sm:$0xff]  ;;  %v10510_v45 = vld [vmem:[#allocation59_spill] sm:$0xff] }
 0x414   : > { %v9482_v21 = vpop.permute.xlu1 %4305  ;;  %v3016_v11 = vmul.f32 0.6931472, %v7290_v4  ;;  %6662 = vmatmul.mubr.msk.f32.gmra.mxu1 %vm529_vm2, %v3543_v49  ;;  %v3054_v31 = vadd.f32 %v3018_v44, %v2798_v28  ;;  %v10509_v44 = vld [vmem:[#allocation38_spill] sm:$0xff]  ;;  %v10511_v4 = vld [vmem:[#allocation60_spill] sm:$0xff] }
 0x415   : > { %1449 = vrot.lane.b32.xlu1 %v10497_v43, %s7598_s24 }
 0x416   : > { %v9489_v16 = vpop.permute.xlu0 %3893  ;;  %v3053_v51 = vadd.f32 %v3016_v11, %v2797_v6  ;;  %v3545_v54 = vmul.f32 %v3054_v31, %v10501_v3  ;;  %v10512_v6 = vld [vmem:[#allocation39_spill] sm:$0xff]  ;;  %v10513_v11 = vld [vmem:[#allocation62_spill] sm:$0xff] }
 0x417   : > { %1455 = vrot.lane.b32.xlu0 %v10498_v62, %s7598_s24  ;;  %v10520_v3 = vld [vmem:[#allocation42_spill] sm:$0xff] }
 0x418   : > { %v9493_v22 = vpop.permute.xlu1 %3891  ;;  %6614 = vmatprep.mubr.msk.f32.mxu0 %vm529_vm2, %v3053_v51  ;;  %v3544_v12 = vmul.f32 %v3053_v51, %v10500_v41  ;;  %v10515_v51 = vld [vmem:[#allocation63_spill] sm:$0xff]  ;;  %v10518_v41 = vld [vmem:[#allocation66_spill] sm:$0xff] }
 0x419   : > { %v7292_v15 = vpop.eup %7291  ;;  %1453 = vrot.lane.b32.xlu1 %v10499_v38, %s7598_s24  ;;  %6615 = vmatmul.mubr.msk.f32.gmra.mxu0 %vm529_vm2, %v3054_v31  ;;  %v10514_v31 = vld [vmem:[#allocation40_spill] sm:$0xff]  ;;  %v10517_v38 = vld [vmem:[#allocation41_spill] sm:$0xff] }
 0x41a   : > { %v3022_v47 = vmul.f32 0.6931472, %v7292_v15  ;;  %v9499_v1 = vpop.permute.xlu0 %4311  ;;  %6664 = vmatprep.mubr.msk.f32.mxu1 %vm529_vm2, %v3544_v12  ;;  %v10516_v15 = vld [vmem:[#allocation61_spill] sm:$0xff] }
 0x41b   : > { %v7294_v24 = vpop.eup %7293  ;;  %1459 = vrot.lane.b32.xlu0 %v10502_v7, %s7598_s24  ;;  %6665 = vmatmul.mubr.msk.f32.gmra.mxu1 %vm529_vm2, %v3545_v54 }
 0x41c   : > { %v3020_v9 = vmul.f32 0.6931472, %v7294_v24  ;;  %v9508_v46 = vpop.permute.xlu1 %4309  ;;  %v3056_v23 = vadd.f32 %v3022_v47, %v2800_v39  ;;  %v10519_v47 = vld [vmem:[#allocation64_spill] sm:$0xff]  ;;  %v10521_v24 = vld [vmem:[#allocation65_spill] sm:$0xff]  ;;  %v10522_v39 = vld [vmem:[#allocation43_spill] sm:$0xff] }
 0x41d   : > { %1457 = vrot.lane.b32.xlu1 %v10503_v18, %s7598_s24 }
 0x41e   : > { %v7296_v61 = vpop.eup %7295  ;;  %v3055_v30 = vadd.f32 %v3020_v9, %v2799_v20  ;;  %v9513_v35 = vpop.permute.xlu0 %3897  ;;  %v3547_v14 = vmul.f32 %v3056_v23, %v10507_v0  ;;  %v10523_v20 = vld [vmem:[#allocation44_spill] sm:$0xff] }
 0x41f   : > { %v3026_v34 = vmul.f32 0.6931472, %v7296_v61  ;;  %1463 = vrot.lane.b32.xlu0 %v10504_v48, %s7598_s24 }
 0x420   : > { %v7298_v17 = vpop.eup %7297  ;;  %v9518_v33 = vpop.permute.xlu1 %3895  ;;  %6617 = vmatprep.mubr.msk.f32.mxu0 %vm529_vm2, %v3055_v30  ;;  %v3546_v19 = vmul.f32 %v3055_v30, %v10505_v60 }
 0x421   : > { %v3024_v29 = vmul.f32 0.6931472, %v7298_v17  ;;  %1461 = vrot.lane.b32.xlu1 %v10506_v2, %s7598_s24  ;;  %6618 = vmatmul.mubr.msk.f32.gmra.mxu0 %vm529_vm2, %v3056_v23  ;;  %v3058_v13 = vadd.f32 %v3026_v34, %v2802_v10 }
 0x422   : > { %v9527_v8 = vpop.permute.xlu0 %4315  ;;  %6667 = vmatprep.mubr.msk.f32.mxu1 %vm529_vm2, %v3546_v19 }
 0x423   : > { %v3057_v42 = vadd.f32 %v3024_v29, %v2801_v50  ;;  %1467 = vrot.lane.b32.xlu0 %v10508_v58, %s7598_s24  ;;  %6668 = vmatmul.mubr.msk.f32.gmra.mxu1 %vm529_vm2, %v3547_v14  ;;  %v3549_v28 = vmul.f32 %v3058_v13, %v10511_v4 }
 0x424   : > { %v4314_v27 = vpop.permute.xlu1 %4313 }
 0x425   : > { %1465 = vrot.lane.b32.xlu1 %v10509_v44, %s7598_s24  ;;  %6620 = vmatprep.mubr.msk.f32.mxu0 %vm529_vm2, %v3057_v42  ;;  %v3548_v37 = vmul.f32 %v3057_v42, %v10510_v45  ;;  %v9659_v45 = vld [vmem:[%s10352_s11] ss:$0 sm:$0xff] }
 0x426   : > { %v3902_v49 = vpop.permute.xlu0 %3901  ;;  %6621 = vmatmul.mubr.msk.f32.gmra.mxu0 %vm529_vm2, %v3058_v13 }
 0x427   : > { %1471 = vrot.lane.b32.xlu0 %v10512_v6, %s7598_s24  ;;  %6670 = vmatprep.mubr.msk.f32.mxu1 %vm529_vm2, %v3548_v37 }
 0x428   : > { %6677 = vmatprep.mubr.msk.f32.mxu0 %vm3935_vm3, %v10513_v11  ;;  %v3900_v43 = vpop.permute.xlu1 %3899  ;;  %6671 = vmatmul.mubr.msk.f32.gmra.mxu1 %vm529_vm2, %v3549_v28 }
 0x429   : > { %1469 = vrot.lane.b32.xlu1 %v10514_v31, %s7598_s24  ;;  %6729 = vmatprep.mubr.msk.f32.mxu1 %vm3935_vm3, %v10515_v51 }
 0x42a   : > { %v4320_v62 = vpop.permute.xlu0 %4319  ;;  %6678 = vmatmul.mubr.msk.f32.vlgmr.msra.gmra.mxu0 %vm3935_vm3, %v10516_v15 }
 0x42b   : > { %1475 = vrot.lane.b32.xlu0 %v10517_v38, %s7598_s24  ;;  %6680 = vmatprep.mubr.msk.f32.mxu0 %vm3935_vm3, %v10518_v41 }
 0x42c   : > { %v4318_v12 = vpop.permute.xlu1 %4317  ;;  %6730 = vmatmul.mubr.msk.f32.vlgmr.msra.gmra.mxu1 %vm3935_vm3, %v10519_v47 }
 0x42d   : > { %1473 = vrot.lane.b32.xlu1 %v10520_v3, %s7598_s24  ;;  %6732 = vmatprep.mubr.msk.f32.mxu1 %vm3935_vm3, %v9396_v63 }
 0x42e   : > { %v3906_v54 = vpop.permute.xlu0 %3905  ;;  %6681 = vmatmul.mubr.msk.f32.gmra.mxu0 %vm3935_vm3, %v10521_v24 }
 0x42f   : > { %1479 = vrot.lane.b32.xlu0 %v10522_v39, %s7598_s24  ;;  %6683 = vmatprep.mubr.msk.f32.mxu0 %vm3935_vm3, %v9412_v56 }
 0x430   : > { %v3904_v7 = vpop.permute.xlu1 %3903  ;;  %6733 = vmatmul.mubr.msk.f32.gmra.mxu1 %vm3935_vm3, %v9386_v40 }
 0x431   : > { %1477 = vrot.lane.b32.xlu1 %v10523_v20, %s7598_s24  ;;  %6735 = vmatprep.mubr.msk.f32.mxu1 %vm3935_vm3, %v9428_v26 }
 0x432   : > { %v4324_v63 = vpop.permute.xlu0 %4323  ;;  %6684 = vmatmul.mubr.msk.f32.gmra.mxu0 %vm3935_vm3, %v9402_v55 }
 0x433   : > { %6686 = vmatprep.mubr.msk.f32.mxu0 %vm3935_vm3, %v9443_v36 }
 0x434   : > { %v4322_v9 = vpop.permute.xlu1 %4321  ;;  %6736 = vmatmul.mubr.msk.f32.gmra.mxu1 %vm3935_vm3, %v9421_v57 }
 0x435   : > { %6738 = vmatprep.mubr.msk.f32.mxu1 %vm3935_vm3, %v9455_v32 }
 0x436   : > { %v3910_v40 = vpop.permute.xlu0 %3909  ;;  %6687 = vmatmul.mubr.msk.f32.gmra.mxu0 %vm3935_vm3, %v9434_v53 }
 0x437   : > { %6689 = vmatprep.mubr.msk.f32.mxu0 %vm3935_vm3, %v9469_v5 }
 0x438   : > { %v3908_v56 = vpop.permute.xlu1 %3907  ;;  %6739 = vmatmul.mubr.msk.f32.gmra.mxu1 %vm3935_vm3, %v9449_v25 }
 0x439   : > { %6741 = vmatprep.mubr.msk.f32.mxu1 %vm3935_vm3, %v9482_v21 }
 0x43a   : > { %v4328_v55 = vpop.permute.xlu0 %4327  ;;  %6690 = vmatmul.mubr.msk.f32.gmra.mxu0 %vm3935_vm3, %v9464_v52 }
 0x43b   : > { %6692 = vmatprep.mubr.msk.f32.mxu0 %vm3935_vm3, %v9493_v22 }
 0x43c   : > { %v4326_v57 = vpop.permute.xlu1 %4325  ;;  %6742 = vmatmul.mubr.msk.f32.gmra.mxu1 %vm3935_vm3, %v9473_v59 }
 0x43d   : > { %6744 = vmatprep.mubr.msk.f32.mxu1 %vm3935_vm3, %v9508_v46 }
 0x43e   : > { %v3914_v26 = vpop.permute.xlu0 %3913  ;;  %6693 = vmatmul.mubr.msk.f32.gmra.mxu0 %vm3935_vm3, %v9489_v16 }
 0x43f   : > { %6695 = vmatprep.mubr.msk.f32.mxu0 %vm3935_vm3, %v9518_v33 }
 0x440   : > { %v3912_v53 = vpop.permute.xlu1 %3911  ;;  %6745 = vmatmul.mubr.msk.f32.gmra.mxu1 %vm3935_vm3, %v9499_v1 }
 0x441   : > { %6747 = vmatprep.mubr.msk.f32.mxu1 %vm3935_vm3, %v4314_v27 }
 0x442   : > { %v4332_v36 = vpop.permute.xlu0 %4331  ;;  %6696 = vmatmul.mubr.msk.f32.gmra.mxu0 %vm3935_vm3, %v9513_v35 }
 0x443   : > { %6698 = vmatprep.mubr.msk.f32.mxu0 %vm3935_vm3, %v3900_v43 }
 0x444   : > { %v4330_v25 = vpop.permute.xlu1 %4329  ;;  %6748 = vmatmul.mubr.msk.f32.gmra.mxu1 %vm3935_vm3, %v9527_v8 }
 0x445   : > { %6750 = vmatprep.mubr.msk.f32.mxu1 %vm3935_vm3, %v4318_v12 }
 0x446   : > { %v3918_v32 = vpop.permute.xlu0 %3917  ;;  %6699 = vmatmul.mubr.msk.f32.gmra.mxu0 %vm3935_vm3, %v3902_v49 }
 0x447   : > { %6701 = vmatprep.mubr.msk.f32.mxu0 %vm3935_vm3, %v3904_v7 }
 0x448   : > { %v3916_v52 = vpop.permute.xlu1 %3915  ;;  %6751 = vmatmul.mubr.msk.f32.gmra.mxu1 %vm3935_vm3, %v4320_v62 }
 0x449   : > { %6753 = vmatprep.mubr.msk.f32.mxu1 %vm3935_vm3, %v4322_v9 }
 0x44a   : > { %v4336_v5 = vpop.permute.xlu0 %4335  ;;  %6702 = vmatmul.mubr.msk.f32.gmra.mxu0 %vm3935_vm3, %v3906_v54 }
 0x44b   : > { %6704 = vmatprep.mubr.msk.f32.mxu0 %vm3935_vm3, %v3908_v56 }
 0x44c   : > { %v4334_v59 = vpop.permute.xlu1 %4333  ;;  %6754 = vmatmul.mubr.msk.f32.gmra.mxu1 %vm3935_vm3, %v4324_v63 }
 0x44d   : > { %6756 = vmatprep.mubr.msk.f32.mxu1 %vm3935_vm3, %v4326_v57 }
 0x44e   : > { %v3922_v21 = vpop.permute.xlu0 %3921  ;;  %6705 = vmatmul.mubr.msk.f32.gmra.mxu0 %vm3935_vm3, %v3910_v40 }
 0x44f   : > { %6707 = vmatprep.mubr.msk.f32.mxu0 %vm3935_vm3, %v3912_v53 }
 0x450   : > { %v3920_v16 = vpop.permute.xlu1 %3919  ;;  %6757 = vmatmul.mubr.msk.f32.gmra.mxu1 %vm3935_vm3, %v4328_v55 }
 0x451   : > { %6759 = vmatprep.mubr.msk.f32.mxu1 %vm3935_vm3, %v4330_v25 }
 0x452   : > { %v4340_v22 = vpop.permute.xlu0 %4339  ;;  %6708 = vmatmul.mubr.msk.f32.gmra.mxu0 %vm3935_vm3, %v3914_v26 }
 0x453   : > { %6710 = vmatprep.mubr.msk.f32.mxu0 %vm3935_vm3, %v3916_v52 }
 0x454   : > { %v4338_v1 = vpop.permute.xlu1 %4337  ;;  %6760 = vmatmul.mubr.msk.f32.gmra.mxu1 %vm3935_vm3, %v4332_v36 }
 0x455   : > { %6762 = vmatprep.mubr.msk.f32.mxu1 %vm3935_vm3, %v4334_v59 }
 0x456   : > { %v3926_v46 = vpop.permute.xlu0 %3925  ;;  %6711 = vmatmul.mubr.msk.f32.gmra.mxu0 %vm3935_vm3, %v3918_v32 }
 0x457   : > { %6713 = vmatprep.mubr.msk.f32.mxu0 %vm3935_vm3, %v3920_v16 }
 0x458   : > { %v3924_v23 = vpop.permute.xlu1 %3923  ;;  %6763 = vmatmul.mubr.msk.f32.gmra.mxu1 %vm3935_vm3, %v4336_v5 }
 0x459   : > { %6765 = vmatprep.mubr.msk.f32.mxu1 %vm3935_vm3, %v4338_v1 }
 0x45a   : > { %v4344_v18 = vpop.permute.xlu0 %4343  ;;  %6714 = vmatmul.mubr.msk.f32.gmra.mxu0 %vm3935_vm3, %v3922_v21 }
 0x45b   : > { %6716 = vmatprep.mubr.msk.f32.mxu0 %vm3935_vm3, %v3924_v23 }
 0x45c   : > { %v4342_v61 = vpop.permute.xlu1 %4341  ;;  %6766 = vmatmul.mubr.msk.f32.gmra.mxu1 %vm3935_vm3, %v4340_v22 }
 0x45d   : > { %6768 = vmatprep.mubr.msk.f32.mxu1 %vm3935_vm3, %v4342_v61 }
 0x45e   : > { %v3930_v30 = vpop.permute.xlu0 %3929  ;;  %6717 = vmatmul.mubr.msk.f32.gmra.mxu0 %vm3935_vm3, %v3926_v46 }
 0x460   : > { %v3928_v35 = vpop.permute.xlu1 %3927  ;;  %6769 = vmatmul.mubr.msk.f32.gmra.mxu1 %vm3935_vm3, %v4344_v18 }
 0x461   : > { %6719 = vmatprep.mubr.msk.f32.mxu0 %vm3935_vm3, %v3928_v35 }
 0x462   : > { %v4348_v34 = vpop.permute.xlu0 %4347  ;;  %6720 = vmatmul.mubr.msk.f32.gmra.mxu0 %vm3935_vm3, %v3930_v30 }
 0x464   : > { %v4346_v48 = vpop.permute.xlu1 %4345 }
 0x465   : > { %6771 = vmatprep.mubr.msk.f32.mxu1 %vm3935_vm3, %v4346_v48 }
 0x466   : > { %v3934_v17 = vpop.permute.xlu0 %3933  ;;  %6772 = vmatmul.mubr.msk.f32.gmra.mxu1 %vm3935_vm3, %v4348_v34 }
 0x468   : > { %v3932_v10 = vpop.permute.xlu1 %3931 }
 0x469   : > { %6722 = vmatprep.mubr.msk.f32.mxu0 %vm3935_vm3, %v3932_v10 }
 0x46a   : > { %v4352_v33 = vpop.permute.xlu0 %4351  ;;  %6723 = vmatmul.mubr.msk.f32.gmra.mxu0 %vm3935_vm3, %v3934_v17 }
 0x46c   : > { %v4350_v60 = vpop.permute.xlu1 %4349 }
 0x46d   : > { %6774 = vmatprep.mubr.msk.f32.mxu1 %vm3935_vm3, %v4350_v60 }
 0x46e   : > { %v1420_v19 = vpop.permute.xlu0 %1419  ;;  %6775 = vmatmul.mubr.msk.f32.gmra.mxu1 %vm3935_vm3, %v4352_v33 }
 0x46f   : > { %1515 = vst.msk [vmem:[#allocation6 + $0x8] sm:$0xff] %vm529_vm2, %v1420_v19 }
 0x470   : > { %v1418_v50 = vpop.permute.xlu1 %1417 }
 0x471   : > { %1514 = vst.msk [vmem:[#allocation6] sm:$0xff] %vm529_vm2, %v1418_v50 }
 0x472   : > { %v1424_v29 = vpop.permute.xlu0 %1423 }
 0x473   : > { %1517 = vst.msk [vmem:[#allocation6 + $0x18] sm:$0xff] %vm529_vm2, %v1424_v29 }
 0x474   : > { %v1422_v2 = vpop.permute.xlu1 %1421 }
 0x475   : > { %1516 = vst.msk [vmem:[#allocation6 + $0x10] sm:$0xff] %vm529_vm2, %v1422_v2 }
 0x476   : > { %v1428_v0 = vpop.permute.xlu0 %1427 }
 0x477   : > { %1519 = vst.msk [vmem:[#allocation6 + $0x28] sm:$0xff] %vm529_vm2, %v1428_v0 }
 0x478   : > { %v1426_v14 = vpop.permute.xlu1 %1425 }
 0x479   : > { %1518 = vst.msk [vmem:[#allocation6 + $0x20] sm:$0xff] %vm529_vm2, %v1426_v14 }
 0x47a   : > { %v1432_v13 = vpop.permute.xlu0 %1431 }
 0x47b   : > { %1521 = vst.msk [vmem:[#allocation6 + $0x38] sm:$0xff] %vm529_vm2, %v1432_v13 }
 0x47c   : > { %v1430_v8 = vpop.permute.xlu1 %1429 }
 0x47d   : > { %1520 = vst.msk [vmem:[#allocation6 + $0x30] sm:$0xff] %vm529_vm2, %v1430_v8 }
 0x47e   : > { %v1436_v42 = vpop.permute.xlu0 %1435 }
 0x47f   : > { %1523 = vst.msk [vmem:[#allocation6 + $0x48] sm:$0xff] %vm529_vm2, %v1436_v42 }
 0x480   : > { %v1434_v58 = vpop.permute.xlu1 %1433 }
 0x481   : > { %1522 = vst.msk [vmem:[#allocation6 + $0x40] sm:$0xff] %vm529_vm2, %v1434_v58 }
 0x482   : > { %v1440_v27 = vpop.permute.xlu0 %1439 }
 0x483   : > { %1525 = vst.msk [vmem:[#allocation6 + $0x58] sm:$0xff] %vm529_vm2, %v1440_v27 }
 0x484   : > { %v1438_v44 = vpop.permute.xlu1 %1437  ;;  %v6577_v49 = vpop.f32.mrf.mxu0 }
 0x485   : > { %1524 = vst.msk [vmem:[#allocation6 + $0x50] sm:$0xff] %vm529_vm2, %v1438_v44  ;;  %v3391_v28 = vmul.f32 %v6577_v49, %v9659_v45  ;;  %v9714_v49 = vld [vmem:[%s10355_s14] sm:$0xff] }
 0x486   : > { %v1444_v37 = vpop.permute.xlu0 %1443  ;;  %v3224_v6 = vpop.f32.mrf.mxu0 }
 0x487   : > { %1527 = vst.msk [vmem:[#allocation6 + $0x68] sm:$0xff] %vm529_vm2, %v1444_v37  ;;  %v3424_v43 = vmul.f32 1.442695, %v3391_v28  ;;  %v3390_v31 = vmul.f32 %v9659_v45, %v3224_v6  ;;  %v9672_v3 = vpop.f32.mrf.mxu1  ;;  %v9724_v28 = vld [vmem:[%s10355_s14 + $0x10] sm:$0xff] }
 0x488   : > { %v1442_v4 = vpop.permute.xlu1 %1441 }
 0x489   : > { %1526 = vst.msk [vmem:[#allocation6 + $0x60] sm:$0xff] %vm529_vm2, %v1442_v4  ;;  %7299 = vpow2.f32 %v3424_v43  ;;  %v3422_v62 = vmul.f32 1.442695, %v3390_v31  ;;  %v9678_v55 = vpop.f32.mrf.mxu1  ;;  %v9719_v4 = vld [vmem:[%s10355_s14 + $0x8] sm:$0xff]  ;;  %v9730_v31 = vld [vmem:[%s10355_s14 + $0x18] sm:$0xff] }
 0x48a   : > { %v1448_v11 = vpop.permute.xlu0 %1447 }
 0x48b   : > { %1529 = vst.msk [vmem:[#allocation6 + $0x78] sm:$0xff] %vm529_vm2, %v1448_v11  ;;  %7301 = vpow2.f32 %v3422_v62  ;;  %v9740_v62 = vld [vmem:[%s10355_s14 + $0x28] sm:$0xff] }
 0x48c   : > { %v1446_v51 = vpop.permute.xlu1 %1445 }
 0x48d   : > { %1528 = vst.msk [vmem:[#allocation6 + $0x70] sm:$0xff] %vm529_vm2, %v1446_v51  ;;  %v9735_v51 = vld [vmem:[%s10355_s14 + $0x20] sm:$0xff] }
 0x48e   : > { %v1452_v15 = vpop.permute.xlu0 %1451 }
 0x48f   : > { %1531 = vst.msk [vmem:[#allocation6 + $0x88] sm:$0xff] %vm529_vm2, %v1452_v15 }
 0x490   : > { %v1450_v38 = vpop.permute.xlu1 %1449 }
 0x491   : > { %1530 = vst.msk [vmem:[#allocation6 + $0x80] sm:$0xff] %vm529_vm2, %v1450_v38 }
 0x492   : > { %v1456_v41 = vpop.permute.xlu0 %1455 }
 0x493   : > { %1533 = vst.msk [vmem:[#allocation6 + $0x98] sm:$0xff] %vm529_vm2, %v1456_v41  ;;  %v9747_v41 = vld [vmem:[%s10355_s14 + $0x30] sm:$0xff] }
 0x494   : > { %v1454_v12 = vpop.permute.xlu1 %1453 }
 0x495   : > { %1532 = vst.msk [vmem:[#allocation6 + $0x90] sm:$0xff] %vm529_vm2, %v1454_v12  ;;  %v6580_v54 = vpop.f32.mrf.mxu0  ;;  %v9752_v12 = vld [vmem:[%s10355_s14 + $0x38] sm:$0xff] }
 0x496   : > { %v1460_v47 = vpop.permute.xlu0 %1459  ;;  %v3393_v39 = vmul.f32 %v6580_v54, %v9659_v45  ;;  %v7300_v7 = vpop.eup %7299 }
 0x497   : > { %1535 = vst.msk [vmem:[#allocation6 + $0xa8] sm:$0xff] %vm529_vm2, %v1460_v47  ;;  %v3234_v20 = vpop.f32.mrf.mxu0  ;;  %3487 = vst [vmem:[#allocation7 + $0x8] sm:$0xff] %v7300_v7  ;;  %v9757_v47 = vld [vmem:[%s10355_s14 + $0x40] sm:$0xff]  ;;  %v9763_v7 = vld [vmem:[%s10355_s14 + $0x48] sm:$0xff] }
 0x498   : > { %v1458_v24 = vpop.permute.xlu1 %1457  ;;  %v3428_v9 = vmul.f32 1.442695, %v3393_v39  ;;  %v3392_v40 = vmul.f32 %v9659_v45, %v3234_v20  ;;  %v7302_v56 = vpop.eup %7301  ;;  %v9768_v20 = vld [vmem:[%s10355_s14 + $0x50] sm:$0xff] }
 0x499   : > { %1534 = vst.msk [vmem:[#allocation6 + $0xa0] sm:$0xff] %vm529_vm2, %v1458_v24  ;;  %3486 = vst [vmem:[#allocation7] sm:$0xff] %v7302_v56  ;;  %v9681_v53 = vpop.f32.mrf.mxu1  ;;  %v9780_v56 = vld [vmem:[%s10355_s14 + $0x60] sm:$0xff] }
 0x49a   : > { %v1464_v63 = vpop.permute.xlu0 %1463  ;;  %7303 = vpow2.f32 %v3428_v9  ;;  %v3426_v26 = vmul.f32 1.442695, %v3392_v40 }
 0x49b   : > { %1537 = vst.msk [vmem:[#allocation6 + $0xb8] sm:$0xff] %vm529_vm2, %v1464_v63  ;;  %v9685_v52 = vpop.f32.mrf.mxu1  ;;  %v9773_v63 = vld [vmem:[%s10355_s14 + $0x58] sm:$0xff] }
 0x49c   : > { %v1462_v57 = vpop.permute.xlu1 %1461  ;;  %7305 = vpow2.f32 %v3426_v26  ;;  %v9790_v26 = vld [vmem:[%s10355_s14 + $0x70] sm:$0xff] }
 0x49d   : > { %1536 = vst.msk [vmem:[#allocation6 + $0xb0] sm:$0xff] %vm529_vm2, %v1462_v57  ;;  %v9785_v57 = vld [vmem:[%s10355_s14 + $0x68] sm:$0xff] }
 0x49e   : > { %v1468_v36 = vpop.permute.xlu0 %1467 }
 0x49f   : > { %1539 = vst.msk [vmem:[#allocation6 + $0xc8] sm:$0xff] %vm529_vm2, %v1468_v36  ;;  %v6583_v32 = vpop.f32.mrf.mxu0 }
 0x4a0   : > { %v1466_v25 = vpop.permute.xlu1 %1465  ;;  %v3395_v5 = vmul.f32 %v6583_v32, %v9659_v45  ;;  %v9796_v32 = vld [vmem:[%s10355_s14 + $0x78] sm:$0xff] }
 0x4a1   : > { %1538 = vst.msk [vmem:[#allocation6 + $0xc0] sm:$0xff] %vm529_vm2, %v1466_v25  ;;  %v3244_v21 = vpop.f32.mrf.mxu0  ;;  %v9690_v1 = vpop.f32.mrf.mxu1 }
 0x4a2   : > { %v1472_v59 = vpop.permute.xlu0 %1471  ;;  %v3432_v16 = vmul.f32 1.442695, %v3395_v5  ;;  %v3394_v22 = vmul.f32 %v9659_v45, %v3244_v21 }
 0x4a3   : > { %1541 = vst.msk [vmem:[#allocation6 + $0xd8] sm:$0xff] %vm529_vm2, %v1472_v59  ;;  %v9694_v61 = vpop.f32.mrf.mxu1 }
 0x4a4   : > { %v1470_v46 = vpop.permute.xlu1 %1469  ;;  %7307 = vpow2.f32 %v3432_v16  ;;  %v3430_v23 = vmul.f32 1.442695, %v3394_v22 }
 0x4a5   : > { %1540 = vst.msk [vmem:[#allocation6 + $0xd0] sm:$0xff] %vm529_vm2, %v1470_v46 }
 0x4a6   : > { %v1476_v18 = vpop.permute.xlu0 %1475  ;;  %7309 = vpow2.f32 %v3430_v23 }
 0x4a7   : > { %1543 = vst.msk [vmem:[#allocation6 + $0xe8] sm:$0xff] %vm529_vm2, %v1476_v18  ;;  %v6586_v30 = vpop.f32.mrf.mxu0  ;;  %v7304_v48 = vpop.eup %7303 }
 0x4a8   : > { %v1474_v35 = vpop.permute.xlu1 %1473  ;;  %v3397_v34 = vmul.f32 %v6586_v30, %v9659_v45  ;;  %3489 = vst [vmem:[#allocation7 + $0x18] sm:$0xff] %v7304_v48 }
 0x4a9   : > { %1542 = vst.msk [vmem:[#allocation6 + $0xe0] sm:$0xff] %vm529_vm2, %v1474_v35  ;;  %v3254_v17 = vpop.f32.mrf.mxu0  ;;  %v9698_v10 = vpop.f32.mrf.mxu1 }
 0x4aa   : > { %v1480_v33 = vpop.permute.xlu0 %1479  ;;  %v3436_v60 = vmul.f32 1.442695, %v3397_v34  ;;  %v3396_v19 = vmul.f32 %v9659_v45, %v3254_v17  ;;  %v7306_v50 = vpop.eup %7305 }
 0x4ab   : > { %1545 = vst.msk [vmem:[#allocation6 + $0xf8] sm:$0xff] %vm529_vm2, %v1480_v33  ;;  %v9702_v29 = vpop.f32.mrf.mxu1  ;;  %3488 = vst [vmem:[#allocation7 + $0x10] sm:$0xff] %v7306_v50 }
 0x4ac   : > { %v1478_v2 = vpop.permute.xlu1 %1477  ;;  %7311 = vpow2.f32 %v3436_v60  ;;  %v3434_v0 = vmul.f32 1.442695, %v3396_v19 }
 0x4ad   : > { %1544 = vst.msk [vmem:[#allocation6 + $0xf0] sm:$0xff] %vm529_vm2, %v1478_v2  ;;  %v6589_v14 = vpop.f32.mrf.mxu0 }
 0x4ae   : > { %7313 = vpow2.f32 %v3434_v0  ;;  %v3399_v13 = vmul.f32 %v6589_v14, %v9659_v45 }
 0x4af   : > { %v3264_v8 = vpop.f32.mrf.mxu0  ;;  %v9706_v42 = vpop.f32.mrf.mxu1 }
 0x4b0   : > { %v3440_v58 = vmul.f32 1.442695, %v3399_v13  ;;  %v3398_v27 = vmul.f32 %v9659_v45, %v3264_v8 }
 0x4b1   : > { %v6592_v44 = vpop.f32.mrf.mxu0  ;;  %v9709_v37 = vpop.f32.mrf.mxu1 }
 0x4b2   : > { %v7308_v6 = vpop.eup %7307  ;;  %7315 = vpow2.f32 %v3440_v58  ;;  %v3438_v11 = vmul.f32 1.442695, %v3398_v27  ;;  %v3401_v43 = vmul.f32 %v6592_v44, %v9659_v45 }
 0x4b3   : > { %3491 = vst [vmem:[#allocation7 + $0x28] sm:$0xff] %v7308_v6  ;;  %v3274_v15 = vpop.f32.mrf.mxu0  ;;  %v9742_v38 = vpop.f32.mrf.mxu1 }
 0x4b4   : > { %v7310_v54 = vpop.eup %7309  ;;  %7317 = vpow2.f32 %v3438_v11  ;;  %v3444_v24 = vmul.f32 1.442695, %v3401_v43  ;;  %v3400_v39 = vmul.f32 %v9659_v45, %v3274_v15 }
 0x4b5   : > { %3490 = vst [vmem:[#allocation7 + $0x20] sm:$0xff] %v7310_v54  ;;  %v6595_v9 = vpop.f32.mrf.mxu0  ;;  %v9775_v40 = vpop.f32.mrf.mxu1 }
 0x4b6   : > { %7319 = vpow2.f32 %v3444_v24  ;;  %v3442_v36 = vmul.f32 1.442695, %v3400_v39  ;;  %v3403_v25 = vmul.f32 %v6595_v9, %v9659_v45 }
 0x4b7   : > { %v3284_v5 = vpop.f32.mrf.mxu0  ;;  %v9798_v59 = vpop.f32.mrf.mxu1 }
 0x4b8   : > { %7321 = vpow2.f32 %v3442_v36  ;;  %v3448_v21 = vmul.f32 1.442695, %v3403_v25  ;;  %v3402_v16 = vmul.f32 %v9659_v45, %v3284_v5 }
 0x4b9   : > { %v7312_v22 = vpop.eup %7311  ;;  %v6598_v46 = vpop.f32.mrf.mxu0 }
 0x4ba   : > { %v9801_v23 = vpop.f32.mrf.mxu1  ;;  %3493 = vst [vmem:[#allocation7 + $0x38] sm:$0xff] %v7312_v22  ;;  %7323 = vpow2.f32 %v3448_v21  ;;  %v3446_v18 = vmul.f32 1.442695, %v3402_v16  ;;  %v3405_v30 = vmul.f32 %v6598_v46, %v9659_v45 }
 0x4bb   : > { %v7314_v35 = vpop.eup %7313  ;;  %v3294_v34 = vpop.f32.mrf.mxu0 }
 0x4bc   : > { %v9804_v48 = vpop.f32.mrf.mxu1  ;;  %3492 = vst [vmem:[#allocation7 + $0x30] sm:$0xff] %v7314_v35  ;;  %7325 = vpow2.f32 %v3446_v18  ;;  %v3452_v17 = vmul.f32 1.442695, %v3405_v30  ;;  %v3404_v33 = vmul.f32 %v9659_v45, %v3294_v34 }
 0x4be   : > { %v9807_v60 = vpop.f32.mrf.mxu1  ;;  %7327 = vpow2.f32 %v3452_v17  ;;  %v3450_v19 = vmul.f32 1.442695, %v3404_v33  ;;  %v6601_v2 = vpop.f32.mrf.mxu0 }
 0x4bf   : > { %v7316_v50 = vpop.eup %7315  ;;  %v3407_v0 = vmul.f32 %v6601_v2, %v9659_v45 }
 0x4c0   : > { %3495 = vst [vmem:[#allocation7 + $0x48] sm:$0xff] %v7316_v50  ;;  %7329 = vpow2.f32 %v3450_v19  ;;  %v3304_v13 = vpop.f32.mrf.mxu0 }
 0x4c1   : > { %v7318_v14 = vpop.eup %7317  ;;  %v9810_v8 = vpop.f32.mrf.mxu1  ;;  %v3456_v58 = vmul.f32 1.442695, %v3407_v0  ;;  %v3406_v27 = vmul.f32 %v9659_v45, %v3304_v13 }
 0x4c2   : > { %3494 = vst [vmem:[#allocation7 + $0x40] sm:$0xff] %v7318_v14  ;;  %v6604_v6 = vpop.f32.mrf.mxu0 }
 0x4c3   : > { %v7320_v44 = vpop.eup %7319  ;;  %v9813_v11 = vpop.f32.mrf.mxu1  ;;  %7331 = vpow2.f32 %v3456_v58  ;;  %v3454_v43 = vmul.f32 1.442695, %v3406_v27  ;;  %v3409_v15 = vmul.f32 %v6604_v6, %v9659_v45 }
 0x4c4   : > { %3497 = vst [vmem:[#allocation7 + $0x58] sm:$0xff] %v7320_v44  ;;  %v3314_v24 = vpop.f32.mrf.mxu0 }
 0x4c5   : > { %v7322_v54 = vpop.eup %7321  ;;  %v9816_v39 = vpop.f32.mrf.mxu1  ;;  %7333 = vpow2.f32 %v3454_v43  ;;  %v3460_v9 = vmul.f32 1.442695, %v3409_v15  ;;  %v3408_v36 = vmul.f32 %v9659_v45, %v3314_v24 }
 0x4c6   : > { %3496 = vst [vmem:[#allocation7 + $0x50] sm:$0xff] %v7322_v54 }
 0x4c7   : > { %v7324_v25 = vpop.eup %7323  ;;  %v6607_v5 = vpop.f32.mrf.mxu0  ;;  %7335 = vpow2.f32 %v3460_v9  ;;  %v3458_v16 = vmul.f32 1.442695, %v3408_v36 }
 0x4c8   : > { %v9819_v21 = vpop.f32.mrf.mxu1  ;;  %3499 = vst [vmem:[#allocation7 + $0x68] sm:$0xff] %v7324_v25  ;;  %v3411_v22 = vmul.f32 %v6607_v5, %v9659_v45 }
 0x4c9   : > { %v7326_v46 = vpop.eup %7325  ;;  %v3324_v18 = vpop.f32.mrf.mxu0  ;;  %7337 = vpow2.f32 %v3458_v16 }
 0x4ca   : > { %v9822_v30 = vpop.f32.mrf.mxu1  ;;  %3498 = vst [vmem:[#allocation7 + $0x60] sm:$0xff] %v7326_v46  ;;  %v3464_v35 = vmul.f32 1.442695, %v3411_v22  ;;  %v3410_v34 = vmul.f32 %v9659_v45, %v3324_v18 }
 0x4cb   : > { %v7328_v17 = vpop.eup %7327  ;;  %v6610_v50 = vpop.f32.mrf.mxu0 }
 0x4cc   : > { %v9825_v33 = vpop.f32.mrf.mxu1  ;;  %3501 = vst [vmem:[#allocation7 + $0x78] sm:$0xff] %v7328_v17  ;;  %7339 = vpow2.f32 %v3464_v35  ;;  %v3462_v19 = vmul.f32 1.442695, %v3410_v34  ;;  %v3413_v0 = vmul.f32 %v6610_v50, %v9659_v45 }
 0x4cd   : > { %v7330_v2 = vpop.eup %7329  ;;  %v3334_v14 = vpop.f32.mrf.mxu0 }
 0x4ce   : > { %3500 = vst [vmem:[#allocation7 + $0x70] sm:$0xff] %v7330_v2  ;;  %7341 = vpow2.f32 %v3462_v19  ;;  %v9828_v13 = vpop.f32.mrf.mxu1  ;;  %v3468_v58 = vmul.f32 1.442695, %v3413_v0  ;;  %v3412_v27 = vmul.f32 %v9659_v45, %v3334_v14 }
 0x4d0   : > { %v7332_v44 = vpop.eup %7331  ;;  %7343 = vpow2.f32 %v3468_v58  ;;  %v3466_v6 = vmul.f32 1.442695, %v3412_v27  ;;  %v9831_v43 = vpop.f32.mrf.mxu1 }
 0x4d1   : > { %3503 = vst [vmem:[#allocation7 + $0x88] sm:$0xff] %v7332_v44 }
 0x4d2   : > { %v7334_v15 = vpop.eup %7333  ;;  %7345 = vpow2.f32 %v3466_v6  ;;  %v6613_v54 = vpop.f32.mrf.mxu0 }
 0x4d3   : > { %3502 = vst [vmem:[#allocation7 + $0x80] sm:$0xff] %v7334_v15  ;;  %v3415_v24 = vmul.f32 %v6613_v54, %v9659_v45 }
 0x4d4   : > { %v7336_v9 = vpop.eup %7335  ;;  %v3344_v36 = vpop.f32.mrf.mxu0 }
 0x4d5   : > { %v9834_v25 = vpop.f32.mrf.mxu1  ;;  %3505 = vst [vmem:[#allocation7 + $0x98] sm:$0xff] %v7336_v9  ;;  %v3472_v5 = vmul.f32 1.442695, %v3415_v24  ;;  %v3414_v16 = vmul.f32 %v9659_v45, %v3344_v36 }
 0x4d6   : > { %v7338_v22 = vpop.eup %7337 }
 0x4d7   : > { %3504 = vst [vmem:[#allocation7 + $0x90] sm:$0xff] %v7338_v22  ;;  %7347 = vpow2.f32 %v3472_v5  ;;  %v3470_v46 = vmul.f32 1.442695, %v3414_v16  ;;  %v9837_v18 = vpop.f32.mrf.mxu1 }
 0x4d9   : > { %v7340_v35 = vpop.eup %7339  ;;  %7349 = vpow2.f32 %v3470_v46  ;;  %v6616_v34 = vpop.f32.mrf.mxu0 }
 0x4da   : > { %3507 = vst [vmem:[#allocation7 + $0xa8] sm:$0xff] %v7340_v35  ;;  %v3417_v19 = vmul.f32 %v6616_v34, %v9659_v45 }
 0x4db   : > { %v7342_v17 = vpop.eup %7341  ;;  %v3354_v50 = vpop.f32.mrf.mxu0 }
 0x4dc   : > { %3506 = vst [vmem:[#allocation7 + $0xa0] sm:$0xff] %v7342_v17  ;;  %v9840_v2 = vpop.f32.mrf.mxu1  ;;  %v3476_v0 = vmul.f32 1.442695, %v3417_v19  ;;  %v3416_v14 = vmul.f32 %v9659_v45, %v3354_v50 }
 0x4dd   : > { %v7344_v58 = vpop.eup %7343 }
 0x4de   : > { %3509 = vst [vmem:[#allocation7 + $0xb8] sm:$0xff] %v7344_v58  ;;  %7351 = vpow2.f32 %v3476_v0  ;;  %v3474_v27 = vmul.f32 1.442695, %v3416_v14  ;;  %v9843_v44 = vpop.f32.mrf.mxu1 }
 0x4df   : > { %v7346_v6 = vpop.eup %7345 }
 0x4e0   : > { %3508 = vst [vmem:[#allocation7 + $0xb0] sm:$0xff] %v7346_v6  ;;  %7353 = vpow2.f32 %v3474_v27 }
 0x4e1   : > { %v6619_v15 = vpop.f32.mrf.mxu0 }
 0x4e2   : > { %v3419_v54 = vmul.f32 %v6619_v15, %v9659_v45 }
 0x4e3   : > { %v3364_v24 = vpop.f32.mrf.mxu0  ;;  %v9846_v9 = vpop.f32.mrf.mxu1 }
 0x4e4   : > { %v3480_v36 = vmul.f32 1.442695, %v3419_v54  ;;  %v3418_v5 = vmul.f32 %v9659_v45, %v3364_v24  ;;  %v7348_v16 = vpop.eup %7347 }
 0x4e5   : > { %v9849_v22 = vpop.f32.mrf.mxu1  ;;  %3511 = vst [vmem:[#allocation7 + $0xc8] sm:$0xff] %v7348_v16 }
 0x4e6   : > { %7355 = vpow2.f32 %v3480_v36  ;;  %v3478_v46 = vmul.f32 1.442695, %v3418_v5  ;;  %v6622_v35 = vpop.f32.mrf.mxu0  ;;  %v7350_v34 = vpop.eup %7349 }
 0x4e7   : > { %v3421_v17 = vmul.f32 %v6622_v35, %v9659_v45  ;;  %3510 = vst [vmem:[#allocation7 + $0xc0] sm:$0xff] %v7350_v34 }
 0x4e8   : > { %7357 = vpow2.f32 %v3478_v46  ;;  %v3374_v19 = vpop.f32.mrf.mxu0  ;;  %v9852_v50 = vpop.f32.mrf.mxu1 }
 0x4e9   : > { %v3484_v0 = vmul.f32 1.442695, %v3421_v17  ;;  %v3420_v14 = vmul.f32 %v9659_v45, %v3374_v19 }
 0x4ea   : > { %v9855_v58 = vpop.f32.mrf.mxu1  ;;  %v6679_v27 = vpop.f32.mrf.mxu0 }
 0x4eb   : > { %7359 = vpow2.f32 %v3484_v0  ;;  %v3482_v6 = vmul.f32 1.442695, %v3420_v14  ;;  %v4226_v15 = vmul.f32 %v6679_v27, %v9672_v3  ;;  %v7352_v54 = vpop.eup %7351 }
 0x4ec   : > { %v4066_v24 = vpop.f32.mrf.mxu0  ;;  %v6731_v36 = vpop.f32.mrf.mxu1  ;;  %3513 = vst [vmem:[#allocation7 + $0xd8] sm:$0xff] %v7352_v54 }
 0x4ed   : > { %7361 = vpow2.f32 %v3482_v6  ;;  %4258 = vst [vmem:[#allocation8 + $0x8] sm:$0xff] %v4226_v15  ;;  %v4225_v5 = vmul.f32 %v4066_v24, %v9678_v55  ;;  %4643 = vst [vmem:[#allocation9 + $0x8] sm:$0xff] %v6731_v36  ;;  %v7354_v16 = vpop.eup %7353 }
 0x4ee   : > { %v6682_v46 = vpop.f32.mrf.mxu0  ;;  %v4483_v35 = vpop.f32.mrf.mxu1  ;;  %3512 = vst [vmem:[#allocation7 + $0xd0] sm:$0xff] %v7354_v16 }
 0x4ef   : > { %4257 = vst [vmem:[#allocation8] sm:$0xff] %v4225_v5  ;;  %v4228_v45 = vmul.f32 %v6682_v46, %v9681_v53  ;;  %4642 = vst [vmem:[#allocation9] sm:$0xff] %v4483_v35 }
 0x4f0   : > { %v4076_v34 = vpop.f32.mrf.mxu0  ;;  %v6734_v17 = vpop.f32.mrf.mxu1 }
 0x4f1   : > { %4260 = vst [vmem:[#allocation8 + $0x18] sm:$0xff] %v4228_v45  ;;  %v4227_v3 = vmul.f32 %v4076_v34, %v9685_v52  ;;  %4645 = vst [vmem:[#allocation9 + $0x18] sm:$0xff] %v6734_v17 }
 0x4f2   : > { %v6685_v19 = vpop.f32.mrf.mxu0  ;;  %v4493_v0 = vpop.f32.mrf.mxu1 }
 0x4f3   : > { %v7356_v14 = vpop.eup %7355  ;;  %4259 = vst [vmem:[#allocation8 + $0x10] sm:$0xff] %v4227_v3  ;;  %v4230_v55 = vmul.f32 %v6685_v19, %v9690_v1  ;;  %4644 = vst [vmem:[#allocation9 + $0x10] sm:$0xff] %v4493_v0 }
 0x4f4   : > { %3515 = vst [vmem:[#allocation7 + $0xe8] sm:$0xff] %v7356_v14  ;;  %v4086_v27 = vpop.f32.mrf.mxu0  ;;  %v6737_v6 = vpop.f32.mrf.mxu1 }
 0x4f5   : > { %v7358_v15 = vpop.eup %7357  ;;  %4262 = vst [vmem:[#allocation8 + $0x28] sm:$0xff] %v4230_v55  ;;  %v4229_v53 = vmul.f32 %v4086_v27, %v9694_v61  ;;  %4647 = vst [vmem:[#allocation9 + $0x28] sm:$0xff] %v6737_v6 }
 0x4f6   : > { %3514 = vst [vmem:[#allocation7 + $0xe0] sm:$0xff] %v7358_v15  ;;  %v6688_v54 = vpop.f32.mrf.mxu0  ;;  %v4503_v24 = vpop.f32.mrf.mxu1 }
 0x4f7   : > { %4261 = vst [vmem:[#allocation8 + $0x20] sm:$0xff] %v4229_v53  ;;  %v4232_v52 = vmul.f32 %v6688_v54, %v9698_v10  ;;  %4646 = vst [vmem:[#allocation9 + $0x20] sm:$0xff] %v4503_v24 }
 0x4f8   : > { %v7360_v36 = vpop.eup %7359  ;;  %v4096_v5 = vpop.f32.mrf.mxu0 }
 0x4f9   : > { %v6740_v16 = vpop.f32.mrf.mxu1  ;;  %3517 = vst [vmem:[#allocation7 + $0xf8] sm:$0xff] %v7360_v36  ;;  %4264 = vst [vmem:[#allocation8 + $0x38] sm:$0xff] %v4232_v52  ;;  %v4231_v1 = vmul.f32 %v4096_v5, %v9702_v29 }
 0x4fa   : > { %4649 = vst [vmem:[#allocation9 + $0x38] sm:$0xff] %v6740_v16  ;;  %v7362_v46 = vpop.eup %7361  ;;  %v6691_v35 = vpop.f32.mrf.mxu0 }
 0x4fb   : > { %v4513_v45 = vpop.f32.mrf.mxu1  ;;  %3516 = vst [vmem:[#allocation7 + $0xf0] sm:$0xff] %v7362_v46  ;;  %4263 = vst [vmem:[#allocation8 + $0x30] sm:$0xff] %v4231_v1  ;;  %v4234_v61 = vmul.f32 %v6691_v35, %v9706_v42 }
 0x4fc   : > { %4648 = vst [vmem:[#allocation9 + $0x30] sm:$0xff] %v4513_v45  ;;  %v4106_v34 = vpop.f32.mrf.mxu0 }
 0x4fd   : > { %v6743_v17 = vpop.f32.mrf.mxu1  ;;  %4266 = vst [vmem:[#allocation8 + $0x48] sm:$0xff] %v4234_v61  ;;  %v4233_v10 = vmul.f32 %v4106_v34, %v9709_v37 }
 0x4fe   : > { %4651 = vst [vmem:[#allocation9 + $0x48] sm:$0xff] %v6743_v17  ;;  %v6694_v3 = vpop.f32.mrf.mxu0 }
 0x4ff   : > { %v4523_v19 = vpop.f32.mrf.mxu1  ;;  %4265 = vst [vmem:[#allocation8 + $0x40] sm:$0xff] %v4233_v10  ;;  %v4236_v29 = vmul.f32 %v6694_v3, %v9742_v38 }
 0x500   : > { %4650 = vst [vmem:[#allocation9 + $0x40] sm:$0xff] %v4523_v19  ;;  %v4116_v0 = vpop.f32.mrf.mxu0 }
 0x501   : > { %v6746_v14 = vpop.f32.mrf.mxu1  ;;  %4268 = vst [vmem:[#allocation8 + $0x58] sm:$0xff] %v4236_v29  ;;  %v4235_v55 = vmul.f32 %v4116_v0, %v9775_v40 }
 0x502   : > { %4653 = vst [vmem:[#allocation9 + $0x58] sm:$0xff] %v6746_v14  ;;  %v6697_v42 = vpop.f32.mrf.mxu0 }
 0x503   : > { %v4533_v27 = vpop.f32.mrf.mxu1  ;;  %4267 = vst [vmem:[#allocation8 + $0x50] sm:$0xff] %v4235_v55  ;;  %v4238_v6 = vmul.f32 %v6697_v42, %v9798_v59 }
 0x504   : > { %4652 = vst [vmem:[#allocation9 + $0x50] sm:$0xff] %v4533_v27  ;;  %v4126_v37 = vpop.f32.mrf.mxu0 }
 0x505   : > { %v6749_v15 = vpop.f32.mrf.mxu1  ;;  %4270 = vst [vmem:[#allocation8 + $0x68] sm:$0xff] %v4238_v6  ;;  %v4237_v53 = vmul.f32 %v4126_v37, %v9801_v23 }
 0x506   : > { %4655 = vst [vmem:[#allocation9 + $0x68] sm:$0xff] %v6749_v15  ;;  %v6700_v38 = vpop.f32.mrf.mxu0 }
 0x507   : > { %v4543_v54 = vpop.f32.mrf.mxu1  ;;  %4269 = vst [vmem:[#allocation8 + $0x60] sm:$0xff] %v4237_v53  ;;  %v4240_v24 = vmul.f32 %v6700_v38, %v9804_v48 }
 0x508   : > { %4654 = vst [vmem:[#allocation9 + $0x60] sm:$0xff] %v4543_v54  ;;  %v4136_v40 = vpop.f32.mrf.mxu0 }
 0x509   : > { %v6752_v52 = vpop.f32.mrf.mxu1  ;;  %4272 = vst [vmem:[#allocation8 + $0x78] sm:$0xff] %v4240_v24  ;;  %v4239_v36 = vmul.f32 %v4136_v40, %v9807_v60 }
 0x50a   : > { %4657 = vst [vmem:[#allocation9 + $0x78] sm:$0xff] %v6752_v52  ;;  %v6703_v59 = vpop.f32.mrf.mxu0 }
 0x50b   : > { %v4553_v5 = vpop.f32.mrf.mxu1  ;;  %4271 = vst [vmem:[#allocation8 + $0x70] sm:$0xff] %v4239_v36  ;;  %v4242_v16 = vmul.f32 %v6703_v59, %v9810_v8 }
 0x50c   : > { %4656 = vst [vmem:[#allocation9 + $0x70] sm:$0xff] %v4553_v5  ;;  %v4146_v23 = vpop.f32.mrf.mxu0 }
 0x50d   : > { %v6755_v1 = vpop.f32.mrf.mxu1  ;;  %4274 = vst [vmem:[#allocation8 + $0x88] sm:$0xff] %v4242_v16  ;;  %v4241_v46 = vmul.f32 %v4146_v23, %v9813_v11 }
 0x50e   : > { %4659 = vst [vmem:[#allocation9 + $0x88] sm:$0xff] %v6755_v1  ;;  %v6706_v48 = vpop.f32.mrf.mxu0 }
 0x50f   : > { %v4563_v35 = vpop.f32.mrf.mxu1  ;;  %4273 = vst [vmem:[#allocation8 + $0x80] sm:$0xff] %v4241_v46  ;;  %v4244_v45 = vmul.f32 %v6706_v48, %v9816_v39 }
 0x510   : > { %4658 = vst [vmem:[#allocation9 + $0x80] sm:$0xff] %v4563_v35  ;;  %v4156_v60 = vpop.f32.mrf.mxu0 }
 0x511   : > { %v6758_v61 = vpop.f32.mrf.mxu1  ;;  %4276 = vst [vmem:[#allocation8 + $0x98] sm:$0xff] %v4244_v45  ;;  %v4243_v34 = vmul.f32 %v4156_v60, %v9819_v21 }
 0x512   : > { %4661 = vst [vmem:[#allocation9 + $0x98] sm:$0xff] %v6758_v61  ;;  %v6709_v8 = vpop.f32.mrf.mxu0 }
 0x513   : > { %v4573_v17 = vpop.f32.mrf.mxu1  ;;  %4275 = vst [vmem:[#allocation8 + $0x90] sm:$0xff] %v4243_v34  ;;  %v4246_v10 = vmul.f32 %v6709_v8, %v9822_v30 }
 0x514   : > { %4660 = vst [vmem:[#allocation9 + $0x90] sm:$0xff] %v4573_v17  ;;  %v4166_v11 = vpop.f32.mrf.mxu0 }
 0x515   : > { %v6761_v3 = vpop.f32.mrf.mxu1  ;;  %4278 = vst [vmem:[#allocation8 + $0xa8] sm:$0xff] %v4246_v10  ;;  %v4245_v19 = vmul.f32 %v4166_v11, %v9825_v33 }
 0x516   : > { %4663 = vst [vmem:[#allocation9 + $0xa8] sm:$0xff] %v6761_v3  ;;  %v6712_v39 = vpop.f32.mrf.mxu0 }
 0x517   : > { %v4583_v29 = vpop.f32.mrf.mxu1  ;;  %4277 = vst [vmem:[#allocation8 + $0xa0] sm:$0xff] %v4245_v19  ;;  %v4248_v0 = vmul.f32 %v6712_v39, %v9828_v13 }
 0x518   : > { %4662 = vst [vmem:[#allocation9 + $0xa0] sm:$0xff] %v4583_v29  ;;  %v4176_v21 = vpop.f32.mrf.mxu0 }
 0x519   : > { %v6764_v14 = vpop.f32.mrf.mxu1  ;;  %4280 = vst [vmem:[#allocation8 + $0xb8] sm:$0xff] %v4248_v0  ;;  %v4247_v55 = vmul.f32 %v4176_v21, %v9831_v43 }
 0x51a   : > { %4665 = vst [vmem:[#allocation9 + $0xb8] sm:$0xff] %v6764_v14  ;;  %v6715_v30 = vpop.f32.mrf.mxu0 }
 0x51b   : > { %v4593_v42 = vpop.f32.mrf.mxu1  ;;  %4279 = vst [vmem:[#allocation8 + $0xb0] sm:$0xff] %v4247_v55  ;;  %v4250_v27 = vmul.f32 %v6715_v30, %v9834_v25 }
 0x51c   : > { %4664 = vst [vmem:[#allocation9 + $0xb0] sm:$0xff] %v4593_v42  ;;  %v4186_v33 = vpop.f32.mrf.mxu0 }
 0x51d   : > { %v6767_v6 = vpop.f32.mrf.mxu1  ;;  %4282 = vst [vmem:[#allocation8 + $0xc8] sm:$0xff] %v4250_v27  ;;  %v4249_v37 = vmul.f32 %v4186_v33, %v9837_v18 }
 0x51e   : > { %4667 = vst [vmem:[#allocation9 + $0xc8] sm:$0xff] %v6767_v6  ;;  %v6718_v13 = vpop.f32.mrf.mxu0 }
 0x51f   : > { %v4603_v15 = vpop.f32.mrf.mxu1  ;;  %4281 = vst [vmem:[#allocation8 + $0xc0] sm:$0xff] %v4249_v37  ;;  %v4252_v53 = vmul.f32 %v6718_v13, %v9840_v2 }
 0x520   : > { %4666 = vst [vmem:[#allocation9 + $0xc0] sm:$0xff] %v4603_v15  ;;  %v4196_v43 = vpop.f32.mrf.mxu0 }
 0x521   : > { %v6770_v38 = vpop.f32.mrf.mxu1  ;;  %4284 = vst [vmem:[#allocation8 + $0xd8] sm:$0xff] %v4252_v53  ;;  %v4251_v54 = vmul.f32 %v4196_v43, %v9843_v44 }
 0x522   : > { %4669 = vst [vmem:[#allocation9 + $0xd8] sm:$0xff] %v6770_v38  ;;  %v6721_v25 = vpop.f32.mrf.mxu0 }
 0x523   : > { %v4613_v24 = vpop.f32.mrf.mxu1  ;;  %4283 = vst [vmem:[#allocation8 + $0xd0] sm:$0xff] %v4251_v54  ;;  %v4254_v40 = vmul.f32 %v6721_v25, %v9846_v9 }
 0x524   : > { %4668 = vst [vmem:[#allocation9 + $0xd0] sm:$0xff] %v4613_v24  ;;  %v4206_v18 = vpop.f32.mrf.mxu0 }
 0x525   : > { %4286 = vst [vmem:[#allocation8 + $0xe8] sm:$0xff] %v4254_v40  ;;  %v4253_v52 = vmul.f32 %v4206_v18, %v9849_v22  ;;  %v10524_v22 = vld [vmem:[#allocation15_spill] sm:$0xff] }
 0x526   : > { %v6773_v36 = vpop.f32.mrf.mxu1 }
 0x527   : > { %4285 = vst [vmem:[#allocation8 + $0xe0] sm:$0xff] %v4253_v52  ;;  %4671 = vst [vmem:[#allocation9 + $0xe8] sm:$0xff] %v6773_v36 }
 0x528   : > { %v4623_v2 = vpop.f32.mrf.mxu1 }
 0x529   : > { %4670 = vst [vmem:[#allocation9 + $0xe0] sm:$0xff] %v4623_v2 }
 0x52a   : > { %v6724_v59 = vpop.f32.mrf.mxu0 }
 0x52b   : > { %v4256_v44 = vmul.f32 %v6724_v59, %v9852_v50 }
 0x52c   : > { %v4216_v5 = vpop.f32.mrf.mxu0 }
 0x52d   : > { %4288 = vst [vmem:[#allocation8 + $0xf8] sm:$0xff] %v4256_v44  ;;  %v4255_v16 = vmul.f32 %v4216_v5, %v9855_v58 }
 0x52e   : > { %v6776_v23 = vpop.f32.mrf.mxu1 }
 0x52f   : > { %4287 = vst [vmem:[#allocation8 + $0xf0] sm:$0xff] %v4255_v16  ;;  %4673 = vst [vmem:[#allocation9 + $0xf8] sm:$0xff] %v6776_v23 }
 0x530   : > { %v4633_v9 = vpop.f32.mrf.mxu1 }
 0x531   : > { %4672 = vst [vmem:[#allocation9 + $0xf0] sm:$0xff] %v4633_v9 }
 0x532 LB: >> { %v7599_v50 = vmov 0.0   ;;  %s9904_s27 = sshll.u32 %s7592_s18, 4  ;;  %vm7600_vm4 = vmmov 0   ;;  %vm4740_vm5 = vcmask 1040384   ;;  %vm4742_vm6 = vcmask 1041408   ;;  %s4696_s18 = sadd.s32 1, %s7592_s18   ;;  %s7592_s18 = sphi %s9893_s18, %s4696_s18   ;;  %v7588_v22 = vphi %v10524_v22, %v10525_v22  }
 0x533   : >> { %6777 = vmatprep.subr.mxu0 %v7599_v50  ;;  %6812 = vmatprep.subr.mxu1 %v7599_v50  ;;  %s4699_s24 = scalar_lea.vmem [#allocation7], %s9904_s27  ;;  %s4701_s25 = scalar_lea.vmem [#allocation8], %s9904_s27  ;;  %vm4744_vm7 = vcmask 1042432   ;;  %vm4747_vm8 = vcmask 1044480   ;;  %vm4749_vm9 = vcmask 1045504   ;;  %vm4751_vm10 = vcmask 1046528  }
 0x534   : >> { %6778 = vmatpush3.msra.mxu0 %v9796_v32  ;;  %6813 = vmatpush3.msra.mxu1 %v9796_v32  ;;  %v9913_v58 = vld [vmem:[%s4699_s24] sm:$0xff]  ;;  %s4753_s0 = scalar_lea.vmem [#allocation9], %s9904_s27  ;;  %v6155_v54 = vld [vmem:[%s4699_s24 + $0x8] sm:$0xff]  ;;  %s4826_s1 = scalar_lea.vmem [#allocation4], %s9904_s27 }
 0x535   : >> { %6779 = vmatprep.subr.mxu0 %v7599_v50  ;;  %6814 = vmatprep.subr.mxu1 %v7599_v50  ;;  %v4703_v46 = vmul.f32 %v7588_v22, %v9913_v58  ;;  %p4693_p12 = scmp.ge.s32.totalorder %s4696_s18, 16  }
 0x536   : >> { %6780 = vmatpush3.msra.mxu0 %v9790_v26  ;;  %6815 = vmatpush3.msra.mxu1 %v9790_v26  ;;  %v9918_v1 = vld [vmem:[%s4701_s25] sm:$0xff]  ;;  %v6157_v18 = vld [vmem:[%s4701_s25 + $0x8] sm:$0xff]  ;;  %s5842_s25 = sshll.u32 (%p4693_p12), %s512_s29, 4  ;;  %s10526_s24 = sand.u32 (%p4693_p12), 1, %s7568_s19   ;;  %s5843_s25 = int_to_ptr.vmem [resolvable:$true] %s5842_s25 }
 0x537   : >> { %6781 = vmatprep.subr.mxu0 %v7599_v50  ;;  %6816 = vmatprep.subr.mxu1 %v7599_v50  ;;  %v9928_v48 = vadd.f32 %v4703_v46, %v9918_v1  ;;  %v10055_v26 = vld [vmem:[#allocation6 + $0x20] sm:$0xff] (%p4693_p12)  ;;  %s5826_s18 = scalar_lea.sflag (%p4693_p12), [#allocation11], %s10526_s24  ;;  %s7500_s27 = scalar_lea.vmem (%p4693_p12), %s5843_s25, 128 }
 0x538   : >> { %6782 = vmatpush3.msra.mxu0 %v9785_v57  ;;  %6817 = vmatpush3.msra.mxu1 %v9785_v57  ;;  %v4754_v38 = vld [vmem:[%s4753_s0] sm:$0xff]  ;;  %p7501_p13 = scmp.ne.s32.totalorder (%p4693_p12), %s5843_s25, %s7500_s27  ;;  %s7601_s3 = smov (%p4693_p12), [#allocation10]  }
 0x539   : >> { %6783 = vmatprep.subr.mxu0 %v7599_v50  ;;  %6818 = vmatprep.subr.mxu1 %v7599_v50  ;;  %v4706_v35 = vrot.slane %v9928_v48, 7 }
 0x53a   : >> { %6784 = vmatpush3.msra.mxu0 %v9780_v56  ;;  %6819 = vmatpush3.msra.mxu1 %v9780_v56  ;;  %p7502_p0 = pnand (%p4693_p12), %p7501_p13, %p7722_p4 }
 0x53b   : >> { %6785 = vmatprep.subr.mxu0 %v7599_v50  ;;  %6820 = vmatprep.subr.mxu1 %v7599_v50  ;;  %v4708_v45 = vmul.f32 %v4706_v35, %v9913_v58 }
 0x53c   : >> { %6786 = vmatpush3.msra.mxu0 %v9773_v63  ;;  %6821 = vmatpush3.msra.mxu1 %v9773_v63  ;;  %v10052_v63 = vld [vmem:[#allocation6 + $0x98] sm:$0xff] (%p4693_p12)  ;;  %p7503_p1 = pneg (%p4693_p12), %p7502_p0 }
 0x53d   : >> { %6787 = vmatprep.subr.mxu0 %v7599_v50  ;;  %6822 = vmatprep.subr.mxu1 %v7599_v50  ;;  %v4709_v60 = vadd.f32 %v4708_v45, %v9918_v1 }
 0x53e   : >> { %6788 = vmatpush3.msra.mxu0 %v9768_v20  ;;  %6823 = vmatpush3.msra.mxu1 %v9768_v20 }
 0x53f   : >> { %6789 = vmatprep.subr.mxu0 %v7599_v50  ;;  %6824 = vmatprep.subr.mxu1 %v7599_v50  ;;  %v4711_v61 = vrot.slane %v4709_v60, 7  ;;  %v4741_v0 = vsel %vm4740_vm5, %v9928_v48, %v4709_v60 }
 0x540   : >> { %6790 = vmatpush3.msra.mxu0 %v9763_v7  ;;  %6825 = vmatpush3.msra.mxu1 %v9763_v7  ;;  %v10049_v7 = vld [vmem:[#allocation6 + $0x18] sm:$0xff] (%p4693_p12) }
 0x541   : >> { %6791 = vmatprep.subr.mxu0 %v7599_v50  ;;  %6826 = vmatprep.subr.mxu1 %v7599_v50  ;;  %v4713_v34 = vmul.f32 %v4711_v61, %v9913_v58  ;;  %v4994_v57 = vsub.f32 (%p4693_p12), 0.0, %v10049_v7 }
 0x542   : >> { %6792 = vmatpush3.msra.mxu0 %v9757_v47  ;;  %6827 = vmatpush3.msra.mxu1 %v9757_v47 }
 0x543   : >> { %6793 = vmatprep.subr.mxu0 %v7599_v50  ;;  %6828 = vmatprep.subr.mxu1 %v7599_v50  ;;  %v4714_v8 = vadd.f32 %v4713_v34, %v9918_v1 }
 0x544   : >> { %6794 = vmatpush3.msra.mxu0 %v9752_v12  ;;  %6829 = vmatpush3.msra.mxu1 %v9752_v12 }
 0x545   : >> { %6795 = vmatprep.subr.mxu0 %v7599_v50  ;;  %6830 = vmatprep.subr.mxu1 %v7599_v50  ;;  %v4716_v17 = vrot.slane %v4714_v8, 7  ;;  %v4743_v14 = vsel %vm4742_vm6, %v4741_v0, %v4714_v8 }
 0x546   : >> { %6796 = vmatpush3.msra.mxu0 %v9747_v41  ;;  %6831 = vmatpush3.msra.mxu1 %v9747_v41  ;;  %v10046_v41 = vld [vmem:[#allocation6 + $0x90] sm:$0xff] (%p4693_p12) }
 0x547   : >> { %6797 = vmatprep.subr.mxu0 %v7599_v50  ;;  %6832 = vmatprep.subr.mxu1 %v7599_v50  ;;  %v4718_v10 = vmul.f32 %v4716_v17, %v9913_v58  ;;  %v5009_v20 = vsub.f32 (%p4693_p12), 0.0, %v10046_v41 }
 0x548   : >> { %6798 = vmatpush3.msra.mxu0 %v9740_v62  ;;  %6833 = vmatpush3.msra.mxu1 %v9740_v62 }
 0x549   : >> { %6799 = vmatprep.subr.mxu0 %v7599_v50  ;;  %6834 = vmatprep.subr.mxu1 %v7599_v50  ;;  %v4719_v11 = vadd.f32 %v4718_v10, %v9918_v1  ;;  %v5059_v32 = vmul.f32 (%p4693_p12), 1.442695, %v5009_v20 }
 0x54a   : >> { %6800 = vmatpush3.msra.mxu0 %v9735_v51  ;;  %6835 = vmatpush3.msra.mxu1 %v9735_v51  ;;  %v10044_v51 = vld [vmem:[#allocation6 + $0x10] sm:$0xff] (%p4693_p12) }
 0x54b   : >> { %6801 = vmatprep.subr.mxu0 %v7599_v50  ;;  %6836 = vmatprep.subr.mxu1 %v7599_v50  ;;  %v4721_v3 = vrot.slane %v4719_v11, 7  ;;  %v4745_v42 = vsel %vm4744_vm7, %v4743_v14, %v4719_v11  ;;  %v4993_v47 = vsub.f32 (%p4693_p12), 0.0, %v10044_v51 }
 0x54c   : >> { %6802 = vmatpush3.msra.mxu0 %v9730_v31  ;;  %6837 = vmatpush3.msra.mxu1 %v9730_v31 }
 0x54d   : >> { %6803 = vmatprep.subr.mxu0 %v7599_v50  ;;  %6838 = vmatprep.subr.mxu1 %v7599_v50  ;;  %v4723_v19 = vmul.f32 %v4721_v3, %v9913_v58  ;;  %v5027_v56 = vmul.f32 (%p4693_p12), 1.442695, %v4993_v47 }
 0x54e   : >> { %6804 = vmatpush3.msra.mxu0 %v9724_v28  ;;  %6839 = vmatpush3.msra.mxu1 %v9724_v28 }
 0x54f   : >> { %6805 = vmatprep.subr.mxu0 %v7599_v50  ;;  %6840 = vmatprep.subr.mxu1 %v7599_v50  ;;  %v4724_v39 = vadd.f32 %v4723_v19, %v9918_v1 }
 0x550   : >> { %6806 = vmatpush3.msra.mxu0 %v9719_v4  ;;  %6809 = vmatprep.mubr.msk.f32.mxu0 %vm7600_vm4, %v7599_v50 }
 0x551   : >> { %6807 = vmatprep.subr.mxu0 %v7599_v50  ;;  %6841 = vmatpush3.msra.mxu1 %v9719_v4  ;;  %v4726_v29 = vrot.slane %v4724_v39, 7  ;;  %v4746_v33 = vsel %vm1156_vm1, %v4745_v42, %v4724_v39  ;;  %v10041_v4 = vld [vmem:[#allocation6 + $0x88] sm:$0xff] (%p4693_p12) }
 0x552   : >> { %6808 = vmatpush3.msra.mxu0 %v9714_v49  ;;  %6842 = vmatprep.subr.mxu1 %v7599_v50  ;;  %v5008_v31 = vsub.f32 (%p4693_p12), 0.0, %v10041_v4 }
 0x553   : >> { %6843 = vmatpush3.msra.mxu1 %v9714_v49  ;;  %6844 = vmatprep.mubr.msk.f32.mxu1 %vm7600_vm4, %v7599_v50  ;;  %v4728_v21 = vmul.f32 %v4726_v29, %v9913_v58 }
 0x554   : > { %v5057_v12 = vmul.f32 (%p4693_p12), 1.442695, %v5008_v31 }
 0x555   : >> { %v4729_v55 = vadd.f32 %v4728_v21, %v9918_v1  ;;  %v6159_v21 = vld [vmem:[%s4753_s0 + $0x8] sm:$0xff] }
 0x557   : >> { %v4731_v30 = vrot.slane %v4729_v55, 7  ;;  %v4748_v13 = vsel %vm4747_vm8, %v4746_v33, %v4729_v55 }
 0x559   : >> { %v4733_v27 = vmul.f32 %v4731_v30, %v9913_v58 }
 0x55b   : >> { %v4734_v6 = vadd.f32 %v4733_v27, %v9918_v1 }
 0x55d   : >> { %v4736_v37 = vrot.slane %v4734_v6, 7  ;;  %v4750_v53 = vsel %vm4749_vm9, %v4748_v13, %v4734_v6  ;;  %v10032_v13 = vld [vmem:[#allocation6] sm:$0xff] (%p4693_p12) }
 0x55f   : >> { %v4738_v15 = vmul.f32 %v4736_v37, %v9913_v58  ;;  %v5350_v37 = vld [vmem:[%s10351_s10] sm:$0xff] (%p4693_p12) }
 0x560   : > { %6847 = vmatprep.subr.mxu0 (%p4693_p12), %v5350_v37  ;;  %6897 = vmatprep.subr.mxu1 (%p4693_p12), %v5350_v37 }
 0x561   : >> { %v4739_v43 = vadd.f32 %v4738_v15, %v9918_v1  ;;  %v4991_v15 = vsub.f32 (%p4693_p12), 0.0, %v10032_v13 }
 0x563   : >> { %v4752_v25 = vsel %vm4751_vm10, %v4750_v53, %v4739_v43  ;;  %v4834_v24 = vrot.slane %v4739_v43, 7  ;;  %v10035_v53 = vld [vmem:[#allocation6 + $0x80] sm:$0xff] (%p4693_p12) }
 0x564   : >> { %v4755_v40 = vmul.f32 %v4754_v38, %v4752_v25  ;;  %v5007_v43 = vsub.f32 (%p4693_p12), 0.0, %v10035_v53  ;;  %v10038_v38 = vld [vmem:[#allocation6 + $0x8] sm:$0xff] (%p4693_p12)  ;;  %v5010_v25 = vsub.f32 (%p4693_p12), 0.0, %v10052_v63 }
 0x565   : >> { %v4836_v52 = vmul.f32 %v6155_v54, %v4834_v24  ;;  %v4992_v49 = vsub.f32 (%p4693_p12), 0.0, %v10038_v38  ;;  %v10058_v24 = vld [vmem:[#allocation6 + $0xa0] sm:$0xff] (%p4693_p12) }
 0x566   : >> { %6810 = vmatmul.mubr.f32.vlgmr.msra.gmra.mxu0 %v4755_v40  ;;  %v5055_v28 = vmul.f32 (%p4693_p12), 1.442695, %v5007_v43  ;;  %v5029_v40 = vmul.f32 (%p4693_p12), 1.442695, %v4994_v57 }
 0x567   : >> { %v4837_v36 = vadd.f32 %v6157_v18, %v4836_v52  ;;  %6848 = vmatpush3.msra.mxu0 (%p4693_p12), %v5350_v37  ;;  %v5025_v62 = vmul.f32 (%p4693_p12), 1.442695, %v4992_v49  ;;  %v5061_v52 = vmul.f32 (%p4693_p12), 1.442695, %v5010_v25  ;;  %v5219_v49 = vld [vmem:[#allocation5 + $0x20] sm:$0xff] (%p4693_p12) }
 0x569   : >> { %v4839_v2 = vrot.slane %v4837_v36, 7 }
 0x56b   : >> { %v4841_v59 = vmul.f32 %v6155_v54, %v4839_v2  ;;  %v10063_v2 = vld [vmem:[#allocation6 + $0xa8] sm:$0xff] (%p4693_p12) }
 0x56d   : >> { %v4842_v44 = vadd.f32 %v6157_v18, %v4841_v59  ;;  %v5215_v59 = vld [vmem:[#allocation5] sm:$0xff] (%p4693_p12) }
 0x56f   : >> { %v4844_v5 = vrot.slane %v4842_v44, 7  ;;  %v4873_v35 = vsel %vm4740_vm5, %v4837_v36, %v4842_v44  ;;  %v4995_v36 = vsub.f32 (%p4693_p12), 0.0, %v10055_v26  ;;  %v5011_v44 = vsub.f32 (%p4693_p12), 0.0, %v10058_v24 }
 0x571   : >> { %v4846_v16 = vmul.f32 %v6155_v54, %v4844_v5  ;;  %v10069_v5 = vld [vmem:[%s10350_s9] ss:$0 sm:$0xff] (%p4693_p12) }
 0x573   : >> { %v4847_v23 = vadd.f32 %v6157_v18, %v4846_v16  ;;  %v5031_v16 = vmul.f32 (%p4693_p12), 1.442695, %v4995_v36 }
 0x575   : >> { %v4849_v9 = vrot.slane %v4847_v23, 7  ;;  %v4874_v60 = vsel %vm4742_vm6, %v4873_v35, %v4847_v23  ;;  %v5216_v35 = vld [vmem:[#allocation5 + $0x8] sm:$0xff] (%p4693_p12) }
 0x577   : >> { %v4851_v22 = vmul.f32 %v6155_v54, %v4849_v9  ;;  %v10072_v9 = vld [vmem:[#allocation6 + $0x30] sm:$0xff] (%p4693_p12) }
 0x579   : >> { %v4852_v50 = vadd.f32 %v6157_v18, %v4851_v22 }
 0x57b   : >> { %v4854_v58 = vrot.slane %v4852_v50, 7  ;;  %v4875_v8 = vsel %vm4744_vm7, %v4874_v60, %v4852_v50  ;;  %v5012_v50 = vsub.f32 (%p4693_p12), 0.0, %v10063_v2  ;;  %v4997_v60 = vsub.f32 (%p4693_p12), 0.0, %v10072_v9 }
 0x57d   : >> { %v4856_v1 = vmul.f32 %v6155_v54, %v4854_v58  ;;  %v10075_v58 = vld [vmem:[#allocation6 + $0xb0] sm:$0xff] (%p4693_p12) }
 0x57f   : >> { %v4857_v46 = vadd.f32 %v6157_v18, %v4856_v1  ;;  %v5231_v1 = vld [vmem:[#allocation5 + $0x80] sm:$0xff] (%p4693_p12) }
 0x581   : >> { %v4859_v48 = vrot.slane %v4857_v46, 7  ;;  %v4876_v10 = vsel %vm1156_vm1, %v4875_v8, %v4857_v46  ;;  %v5013_v8 = vsub.f32 (%p4693_p12), 0.0, %v10075_v58 }
 0x583   : >> { %v4861_v45 = vmul.f32 %v6155_v54, %v4859_v48  ;;  %v5254_v48 = vmul.f32 (%p4693_p12), %v10069_v5, %v5215_v59 }
 0x585   : >> { %v4862_v61 = vadd.f32 %v6157_v18, %v4861_v45  ;;  %v5065_v45 = vmul.f32 (%p4693_p12), 1.442695, %v5012_v50 }
 0x587   : >> { %v4864_v34 = vrot.slane %v4862_v61, 7  ;;  %v4877_v19 = vsel %vm4747_vm8, %v4876_v10, %v4862_v61  ;;  %v5270_v10 = vmul.f32 (%p4693_p12), %v10069_v5, %v5231_v1 }
 0x589   : >> { %v4866_v17 = vmul.f32 %v6155_v54, %v4864_v34  ;;  %v5232_v34 = vld [vmem:[#allocation5 + $0x88] sm:$0xff] (%p4693_p12) }
 0x58b   : >> { %v4867_v11 = vadd.f32 %v6157_v18, %v4866_v17 }
 0x58d   : >> { %v4869_v3 = vrot.slane %v4867_v11, 7  ;;  %v4878_v29 = vsel %vm4749_vm9, %v4877_v19, %v4867_v11  ;;  %v5217_v11 = vld [vmem:[#allocation5 + $0x10] sm:$0xff] (%p4693_p12) }
 0x58e   : > { %v5256_v43 = vmul.f32 (%p4693_p12), %v10069_v5, %v5217_v11 }
 0x58f   : >> { %v4871_v39 = vmul.f32 %v6155_v54, %v4869_v3  ;;  %v5023_v54 = vmul.f32 (%p4693_p12), 1.442695, %v4991_v15  ;;  %v5035_v3 = vmul.f32 (%p4693_p12), 1.442695, %v4997_v60 }
 0x591   : >> { %v4872_v0 = vadd.f32 %v6157_v18, %v4871_v39  ;;  %7364 = vpow2.f32 (%p4693_p12), %v5023_v54  ;;  %v10060_v18 = vld [vmem:[#allocation6 + $0x28] sm:$0xff] (%p4693_p12)  ;;  %v5234_v54 = vld [vmem:[#allocation5 + $0x98] sm:$0xff] (%p4693_p12) }
 0x592   : > { %7366 = vpow2.f32 (%p4693_p12), %v5055_v28  ;;  %v4996_v23 = vsub.f32 (%p4693_p12), 0.0, %v10060_v18  ;;  %v5067_v28 = vmul.f32 (%p4693_p12), 1.442695, %v5013_v8 }
 0x593   : >> { %v4879_v14 = vsel %vm4751_vm10, %v4878_v29, %v4872_v0  ;;  %v4956_v55 = vrot.slane %v4872_v0, 7   ;;  %7368 = vpow2.f32 (%p4693_p12), %v5025_v62  ;;  %v5255_v0 = vmul.f32 (%p4693_p12), %v10069_v5, %v5216_v35 }
 0x594   : >> { %v4882_v30 = vmul.f32 %v6159_v21, %v4879_v14  ;;  %7370 = vpow2.f32 (%p4693_p12), %v5057_v12  ;;  %v5033_v46 = vmul.f32 (%p4693_p12), 1.442695, %v4996_v23  ;;  %v10082_v21 = vld [vmem:[#allocation6 + $0x38] sm:$0xff] (%p4693_p12)  ;;  %v5258_v23 = vmul.f32 (%p4693_p12), %v10069_v5, %v5219_v49 }
 0x595   : >> { %v10525_v22 = vmov %v4956_v55  ;;  %4958 = vst [vmem:[#allocation2] sm:$0x1] (%p4693_p12), %v4956_v55  ;;  %7372 = vpow2.f32 (%p4693_p12), %v5027_v56  ;;  %v4998_v20 = vsub.f32 (%p4693_p12), 0.0, %v10082_v21 }
 0x596   : >> { %6845 = vmatmul.mubr.f32.vlgmr.msra.gmra.mxu1 %v4882_v30  ;;  %7374 = vpow2.f32 (%p4693_p12), %v5059_v32  ;;  %v5063_v22 = vmul.f32 (%p4693_p12), 1.442695, %v5011_v44 }
 0x597   : > { %6898 = vmatpush3.msra.mxu1 (%p4693_p12), %v5350_v37  ;;  %7376 = vpow2.f32 (%p4693_p12), %v5029_v40  ;;  %v10095_v40 = vld [vmem:[#allocation6 + $0xb8] sm:$0xff] (%p4693_p12)  ;;  %v5037_v8 = vmul.f32 (%p4693_p12), 1.442695, %v4998_v20 }
 0x598   : > { %7378 = vpow2.f32 (%p4693_p12), %v5061_v52 }
 0x599   : > { %7380 = vpow2.f32 (%p4693_p12), %v5031_v16  ;;  %v5273_v16 = vmul.f32 (%p4693_p12), %v10069_v5, %v5234_v54  ;;  %v10123_v54 = vld [vmem:[#allocation6 + $0x50] sm:$0xff] (%p4693_p12) }
 0x59a   : > { %7382 = vpow2.f32 (%p4693_p12), %v5063_v22 }
 0x59b   : > { %7384 = vpow2.f32 (%p4693_p12), %v5033_v46 }
 0x59c   : > { %7386 = vpow2.f32 (%p4693_p12), %v5065_v45  ;;  %v5235_v45 = vld [vmem:[#allocation5 + $0xa0] sm:$0xff] (%p4693_p12) }
 0x59d   : > { %7388 = vpow2.f32 (%p4693_p12), %v5035_v3 }
 0x59e   : > { %v7365_v17 = vpop.eup (%p4693_p12), %7364 }
 0x59f   : > { %v7367_v19 = vpop.eup (%p4693_p12), %7366  ;;  %v5087_v39 = vadd.f32 (%p4693_p12), 1.0, %v7365_v17  ;;  %v5014_v17 = vsub.f32 (%p4693_p12), 0.0, %v10095_v40 }
 0x5a0   : > { %v7369_v14 = vpop.eup (%p4693_p12), %7368  ;;  %v5103_v30 = vadd.f32 (%p4693_p12), 1.0, %v7367_v19 }
 0x5a1   : > { %v7371_v37 = vpop.eup (%p4693_p12), %7370  ;;  %7390 = vrcp.f32 (%p4693_p12), %v5087_v39  ;;  %v5088_v15 = vadd.f32 (%p4693_p12), 1.0, %v7369_v14  ;;  %v10110_v39 = vld [vmem:[#allocation6 + $0xc0] sm:$0xff] (%p4693_p12) }
 0x5a2   : > { %7392 = vrcp.f32 (%p4693_p12), %v5103_v30  ;;  %v5104_v62 = vadd.f32 (%p4693_p12), 1.0, %v7371_v37  ;;  %v7373_v56 = vpop.eup (%p4693_p12), %7372  ;;  %v5274_v30 = vmul.f32 (%p4693_p12), %v10069_v5, %v5235_v45  ;;  %v5015_v20 = vsub.f32 (%p4693_p12), 0.0, %v10110_v39 }
 0x5a3   : > { %7394 = vrcp.f32 (%p4693_p12), %v5088_v15  ;;  %v7375_v52 = vpop.eup (%p4693_p12), %7374  ;;  %v5089_v36 = vadd.f32 (%p4693_p12), 1.0, %v7373_v56 }
 0x5a4   : > { %7396 = vrcp.f32 (%p4693_p12), %v5104_v62  ;;  %v7377_v22 = vpop.eup (%p4693_p12), %7376  ;;  %v5105_v46 = vadd.f32 (%p4693_p12), 1.0, %v7375_v52 }
 0x5a5   : > { %7398 = vpow2.f32 (%p4693_p12), %v5067_v28  ;;  %v7379_v60 = vpop.eup (%p4693_p12), %7378 }
 0x5a6   : > { %7400 = vrcp.f32 (%p4693_p12), %v5089_v36  ;;  %v5106_v19 = vadd.f32 (%p4693_p12), 1.0, %v7379_v60  ;;  %v10128_v36 = vld [vmem:[#allocation6 + $0xd0] sm:$0xff] (%p4693_p12) }
 0x5a7   : > { %7402 = vrcp.f32 (%p4693_p12), %v5105_v46 }
 0x626   : >> { %v4822_v42 = vpop.f32.mrf.mxu0 }
 0x627   : >> { %4827 = vst.msk [vmem:[%s4826_s1] sm:$0xff] %vm529_vm2, %v4822_v42 }
 0x628   : >> { %v6811_v27 = vpop.f32.mrf.mxu0 }
 0x629   : > { %v5271_v27 = vmul.f32 (%p4693_p12), %v10069_v5, %v5232_v34  ;;  %v5220_v34 = vld [vmem:[#allocation5 + $0x28] sm:$0xff] (%p4693_p12) }
 0x62a   : > { %v5259_v15 = vmul.f32 (%p4693_p12), %v10069_v5, %v5220_v34  ;;  %v5017_v34 = vsub.f32 (%p4693_p12), 0.0, %v10128_v36 }
 0x654   : > { %4695 = sbr.rel (!%p4693_p12) target bundleno = 1330 (0x532), region = 134 }
 0x656   : >> { %v4949_v33 = vpop.f32.mrf.mxu1 }
 0x657   : >> { %6161 = vst.msk [vmem:[%s4826_s1 + $0x8] sm:$0xff] %vm529_vm2, %v4949_v33  ;;  %v5233_v33 = vld [vmem:[#allocation5 + $0x90] sm:$0xff] (%p4693_p12) }
 0x658   : >> { %v6846_v6 = vpop.f32.mrf.mxu1  ;;  %v5272_v32 = vmul.f32 (%p4693_p12), %v10069_v5, %v5233_v33 }
 0x659   : > { %v5218_v6 = vld [vmem:[#allocation5 + $0x18] sm:$0xff] }
 0x65a   : > { %v5257_v25 = vmul.f32 %v10069_v5, %v5218_v6 }
 0x65e   : > { %v5183_v61 = vld [vmem:[#allocation4] sm:$0xff]  ;;  %v5184_v42 = vld [vmem:[#allocation4 + $0x8] sm:$0xff]  ;;  %v5185_v47 = vld [vmem:[#allocation4 + $0x10] sm:$0xff] }
 0x65f   : > { %v5199_v29 = vld [vmem:[#allocation4 + $0x80] sm:$0xff]  ;;  %v10084_v55 = vadd.f32 %v5254_v48, %v5183_v61  ;;  %v5200_v12 = vld [vmem:[#allocation4 + $0x88] sm:$0xff]  ;;  %v10091_v57 = vadd.f32 %v5255_v0, %v5184_v42  ;;  %v5201_v59 = vld [vmem:[#allocation4 + $0x90] sm:$0xff]  ;;  %v10101_v1 = vadd.f32 %v5256_v43, %v5185_v47  ;;  %v5090_v61 = vadd.f32 1.0, %v7377_v22 }
 0x660   : > { %v10088_v31 = vadd.f32 %v5270_v10, %v5199_v29  ;;  %v5186_v44 = vld [vmem:[#allocation4 + $0x18] sm:$0xff]  ;;  %v10099_v50 = vadd.f32 %v5271_v27, %v5200_v12  ;;  %v5187_v35 = vld [vmem:[#allocation4 + $0x20] sm:$0xff]  ;;  %v10106_v11 = vadd.f32 %v5272_v32, %v5201_v59  ;;  %v7381_v29 = vpop.eup %7380  ;;  %v10117_v42 = vld [vmem:[#allocation6 + $0x48] sm:$0xff]  ;;  %v5069_v47 = vmul.f32 1.442695, %v5014_v17 }
 0x661   : > { %v5202_v48 = vld [vmem:[#allocation4 + $0x98] sm:$0xff]  ;;  %v10104_v10 = vld [vmem:[#allocation6 + $0x40] sm:$0xff]  ;;  %v10108_v3 = vadd.f32 %v5257_v25, %v5186_v44  ;;  %7404 = vrcp.f32 %v5090_v61  ;;  %v10114_v14 = vadd.f32 %v5258_v23, %v5187_v35  ;;  %v10119_v27 = vld [vmem:[#allocation6 + $0xc8] sm:$0xff]  ;;  %v7383_v33 = vpop.eup %7382  ;;  %v5091_v6 = vadd.f32 1.0, %v7381_v29 }
 0x662   : > { %v10112_v0 = vadd.f32 %v5273_v16, %v5202_v48  ;;  %7406 = vrcp.f32 %v5106_v19  ;;  %v5203_v37 = vld [vmem:[#allocation4 + $0xa0] sm:$0xff]  ;;  %v4999_v43 = vsub.f32 0.0, %v10104_v10  ;;  %v7385_v49 = vpop.eup %7384  ;;  %v5107_v28 = vadd.f32 1.0, %v7383_v33  ;;  %v5188_v62 = vld [vmem:[#allocation4 + $0x28] sm:$0xff]  ;;  %v10138_v35 = vld [vmem:[#allocation6 + $0x58] sm:$0xff] }
 0x663   : > { %v5236_v12 = vld [vmem:[#allocation5 + $0xa8] sm:$0xff]  ;;  %7408 = vpow2.f32 %v5037_v8  ;;  %v7387_v56 = vpop.eup %7386  ;;  %v5092_v32 = vadd.f32 1.0, %v7385_v49  ;;  %v5000_v25 = vsub.f32 0.0, %v10117_v42  ;;  %v5016_v52 = vsub.f32 0.0, %v10119_v27  ;;  %v10141_v8 = vld [vmem:[#allocation6 + $0xd8] sm:$0xff] }
 0x664   : > { %7410 = vrcp.f32 %v5091_v6  ;;  %v10130_v59 = vadd.f32 %v5274_v30, %v5203_v37  ;;  %v5108_v44 = vadd.f32 1.0, %v7387_v56  ;;  %v5001_v16 = vsub.f32 0.0, %v10123_v54  ;;  %v7389_v23 = vpop.eup %7388  ;;  %v10153_v56 = vld [vmem:[#allocation6 + $0xe0] sm:$0xff] }
 0x665   : > { %7412 = vrcp.f32 %v5107_v28  ;;  %v10133_v22 = vadd.f32 %v5259_v15, %v5188_v62  ;;  %v10136_v46 = vmul.f32 %v10069_v5, %v5236_v12  ;;  %v5039_v48 = vmul.f32 1.442695, %v4999_v43  ;;  %v7391_v45 = vpop.eup %7390  ;;  %v10146_v43 = vld [vmem:[#allocation6 + $0x60] sm:$0xff] }
 0x666   : > { %7414 = vrcp.f32 %v5092_v32  ;;  %v5093_v60 = vadd.f32 1.0, %v7389_v23  ;;  %v5071_v61 = vmul.f32 1.442695, %v5015_v20  ;;  %v7393_v17 = vpop.eup %7392  ;;  %v5151_v19 = vmul.f32 %v7391_v45, %v10032_v13 }
 0x667   : > { %7416 = vrcp.f32 %v5108_v44  ;;  %v5041_v29 = vmul.f32 1.442695, %v5000_v25  ;;  %v5073_v30 = vmul.f32 1.442695, %v5016_v52  ;;  %v7395_v33 = vpop.eup %7394  ;;  %v5167_v6 = vmul.f32 %v7393_v17, %v10035_v53 }
 0x668   : > { %7418 = vpow2.f32 %v5069_v47  ;;  %v5043_v37 = vmul.f32 1.442695, %v5001_v16  ;;  %v5002_v15 = vsub.f32 0.0, %v10138_v35  ;;  %v7397_v49 = vpop.eup %7396  ;;  %v5318_v28 = vmul.f32 %v10084_v55, %v5151_v19  ;;  %v5221_v55 = vld [vmem:[#allocation5 + $0x30] sm:$0xff] }
 0x669   : > { %7420 = vrcp.f32 %v5093_v60  ;;  %v5152_v62 = vmul.f32 %v7395_v33, %v10038_v38  ;;  %v5018_v13 = vsub.f32 0.0, %v10141_v8  ;;  %v7399_v12 = vpop.eup %7398  ;;  %v5334_v47 = vmul.f32 %v10088_v31, %v5167_v6 }
 0x66a   : > { %7422 = vpow2.f32 %v5039_v48  ;;  %v5168_v20 = vmul.f32 %v7397_v49, %v10041_v4  ;;  %v5075_v53 = vmul.f32 1.442695, %v5017_v34  ;;  %v7401_v32 = vpop.eup %7400  ;;  %6849 = vmatprep.mubr.msk.f32.mxu0 %vm529_vm2, %v5318_v28  ;;  %v5109_v52 = vadd.f32 1.0, %v7399_v12  ;;  %v10168_v34 = vld [vmem:[#allocation6 + $0x68] sm:$0xff] }
 0x66b   : > { %7424 = vpow2.f32 %v5071_v61  ;;  %v5319_v25 = vmul.f32 %v10091_v57, %v5152_v62  ;;  %v5003_v38 = vsub.f32 0.0, %v10146_v43  ;;  %v7403_v44 = vpop.eup %7402  ;;  %6873 = vmatprep.mubr.msk.f32.mxu1 %vm529_vm2, %v5334_v47  ;;  %v5153_v4 = vmul.f32 %v7401_v32, %v10044_v51  ;;  %v10182_v47 = vld [vmem:[#allocation6 + $0xe8] sm:$0xff] }
 0x66c   : > { %7426 = vpow2.f32 %v5041_v29  ;;  %v5335_v31 = vmul.f32 %v10099_v50, %v5168_v20  ;;  %v5045_v16 = vmul.f32 1.442695, %v5002_v15  ;;  %v5169_v48 = vmul.f32 %v7403_v44, %v10046_v41  ;;  %v5204_v29 = vld [vmem:[#allocation4 + $0xa8] sm:$0xff] }
 0x66d   : > { %7428 = vpow2.f32 %v5073_v30  ;;  %6850 = vmatmul.mubr.msk.f32.vlgmr.msra.gmra.mxu0 %vm529_vm2, %v5319_v25  ;;  %v5077_v57 = vmul.f32 1.442695, %v5018_v13  ;;  %v5019_v45 = vsub.f32 0.0, %v10153_v56  ;;  %v5320_v61 = vmul.f32 %v10101_v1, %v5153_v4  ;;  %v5237_v30 = vld [vmem:[#allocation5 + $0xb0] sm:$0xff] }
 0x66e   : > { %v7405_v23 = vpop.eup %7404  ;;  %7430 = vrcp.f32 %v5109_v52  ;;  %6874 = vmatmul.mubr.msk.f32.vlgmr.msra.gmra.mxu1 %vm529_vm2, %v5335_v31  ;;  %v5260_v51 = vmul.f32 %v10069_v5, %v5221_v55  ;;  %v5336_v19 = vmul.f32 %v10106_v11, %v5169_v48  ;;  %v5047_v33 = vmul.f32 1.442695, %v5003_v38  ;;  %v5222_v38 = vld [vmem:[#allocation5 + $0x38] sm:$0xff]  ;;  %v5205_v4 = vld [vmem:[#allocation4 + $0xb0] sm:$0xff] }
 0x66f   : > { %v7407_v60 = vpop.eup %7406  ;;  %v5154_v50 = vmul.f32 %v7405_v23, %v10049_v7  ;;  %7432 = vpow2.f32 %v5043_v37  ;;  %6852 = vmatprep.mubr.msk.f32.mxu0 %vm529_vm2, %v5320_v61  ;;  %v5079_v15 = vmul.f32 1.442695, %v5019_v45  ;;  %v5004_v28 = vsub.f32 0.0, %v10168_v34  ;;  %v10195_v23 = vld [vmem:[#allocation6 + $0x70] sm:$0xff] }
 0x670   : > { %v7409_v17 = vpop.eup %7408  ;;  %v5170_v41 = vmul.f32 %v7407_v60, %v10052_v63  ;;  %7434 = vpow2.f32 %v5075_v53  ;;  %6876 = vmatprep.mubr.msk.f32.mxu1 %vm529_vm2, %v5336_v19  ;;  %v5189_v63 = vld [vmem:[#allocation4 + $0x30] sm:$0xff]  ;;  %v5276_v12 = vmul.f32 %v10069_v5, %v5237_v30 }
 0x671   : > { %v7411_v6 = vpop.eup %7410  ;;  %v5321_v1 = vmul.f32 %v10108_v3, %v5154_v50  ;;  %v5094_v7 = vadd.f32 1.0, %v7409_v17  ;;  %7436 = vpow2.f32 %v5045_v16  ;;  %v5307_v3 = vadd.f32 %v10136_v46, %v5204_v29  ;;  %v5190_v17 = vld [vmem:[#allocation4 + $0x38] sm:$0xff] }
 0x672   : > { %v7413_v37 = vpop.eup %7412  ;;  %v5337_v49 = vmul.f32 %v10112_v0, %v5170_v41  ;;  %v5155_v11 = vmul.f32 %v7411_v6, %v10055_v26  ;;  %7438 = vpow2.f32 %v5077_v57  ;;  %v5049_v53 = vmul.f32 1.442695, %v5004_v28 }
 0x673   : > { %v7415_v62 = vpop.eup %7414  ;;  %6853 = vmatmul.mubr.msk.f32.gmra.mxu0 %vm529_vm2, %v5321_v1  ;;  %v5171_v13 = vmul.f32 %v7413_v37, %v10058_v24  ;;  %7440 = vrcp.f32 %v5094_v7  ;;  %v5292_v46 = vadd.f32 %v5260_v51, %v5189_v63  ;;  %v5261_v57 = vmul.f32 %v10069_v5, %v5222_v38  ;;  %v5238_v1 = vld [vmem:[#allocation5 + $0xb8] sm:$0xff]  ;;  %v5223_v63 = vld [vmem:[#allocation5 + $0x40] sm:$0xff] }
 0x674   : > { %v7417_v20 = vpop.eup %7416  ;;  %6877 = vmatmul.mubr.msk.f32.gmra.mxu1 %vm529_vm2, %v5337_v49  ;;  %v5322_v26 = vmul.f32 %v10114_v14, %v5155_v11  ;;  %v5156_v0 = vmul.f32 %v7415_v62, %v10060_v18  ;;  %7442 = vpow2.f32 %v5047_v33  ;;  %v5020_v14 = vsub.f32 0.0, %v10182_v47  ;;  %v10202_v33 = vld [vmem:[#allocation6 + $0xf0] sm:$0xff]  ;;  %v10206_v62 = vld [vmem:[#allocation6 + $0xf8] sm:$0xff] }
 0x675   : > { %v7419_v32 = vpop.eup %7418  ;;  %v5338_v25 = vmul.f32 %v10130_v59, %v5171_v13  ;;  %v5172_v24 = vmul.f32 %v7417_v20, %v10063_v2  ;;  %7444 = vpow2.f32 %v5079_v15  ;;  %v5308_v61 = vadd.f32 %v5276_v12, %v5205_v4  ;;  %v10204_v15 = vld [vmem:[#allocation6 + $0x78] sm:$0xff] }
 0x676   : > { %v7421_v55 = vpop.eup %7420  ;;  %6855 = vmatprep.mubr.msk.f32.mxu0 %vm529_vm2, %v5322_v26  ;;  %v5323_v52 = vmul.f32 %v10133_v22, %v5156_v0  ;;  %v5110_v44 = vadd.f32 1.0, %v7419_v32  ;;  %7446 = vpow2.f32 %v5049_v53  ;;  %v5005_v41 = vsub.f32 0.0, %v10195_v23 }
 0x677   : > { %v7423_v18 = vpop.eup %7422  ;;  %6879 = vmatprep.mubr.msk.f32.mxu1 %vm529_vm2, %v5338_v25  ;;  %v5339_v31 = vmul.f32 %v5307_v3, %v5172_v24  ;;  %v5157_v59 = vmul.f32 %v7421_v55, %v10072_v9  ;;  %v5081_v9 = vmul.f32 1.442695, %v5020_v14  ;;  %v5293_v11 = vadd.f32 %v5261_v57, %v5190_v17  ;;  %v5239_v3 = vld [vmem:[#allocation5 + $0xc0] sm:$0xff]  ;;  %v5206_v55 = vld [vmem:[#allocation4 + $0xb8] sm:$0xff]  ;;  %v5241_v17 = vld [vmem:[#allocation5 + $0xd0] sm:$0xff] }
 0x678   : > { %v7425_v2 = vpop.eup %7424  ;;  %6856 = vmatmul.mubr.msk.f32.gmra.mxu0 %vm529_vm2, %v5323_v52  ;;  %7448 = vrcp.f32 %v5110_v44  ;;  %v5095_v16 = vadd.f32 1.0, %v7423_v18  ;;  %v5051_v20 = vmul.f32 1.442695, %v5005_v41  ;;  %v5021_v26 = vsub.f32 0.0, %v10202_v33  ;;  %v5207_v57 = vld [vmem:[#allocation4 + $0xc0] sm:$0xff] }
 0x679   : > { %v7427_v22 = vpop.eup %7426  ;;  %6880 = vmatmul.mubr.msk.f32.gmra.mxu1 %vm529_vm2, %v5339_v31  ;;  %v5324_v48 = vmul.f32 %v5292_v46, %v5157_v59  ;;  %v5111_v45 = vadd.f32 1.0, %v7425_v2  ;;  %v5277_v53 = vmul.f32 %v10069_v5, %v5238_v1  ;;  %v5006_v25 = vsub.f32 0.0, %v10204_v15  ;;  %v5240_v31 = vld [vmem:[#allocation5 + $0xc8] sm:$0xff] }
 0x67a   : > { %v7429_v60 = vpop.eup %7428  ;;  %7450 = vrcp.f32 %v5095_v16  ;;  %v5096_v50 = vadd.f32 1.0, %v7427_v22  ;;  %v5262_v52 = vmul.f32 %v10069_v5, %v5223_v63  ;;  %v5022_v38 = vsub.f32 0.0, %v10206_v62  ;;  %v5191_v16 = vld [vmem:[#allocation4 + $0x40] sm:$0xff] }
 0x67b   : > { %v7431_v51 = vpop.eup %7430  ;;  %6858 = vmatprep.mubr.msk.f32.mxu0 %vm529_vm2, %v5324_v48  ;;  %7452 = vrcp.f32 %v5111_v45  ;;  %v5112_v19 = vadd.f32 1.0, %v7429_v60  ;;  %v5278_v14 = vmul.f32 %v10069_v5, %v5239_v3  ;;  %v5309_v48 = vadd.f32 %v5277_v53, %v5206_v55  ;;  %v5192_v45 = vld [vmem:[#allocation4 + $0x48] sm:$0xff]  ;;  %v5225_v60 = vld [vmem:[#allocation5 + $0x50] sm:$0xff]  ;;  %v5227_v53 = vld [vmem:[#allocation5 + $0x60] sm:$0xff] }
 0x67c   : > { %v7433_v29 = vpop.eup %7432  ;;  %v5173_v30 = vmul.f32 %v7431_v51, %v10075_v58  ;;  %7454 = vrcp.f32 %v5096_v50  ;;  %v5224_v58 = vld [vmem:[#allocation5 + $0x48] sm:$0xff]  ;;  %v5053_v50 = vmul.f32 1.442695, %v5006_v25  ;;  %v5279_v51 = vmul.f32 %v10069_v5, %v5240_v31  ;;  %v5193_v3 = vld [vmem:[#allocation4 + $0x50] sm:$0xff]  ;;  %v5243_v55 = vld [vmem:[#allocation5 + $0xe0] sm:$0xff] }
 0x67d   : > { %v7435_v6 = vpop.eup %7434  ;;  %7456 = vrcp.f32 %v5112_v19  ;;  %v5097_v7 = vadd.f32 1.0, %v7433_v29  ;;  %v5263_v18 = vmul.f32 %v10069_v5, %v5224_v58  ;;  %v5085_v19 = vmul.f32 1.442695, %v5022_v38 }
 0x67e   : > { %v7437_v37 = vpop.eup %7436  ;;  %v5340_v49 = vmul.f32 %v5308_v61, %v5173_v30  ;;  %v5113_v28 = vadd.f32 1.0, %v7435_v6  ;;  %7458 = vpow2.f32 %v5081_v9  ;;  %v5294_v29 = vadd.f32 %v5262_v52, %v5191_v16  ;;  %v5208_v30 = vld [vmem:[#allocation4 + $0xc8] sm:$0xff]  ;;  %v5226_v6 = vld [vmem:[#allocation5 + $0x58] sm:$0xff] }
 0x67f   : > { %v7439_v13 = vpop.eup %7438  ;;  %7460 = vrcp.f32 %v5097_v7  ;;  %v5098_v12 = vadd.f32 1.0, %v7437_v37  ;;  %v5310_v7 = vadd.f32 %v5278_v14, %v5207_v57  ;;  %v5295_v37 = vadd.f32 %v5263_v18, %v5192_v45  ;;  %v5210_v14 = vld [vmem:[#allocation4 + $0xd8] sm:$0xff]  ;;  %v5228_v18 = vld [vmem:[#allocation5 + $0x68] sm:$0xff]  ;;  %v5195_v57 = vld [vmem:[#allocation4 + $0x60] sm:$0xff] }
 0x680   : > { %v7441_v0 = vpop.eup %7440  ;;  %6882 = vmatprep.mubr.msk.f32.mxu1 %vm529_vm2, %v5340_v49  ;;  %7462 = vrcp.f32 %v5113_v28  ;;  %v5114_v32 = vadd.f32 1.0, %v7439_v13  ;;  %v5264_v49 = vmul.f32 %v10069_v5, %v5225_v60  ;;  %v5280_v58 = vmul.f32 %v10069_v5, %v5241_v17 }
 0x681   : > { %v7443_v24 = vpop.eup %7442  ;;  %v5158_v46 = vmul.f32 %v7441_v0, %v10082_v21  ;;  %7464 = vrcp.f32 %v5098_v12  ;;  %v5083_v21 = vmul.f32 1.442695, %v5021_v26  ;;  %v5209_v26 = vld [vmem:[#allocation4 + $0xd0] sm:$0xff]  ;;  %v5265_v0 = vmul.f32 %v10069_v5, %v5226_v6 }
 0x682   : > { %v7445_v44 = vpop.eup %7444  ;;  %7466 = vrcp.f32 %v5114_v32  ;;  %v5099_v59 = vadd.f32 1.0, %v7443_v24 }
 0x683   : > { %v7447_v4 = vpop.eup %7446  ;;  %v5325_v2 = vmul.f32 %v5293_v11, %v5158_v46  ;;  %v5115_v22 = vadd.f32 1.0, %v7445_v44  ;;  %7468 = vpow2.f32 %v5051_v20  ;;  %v5242_v11 = vld [vmem:[#allocation5 + $0xd8] sm:$0xff]  ;;  %v5311_v20 = vadd.f32 %v5279_v51, %v5208_v30 }
 0x684   : > { %7470 = vrcp.f32 %v5099_v59  ;;  %v5100_v61 = vadd.f32 1.0, %v7447_v4  ;;  %v5281_v46 = vmul.f32 %v10069_v5, %v5242_v11  ;;  %v5296_v44 = vadd.f32 %v5264_v49, %v5193_v3 }
 0x685   : > { %v7449_v9 = vpop.eup %7448  ;;  %6859 = vmatmul.mubr.msk.f32.gmra.mxu0 %vm529_vm2, %v5325_v2  ;;  %7472 = vrcp.f32 %v5115_v22  ;;  %v5312_v4 = vadd.f32 %v5280_v58, %v5209_v26  ;;  %v5266_v2 = vmul.f32 %v10069_v5, %v5227_v53 }
 0x686   : > { %v5174_v41 = vmul.f32 %v7449_v9, %v10095_v40  ;;  %7474 = vrcp.f32 %v5100_v61  ;;  %v5313_v61 = vadd.f32 %v5281_v46, %v5210_v14  ;;  %v5267_v9 = vmul.f32 %v10069_v5, %v5228_v18  ;;  %v5246_v14 = vld [vmem:[#allocation5 + $0xf8] sm:$0xff] }
 0x687   : > { %v7451_v1 = vpop.eup %7450  ;;  %7476 = vpow2.f32 %v5083_v21  ;;  %v5298_v6 = vadd.f32 %v5266_v2, %v5195_v57 }
 0x688   : > { %v7453_v63 = vpop.eup %7452  ;;  %v5341_v28 = vmul.f32 %v5309_v48, %v5174_v41  ;;  %v5159_v13 = vmul.f32 %v7451_v1, %v10104_v10  ;;  %7478 = vpow2.f32 %v5053_v50  ;;  %v5194_v10 = vld [vmem:[#allocation4 + $0x58] sm:$0xff]  ;;  %v5211_v50 = vld [vmem:[#allocation4 + $0xe0] sm:$0xff] }
 0x689   : > { %v7455_v40 = vpop.eup %7454  ;;  %v5175_v12 = vmul.f32 %v7453_v63, %v10110_v39  ;;  %7480 = vpow2.f32 %v5085_v19  ;;  %v5297_v48 = vadd.f32 %v5265_v0, %v5194_v10  ;;  %v5196_v19 = vld [vmem:[#allocation4 + $0x68] sm:$0xff] }
 0x68a   : > { %v7457_v32 = vpop.eup %7456  ;;  %6883 = vmatmul.mubr.msk.f32.gmra.mxu1 %vm529_vm2, %v5341_v28  ;;  %v5326_v25 = vmul.f32 %v5294_v29, %v5159_v13  ;;  %v5160_v24 = vmul.f32 %v7455_v40, %v10117_v42  ;;  %v5299_v28 = vadd.f32 %v5267_v9, %v5196_v19  ;;  %v5351_v19 = vld [vmem:[%s7742_s26] sm:$0xff] }
 0x68b   : > { %v7459_v52 = vpop.eup %7458  ;;  %v5342_v38 = vmul.f32 %v5310_v7, %v5175_v12  ;;  %v5176_v39 = vmul.f32 %v7457_v32, %v10119_v27  ;;  %v5282_v27 = vmul.f32 %v10069_v5, %v5243_v55 }
 0x68c   : > { %v7461_v31 = vpop.eup %7460  ;;  %6861 = vmatprep.mubr.msk.f32.mxu0 %vm529_vm2, %v5326_v25  ;;  %v5327_v59 = vmul.f32 %v5295_v37, %v5160_v24  ;;  %v5116_v16 = vadd.f32 1.0, %v7459_v52  ;;  %v5229_v24 = vld [vmem:[#allocation5 + $0x70] sm:$0xff] }
 0x68d   : > { %v7463_v42 = vpop.eup %7462  ;;  %6885 = vmatprep.mubr.msk.f32.mxu1 %vm529_vm2, %v5342_v38  ;;  %v5343_v22 = vmul.f32 %v5311_v20, %v5176_v39  ;;  %v5161_v21 = vmul.f32 %v7461_v31, %v10123_v54  ;;  %v5314_v7 = vadd.f32 %v5282_v27, %v5211_v50  ;;  %v5268_v46 = vmul.f32 %v10069_v5, %v5229_v24  ;;  %v5197_v52 = vld [vmem:[#allocation4 + $0x70] sm:$0xff]  ;;  %v5230_v39 = vld [vmem:[#allocation5 + $0x78] sm:$0xff] }
 0x68e   : > { %v7465_v45 = vpop.eup %7464  ;;  %6862 = vmatmul.mubr.msk.f32.gmra.mxu0 %vm529_vm2, %v5327_v59  ;;  %v5177_v60 = vmul.f32 %v7463_v42, %v10128_v36  ;;  %7482 = vrcp.f32 %v5116_v16  ;;  %v5245_v38 = vld [vmem:[#allocation5 + $0xf0] sm:$0xff]  ;;  %v5269_v2 = vmul.f32 %v10069_v5, %v5230_v39  ;;  %v5198_v42 = vld [vmem:[#allocation4 + $0x78] sm:$0xff] }
 0x68f   : > { %v7467_v51 = vpop.eup %7466  ;;  %6886 = vmatmul.mubr.msk.f32.gmra.mxu1 %vm529_vm2, %v5343_v22  ;;  %v5328_v17 = vmul.f32 %v5296_v44, %v5161_v21  ;;  %v5162_v54 = vmul.f32 %v7465_v45, %v10138_v35  ;;  %v5300_v18 = vadd.f32 %v5268_v46, %v5197_v52  ;;  %v5284_v31 = vmul.f32 %v10069_v5, %v5245_v38  ;;  %v5357_v52 = vld [vmem:[%s7742_s26 + $0x30] sm:$0xff] }
 0x690   : > { %v7469_v41 = vpop.eup %7468  ;;  %v5344_v29 = vmul.f32 %v5312_v4, %v5177_v60  ;;  %v5178_v30 = vmul.f32 %v7467_v51, %v10141_v8  ;;  %v5244_v8 = vld [vmem:[#allocation5 + $0xe8] sm:$0xff]  ;;  %v5213_v4 = vld [vmem:[#allocation4 + $0xf0] sm:$0xff]  ;;  %v5285_v22 = vmul.f32 %v10069_v5, %v5246_v14  ;;  %v5301_v27 = vadd.f32 %v5269_v2, %v5198_v42 }
 0x691   : > { %v7471_v1 = vpop.eup %7470  ;;  %6864 = vmatprep.mubr.msk.f32.mxu0 %vm529_vm2, %v5328_v17  ;;  %v5329_v36 = vmul.f32 %v5297_v48, %v5162_v54  ;;  %v5101_v37 = vadd.f32 1.0, %v7469_v41  ;;  %v5283_v53 = vmul.f32 %v10069_v5, %v5244_v8  ;;  %v5316_v48 = vadd.f32 %v5284_v31, %v5213_v4  ;;  %v5367_v41 = vld [vmem:[%s7742_s26 + $0x80] sm:$0xff]  ;;  %v5354_v8 = vld [vmem:[%s7742_s26 + $0x18] sm:$0xff] }
 0x692   : > { %v7473_v49 = vpop.eup %7472  ;;  %6888 = vmatprep.mubr.msk.f32.mxu1 %vm529_vm2, %v5344_v29  ;;  %v5345_v11 = vmul.f32 %v5313_v61, %v5178_v30  ;;  %v5163_v63 = vmul.f32 %v7471_v1, %v10146_v43  ;;  %v5368_v1 = vld [vmem:[%s7742_s26 + $0x88] sm:$0xff]  ;;  %v5374_v2 = vld [vmem:[%s7742_s26 + $0xb8] sm:$0xff]  ;;  %v5359_v42 = vld [vmem:[%s7742_s26 + $0x40] sm:$0xff] }
 0x693   : > { %v7475_v35 = vpop.eup %7474  ;;  %6865 = vmatmul.mubr.msk.f32.gmra.mxu0 %vm529_vm2, %v5329_v36  ;;  %v5179_v13 = vmul.f32 %v7473_v49, %v10153_v56  ;;  %7484 = vrcp.f32 %v5101_v37  ;;  %v5212_v56 = vld [vmem:[#allocation4 + $0xe8] sm:$0xff] }
 0x694   : > { %v7477_v3 = vpop.eup %7476  ;;  %6889 = vmatmul.mubr.msk.f32.gmra.mxu1 %vm529_vm2, %v5345_v11  ;;  %v5330_v58 = vmul.f32 %v5298_v6, %v5163_v63  ;;  %v5164_v40 = vmul.f32 %v7475_v35, %v10168_v34  ;;  %v5315_v34 = vadd.f32 %v5283_v53, %v5212_v56  ;;  %v5352_v6 = vld [vmem:[%s7742_s26 + $0x8] sm:$0xff]  ;;  %v5353_v63 = vld [vmem:[%s7742_s26 + $0x10] sm:$0xff] }
 0x695   : > { %v7479_v12 = vpop.eup %7478  ;;  %v5346_v20 = vmul.f32 %v5314_v7, %v5179_v13  ;;  %v5117_v26 = vadd.f32 1.0, %v7477_v3  ;;  %v5369_v35 = vld [vmem:[%s7742_s26 + $0x90] sm:$0xff] }
 0x696   : > { %v7481_v0 = vpop.eup %7480  ;;  %6867 = vmatprep.mubr.msk.f32.mxu0 %vm529_vm2, %v5330_v58  ;;  %v5331_v43 = vmul.f32 %v5299_v28, %v5164_v40  ;;  %v5102_v32 = vadd.f32 1.0, %v7479_v12  ;;  %v5370_v40 = vld [vmem:[%s7742_s26 + $0x98] sm:$0xff] }
 0x697   : > { %6891 = vmatprep.mubr.msk.f32.mxu1 %vm529_vm2, %v5346_v20  ;;  %7486 = vrcp.f32 %v5117_v26  ;;  %v5118_v25 = vadd.f32 1.0, %v7481_v0 }
 0x698   : > { %6868 = vmatmul.mubr.msk.f32.gmra.mxu0 %vm529_vm2, %v5331_v43  ;;  %7488 = vrcp.f32 %v5102_v32  ;;  %v5355_v43 = vld [vmem:[%s7742_s26 + $0x20] sm:$0xff] }
 0x699   : > { %7490 = vrcp.f32 %v5118_v25  ;;  %v5371_v32 = vld [vmem:[%s7742_s26 + $0xa0] sm:$0xff]  ;;  %v5356_v25 = vld [vmem:[%s7742_s26 + $0x28] sm:$0xff] }
 0x69b   : > { %v7483_v10 = vpop.eup %7482 }
 0x69c   : > { %v5180_v55 = vmul.f32 %v7483_v10, %v10182_v47  ;;  %v5214_v47 = vld [vmem:[#allocation4 + $0xf8] sm:$0xff] }
 0x69d   : > { %v5317_v61 = vadd.f32 %v5285_v22, %v5214_v47 }
 0x69e   : > { %v5347_v44 = vmul.f32 %v5315_v34, %v5180_v55  ;;  %v5372_v34 = vld [vmem:[%s7742_s26 + $0xa8] sm:$0xff] }
 0x6a0   : > { %v7485_v59 = vpop.eup %7484  ;;  %6892 = vmatmul.mubr.msk.f32.gmra.mxu1 %vm529_vm2, %v5347_v44  ;;  %v5358_v44 = vld [vmem:[%s7742_s26 + $0x38] sm:$0xff] }
 0x6a1   : > { %v5165_v16 = vmul.f32 %v7485_v59, %v10195_v23 }
 0x6a3   : > { %v5332_v21 = vmul.f32 %v5300_v18, %v5165_v16  ;;  %v5373_v18 = vld [vmem:[%s7742_s26 + $0xb0] sm:$0xff] }
 0x6a4   : > { %v7487_v57 = vpop.eup %7486 }
 0x6a5   : > { %v7489_v45 = vpop.eup %7488  ;;  %6870 = vmatprep.mubr.msk.f32.mxu0 %vm529_vm2, %v5332_v21  ;;  %v5181_v60 = vmul.f32 %v7487_v57, %v10202_v33  ;;  %v5360_v57 = vld [vmem:[%s7742_s26 + $0x48] sm:$0xff] }
 0x6a6   : > { %v7491_v50 = vpop.eup %7490  ;;  %v5166_v23 = vmul.f32 %v7489_v45, %v10204_v15  ;;  %v5375_v45 = vld [vmem:[%s7742_s26 + $0xc0] sm:$0xff] }
 0x6a7   : > { %v5348_v9 = vmul.f32 %v5316_v48, %v5181_v60  ;;  %v5182_v5 = vmul.f32 %v7491_v50, %v10206_v62 }
 0x6a8   : > { %v5333_v51 = vmul.f32 %v5301_v27, %v5166_v23  ;;  %v5376_v23 = vld [vmem:[%s7742_s26 + $0xc8] sm:$0xff] }
 0x6a9   : > { %6894 = vmatprep.mubr.msk.f32.mxu1 %vm529_vm2, %v5348_v9  ;;  %v5349_v17 = vmul.f32 %v5317_v61, %v5182_v5 }
 0x6aa   : > { %6871 = vmatmul.mubr.msk.f32.gmra.mxu0 %vm529_vm2, %v5333_v51  ;;  %v5361_v51 = vld [vmem:[%s7742_s26 + $0x50] sm:$0xff] }
 0x6ab   : > { %6895 = vmatmul.mubr.msk.f32.gmra.mxu1 %vm529_vm2, %v5349_v17 }
 0x72d   : > { %v6851_v54 = vpop.f32.mrf.mxu0 }
 0x72e   : > { %v6875_v33 = vpop.f32.mrf.mxu1  ;;  %v5551_v37 = vadd.f32 %v6851_v54, %v5352_v6  ;;  %v5378_v6 = vld [vmem:[%s7742_s26 + $0xd8] sm:$0xff] }
 0x72f   : > { %v5545_v29 = vpop.f32.mrf.mxu0  ;;  %v5631_v49 = vadd.f32 %v6875_v33, %v5368_v1  ;;  %v5363_v1 = vld [vmem:[%s7742_s26 + $0x60] sm:$0xff] }
 0x730   : > { %v5625_v15 = vpop.f32.mrf.mxu1  ;;  %v5546_v30 = vadd.f32 %v5545_v29, %v5351_v19  ;;  %v5362_v19 = vld [vmem:[%s7742_s26 + $0x58] sm:$0xff] }
 0x731   : > { %v5626_v62 = vadd.f32 %v5625_v15, %v5367_v41  ;;  %v5377_v41 = vld [vmem:[%s7742_s26 + $0xd0] sm:$0xff] }
 0x732   : > { %5704 = vxpose.xlu0.b32.start [1/16] (narrow) %v5546_v30, 8 }
 0x733   : > { %v6854_v36 = vpop.f32.mrf.mxu0  ;;  %5736 = vxpose.xlu1.b32.start [1/16] (narrow) %v5626_v62, 8 }
 0x734   : > { %v6878_v7 = vpop.f32.mrf.mxu1  ;;  %v5561_v20 = vadd.f32 %v6854_v36, %v5354_v8 }
 0x735   : > { %v5555_v11 = vpop.f32.mrf.mxu0  ;;  %v5641_v26 = vadd.f32 %v6878_v7, %v5370_v40 }
 0x736   : > { %v5635_v28 = vpop.f32.mrf.mxu1  ;;  %5705 = vxpose.xlu0.b32.cont [2/16] (narrow) %v5551_v37, 8  ;;  %v5556_v13 = vadd.f32 %v5555_v11, %v5353_v63  ;;  %v5379_v63 = vld [vmem:[%s7742_s26 + $0xe0] sm:$0xff] }
 0x737   : > { %5737 = vxpose.xlu1.b32.cont [2/16] (narrow) %v5631_v49, 8  ;;  %v5636_v3 = vadd.f32 %v5635_v28, %v5369_v35  ;;  %v5364_v49 = vld [vmem:[%s7742_s26 + $0x68] sm:$0xff] }
 0x738   : > { %v6857_v58 = vpop.f32.mrf.mxu0 }
 0x739   : > { %v6881_v12 = vpop.f32.mrf.mxu1  ;;  %v5571_v10 = vadd.f32 %v6857_v58, %v5356_v25  ;;  %v5365_v58 = vld [vmem:[%s7742_s26 + $0x70] sm:$0xff] }
 0x73a   : > { %5706 = vxpose.xlu0.b32.cont [3/16] (narrow) %v5556_v13, 8  ;;  %v5565_v0 = vpop.f32.mrf.mxu0  ;;  %v5651_v55 = vadd.f32 %v6881_v12, %v5372_v34  ;;  %v5380_v13 = vld [vmem:[%s7742_s26 + $0xe8] sm:$0xff]  ;;  %v5381_v12 = vld [vmem:[%s7742_s26 + $0xf0] sm:$0xff] }
 0x73b   : > { %5738 = vxpose.xlu1.b32.cont [3/16] (narrow) %v5636_v3, 8  ;;  %v5645_v53 = vpop.f32.mrf.mxu1  ;;  %v5566_v56 = vadd.f32 %v5565_v0, %v5355_v43  ;;  %v5366_v43 = vld [vmem:[%s7742_s26 + $0x78] sm:$0xff] }
 0x73c   : > { %v5646_v24 = vadd.f32 %v5645_v53, %v5371_v32  ;;  %v5382_v32 = vld [vmem:[%s7742_s26 + $0xf8] sm:$0xff]  ;;  %s6205_s26 = sshll.u32 %s7576_s21, 7  ;;  %s7504_s21 = sshll.u32 %s7601_s3, 4  ;;  %s7505_s21 = int_to_ptr.vmem [resolvable:$false] %s7504_s21 }
 0x73d   : > { %s5840_s2 = scalar_lea.hbm %s10356_s15, %s6205_s26  ;;  %s7506_s4 = scalar_lea.vmem %s7505_s21, 256 }
 0x73e   : > { %5707 = vxpose.xlu0.b32.cont [4/16] (narrow) %v5561_v20, 8  ;;  %p7507_p2 = scmp.lt.s32.totalorder %s5843_s25, %s7505_s21  ;;  %p7508_p3 = scmp.lt.s32.totalorder %s7506_s4, %s7500_s27 }
 0x73f   : > { %5739 = vxpose.xlu1.b32.cont [4/16] (narrow) %v5641_v26, 8 }
 0x740   : > { %p7509_p5 = por %p7508_p3, %p7507_p2 }
 0x742   : > { %5708 = vxpose.xlu0.b32.cont [5/16] (narrow) %v5566_v56, 8  ;;  %p7510_p6 = pnand %p7509_p5, %p7503_p1 }
 0x743   : > { %5740 = vxpose.xlu1.b32.cont [5/16] (narrow) %v5646_v24, 8 }
 0x745   : > { %v6860_v46 = vpop.f32.mrf.mxu0 }
 0x746   : > { %5709 = vxpose.xlu0.b32.cont [6/16] (narrow) %v5571_v10, 8  ;;  %v5581_v59 = vadd.f32 %v6860_v46, %v5358_v44 }
 0x747   : > { %v5575_v38 = vpop.f32.mrf.mxu0  ;;  %5741 = vxpose.xlu1.b32.cont [6/16] (narrow) %v5651_v55, 8 }
 0x748   : > { %v5576_v39 = vadd.f32 %v5575_v38, %v5357_v52 }
 0x74a   : > { %v6884_v14 = vpop.f32.mrf.mxu1  ;;  %5710 = vxpose.xlu0.b32.cont [7/16] (narrow) %v5576_v39, 8 }
 0x74b   : > { %v5661_v21 = vadd.f32 %v6884_v14, %v5374_v2 }
 0x74c   : > { %v5655_v31 = vpop.f32.mrf.mxu1 }
 0x74d   : > { %v5656_v4 = vadd.f32 %v5655_v31, %v5373_v18 }
 0x74e   : > { %v6863_v16 = vpop.f32.mrf.mxu0  ;;  %5711 = vxpose.xlu0.b32.cont [8/16] (narrow) %v5581_v59, 8 }
 0x74f   : > { %5742 = vxpose.xlu1.b32.cont [7/16] (narrow) %v5656_v4, 8  ;;  %v6887_v22 = vpop.f32.mrf.mxu1  ;;  %v5591_v61 = vadd.f32 %v6863_v16, %v5360_v57 }
 0x750   : > { %v5585_v47 = vpop.f32.mrf.mxu0  ;;  %v5671_v17 = vadd.f32 %v6887_v22, %v5376_v23 }
 0x751   : > { %v5586_v48 = vadd.f32 %v5585_v47, %v5359_v42  ;;  %v5665_v27 = vpop.f32.mrf.mxu1 }
 0x752   : > { %v5666_v50 = vadd.f32 %v5665_v27, %v5375_v45 }
 0x753   : > { %5743 = vxpose.xlu1.b32.cont [8/16] (narrow) %v5661_v21, 8  ;;  %5712 = vxpose.xlu0.b32.cont [9/16] (narrow) %v5586_v48, 8  ;;  %v6866_v60 = vpop.f32.mrf.mxu0 }
 0x754   : > { %v6890_v9 = vpop.f32.mrf.mxu1  ;;  %v5601_v15 = vadd.f32 %v6866_v60, %v5362_v19 }
 0x755   : > { %v5595_v5 = vpop.f32.mrf.mxu0  ;;  %v5681_v7 = vadd.f32 %v6890_v9, %v5378_v6 }
 0x756   : > { %v5596_v54 = vadd.f32 %v5595_v5, %v5361_v51  ;;  %v5675_v33 = vpop.f32.mrf.mxu1 }
 0x757   : > { %5744 = vxpose.xlu1.b32.cont [9/16] (narrow) %v5666_v50, 8  ;;  %5713 = vxpose.xlu0.b32.cont [10/16] (narrow) %v5591_v61, 8  ;;  %v5676_v30 = vadd.f32 %v5675_v33, %v5377_v41 }
 0x758   : > { %v6869_v29 = vpop.f32.mrf.mxu0 }
 0x759   : > { %v5611_v28 = vadd.f32 %v6869_v29, %v5364_v49 }
 0x75a   : > { %v5605_v62 = vpop.f32.mrf.mxu0 }
 0x75b   : > { %5745 = vxpose.xlu1.b32.cont [10/16] (narrow) %v5671_v17, 8  ;;  %5714 = vxpose.xlu0.b32.cont [11/16] (narrow) %v5596_v54, 8  ;;  %v5606_v37 = vadd.f32 %v5605_v62, %v5363_v1 }
 0x75f   : > { %5746 = vxpose.xlu1.b32.cont [11/16] (narrow) %v5676_v30, 8  ;;  %5715 = vxpose.xlu0.b32.cont [12/16] (narrow) %v5601_v15, 8 }
 0x760   : > { %v6893_v36 = vpop.f32.mrf.mxu1 }
 0x761   : > { %v5691_v8 = vadd.f32 %v6893_v36, %v5380_v13 }
 0x762   : > { %v5685_v11 = vpop.f32.mrf.mxu1 }
 0x763   : > { %5747 = vxpose.xlu1.b32.cont [12/16] (narrow) %v5681_v7, 8  ;;  %5716 = vxpose.xlu0.b32.cont [13/16] (narrow) %v5606_v37, 8  ;;  %v5686_v35 = vadd.f32 %v5685_v11, %v5379_v63 }
 0x767   : > { %5748 = vxpose.xlu1.b32.cont [13/16] (narrow) %v5686_v35, 8  ;;  %5717 = vxpose.xlu0.b32.cont [14/16] (narrow) %v5611_v28, 8 }
 0x76a   : > { %v6872_v3 = vpop.f32.mrf.mxu0 }
 0x76b   : > { %v6896_v40 = vpop.f32.mrf.mxu1  ;;  %5749 = vxpose.xlu1.b32.cont [14/16] (narrow) %v5691_v8, 8  ;;  %v5621_v56 = vadd.f32 %v6872_v3, %v5366_v43 }
 0x76c   : > { %v5615_v20 = vpop.f32.mrf.mxu0  ;;  %v5701_v25 = vadd.f32 %v6896_v40, %v5382_v32 }
 0x76d   : > { %v5616_v26 = vadd.f32 %v5615_v20, %v5365_v58  ;;  %v5695_v0 = vpop.f32.mrf.mxu1 }
 0x76e   : > { %v5696_v53 = vadd.f32 %v5695_v0, %v5381_v12 }
 0x76f   : > { %5718 = vxpose.xlu0.b32.cont [15/16] (narrow) %v5616_v26, 8 }
 0x770   : > { %5750 = vxpose.xlu1.b32.cont [15/16] (narrow) %v5696_v53, 8 }
 0x773   : > { %5719 = vxpose.xlu0.b32.end [16/16] (narrow) %v5621_v56, 8 }
 0x774   : > { %5751 = vxpose.xlu1.b32.end [16/16] (narrow) %v5701_v25, 8 }
 0x7b3   : > { %v5720_v24 = vpop.trf.xlu0 }
 0x7b4   : > { %v5752_v34 = vpop.trf.xlu1  ;;  %v5768_v10 = vmul.f32 0.70710677, %v5720_v24  ;;  %v5814_v11 = vmul.f32 0.5, %v5720_v24 }
 0x7b5   : > { %v5769_v46 = vmul.f32 0.70710677, %v5752_v34  ;;  %v5815_v28 = vmul.f32 0.5, %v5752_v34 }
 0x7b6   : > { %v5770_v55 = vand.u32 2147483647, %v5768_v10  ;;  %vm5808_vm11 = vcmp.ge.f32.partialorder %v5768_v10, 0.0 }
 0x7b7   : > { %v5771_v52 = vand.u32 2147483647, %v5769_v46  ;;  %vm5809_vm12 = vcmp.ge.f32.partialorder %v5769_v46, 0.0 }
 0x7b8   : > { %v5772_v38 = vmul.f32 0.3275911, %v5770_v55  ;;  %v5796_v18 = vsub.f32 0.0, %v5770_v55 }
 0x7b9   : > { %v5773_v39 = vmul.f32 0.3275911, %v5771_v52  ;;  %v5797_v31 = vsub.f32 0.0, %v5771_v52 }
 0x7ba   : > { %v5774_v44 = vadd.f32 1.0, %v5772_v38  ;;  %v5798_v59 = vmul.f32 %v5796_v18, %v5770_v55 }
 0x7bb   : > { %v5775_v14 = vadd.f32 1.0, %v5773_v39  ;;  %v5799_v4 = vmul.f32 %v5797_v31, %v5771_v52 }
 0x7bc   : > { %7492 = vrcp.f32 %v5774_v44  ;;  %v5800_v22 = vmul.f32 1.442695, %v5798_v59 }
 0x7bd   : > { %7494 = vrcp.f32 %v5775_v14  ;;  %v5802_v21 = vmul.f32 1.442695, %v5799_v4 }
 0x7be   : > { %7496 = vpow2.f32 %v5800_v22 }
 0x7bf   : > { %7498 = vpow2.f32 %v5802_v21 }
 0x7c9   : > { %v7493_v2 = vpop.eup %7492 }
 0x7ca   : > { %v7495_v16 = vpop.eup %7494  ;;  %v5778_v42 = vmul.f32 1.0614054, %v7493_v2 }
 0x7cb   : > { %v5779_v47 = vmul.f32 1.0614054, %v7495_v16  ;;  %v7497_v41 = vpop.eup %7496 }
 0x7cc   : > { %v6195_v48 = vadd.f32 -1.4531521, %v5778_v42  ;;  %v7499_v15 = vpop.eup %7498 }
 0x7cd   : > { %v6196_v57 = vadd.f32 -1.4531521, %v5779_v47 }
 0x7ce   : > { %v5782_v27 = vmul.f32 %v7493_v2, %v6195_v48 }
 0x7cf   : > { %v5783_v45 = vmul.f32 %v7495_v16, %v6196_v57 }
 0x7d0   : > { %v5784_v60 = vadd.f32 1.4214138, %v5782_v27 }
 0x7d1   : > { %v5785_v61 = vadd.f32 1.4214138, %v5783_v45 }
 0x7d2   : > { %v5786_v50 = vmul.f32 %v7493_v2, %v5784_v60 }
 0x7d3   : > { %v5787_v23 = vmul.f32 %v7495_v16, %v5785_v61 }
 0x7d4   : > { %v6197_v9 = vadd.f32 -0.28449672, %v5786_v50 }
 0x7d5   : > { %v6198_v5 = vadd.f32 -0.28449672, %v5787_v23 }
 0x7d6   : > { %v5790_v51 = vmul.f32 %v7493_v2, %v6197_v9 }
 0x7d7   : > { %v5791_v17 = vmul.f32 %v7495_v16, %v6198_v5 }
 0x7d8   : > { %v5792_v54 = vadd.f32 0.2548296, %v5790_v51 }
 0x7d9   : > { %v5793_v19 = vadd.f32 0.2548296, %v5791_v17 }
 0x7da   : > { %v5794_v33 = vmul.f32 %v7493_v2, %v5792_v54 }
 0x7db   : > { %v5795_v29 = vmul.f32 %v7495_v16, %v5793_v19 }
 0x7dc   : > { %v5804_v30 = vmul.f32 %v7497_v41, %v5794_v33 }
 0x7dd   : > { %v5805_v6 = vmul.f32 %v7499_v15, %v5795_v29 }
 0x7de   : > { %v5806_v62 = vsub.f32 1.0, %v5804_v30 }
 0x7df   : > { %v5807_v1 = vsub.f32 1.0, %v5805_v6 }
 0x7e0   : > { %v5810_v36 = vsub.f32 0.0, %v5806_v62 }
 0x7e1   : > { %v5811_v7 = vsub.f32 0.0, %v5807_v1 }
 0x7e2   : > { %v5812_v37 = vsel %vm5808_vm11, %v5806_v62, %v5810_v36 }
 0x7e3   : > { %v5813_v49 = vsel %vm5809_vm12, %v5807_v1, %v5811_v7  ;;  %v5816_v63 = vadd.f32 1.0, %v5812_v37 }
 0x7e4   : > { %v5817_v35 = vadd.f32 1.0, %v5813_v49 }
 0x7e5   : > { %v5818_v13 = vmul.f32 %v5816_v63, %v5814_v11 }
 0x7e6   : > { %v5819_v8 = vmul.f32 %v5817_v35, %v5815_v28 }
 0x7e8   : > { %v5822_v3 = vcombine.low %v5818_v13, %v5819_v8 }
 0x7ea   : > { %5824 = vst [vmem:[%s512_s29] sm:$0xff] %v5822_v3 }
 0x7eb   : > { %7513 = shalt.err (!%p7510_p6)
}
 0x7ec   : > { %s7514_s26 = scalar_lea.hbm %s5840_s2, 128  ;;  %s7518_s0 = scalar_lea.hbm %s10356_s15, 256 }
 0x7ed   : > { %p7515_p7 = scmp.ne.s32.totalorder %s5840_s2, %s7514_s26  ;;  %p7519_p11 = scmp.lt.s32.totalorder %s5840_s2, %s10356_s15 }
 0x7ee   : > { %p7520_p12 = scmp.lt.s32.totalorder %s7518_s0, %s7514_s26 }
 0x7ef   : > { %p7516_p9 = pnand %p7515_p7, %p7722_p4 }
 0x7f0   : > { %p7521_p13 = por %p7520_p12, %p7519_p11 }
 0x7f1   : > { %p7517_p10 = pneg %p7516_p9 }
 0x7f3   : > { %p7522_p0 = pnand %p7521_p13, %p7517_p10 }
 0x7f5   : > { %7525 = shalt.err (!%p7522_p0)
}
 0x7f6   : > { %6899 = dma.vmem_to_hbm [thread:$0]  (%p7722_p4), %s5843_s25, 128, %s5840_s2, %s5826_s18  }
 0x7f7 PF: > { %s10527_s3 = sld [smem:[#allocation13_spill]]  ;;  %p6905_p1 = scmp.ge.s32.totalorder %s7584_s23, 2 }
 0x7f9   : > { %p6902_p2 = pnand %p6905_p1, %p7729_p8 }
 0x7fb   : > { %p6903_p3 = pneg %p6902_p2 }
 0x7fd   : > { %s5854_s4 = sand.u32 1, %s10527_s3  }
 0x7fe   : > { %s5855_s27 = scalar_lea.sflag [#allocation11], %s5854_s4 }
 0x7ff   : > { %7559 = dma.done.wait (%p6903_p3), %s5855_s27, 128  }
 0x800   : > { %7561 = vsyncadd (%p6903_p3), %s5855_s27, 4294967168  ;;  %s28_s23 = sadd.s32 1, %s7584_s23   ;;  %s10528_s28 = sld [smem:[#allocation14_spill]] }
 0x801   : > { %p25_p5 = scmp.ge.s32.totalorder %s28_s23, 4   ;;  %s10529_s18 = smov %s7568_s19 }
 0x802   : > { %s10530_s19 = smov %s7572_s20  ;;  %s10531_s20 = smov %s7735_s16 }
 0x803   : > { %s10532_s21 = smov %s7580_s22  ;;  %27 = sbr.rel (!%p25_p5) target bundleno = 10 (0xa), region = 145 }
 0x806   : > { %s10533_s22 = smov %s10528_s28 }
 0x808   :  { %5860 = vsyncpa [#allocation11], 1 }
 0x809   :  { %5862 = vsyncpa [#allocation11 + $0x1], 1 }

</bundles_post_ra>
